<compile_context>
chip_gen: v7x
topology: tpu7x:2x2x1
jax: 0.10.0
libtpu: 0.0.40
codegen_flags: <defaults>
</compile_context>

<pallas_src>
import jax
import jax.numpy as jnp
from jax.experimental import pallas as pl
from jax.experimental.pallas import tpu as pltpu

# ---------------- problem sizes (small, TPU-friendly) ----------------
B = 2                 # batch
L = 16                # sequence length
H = 128               # hidden size (lane-aligned)
T = 8                 # num_generated_triples (decoder queries)
NUM_CLASSES = 4
C = NUM_CLASSES + 1   # class logits dim (num_classes + "no-relation")
CPAD = 128            # lane-padded class-logit width (sliced back to C)
NH = 8                # span heads: sub_s, sub_e, obj_s, obj_e, asp_s, asp_e, op_s, op_e
NHH = NH * H          # 1024 folded span-head hidden dim
TL = T * L            # 128  lane-dense span-row width (one row per (b, head))
VOCAB = 100
NEG_INF_FILL = -10000.0
OUT_ROWS = B * T + B * NH          # 32 rows: [class rows | span rows]

# -------- packed constant buffer (f32, width 128) row layout --------
ROW_BG = 0                          # (1, H)   GCN bias
ROW_BC = ROW_BG + 1                 # (1, CPAD) class-head bias (lane padded)
ROW_B12 = ROW_BC + 1                # (NH, H)  b1[h] + b2[h]  (inside tanh)
ROW_W3 = ROW_B12 + NH               # (NH, H)  w3 rows
ROW_B3 = ROW_W3 + NH                # (NH, 128) b3[h] broadcast over lanes
ROW_QUERY = ROW_B3 + NH             # (B*T, H) decoder queries, pre-tiled per batch
CONST_ROWS = ROW_QUERY + B * T      # 42

# -------- packed per-call mask buffer (f32, width 128) row layout --------
MROW_SPAN = 0                       # (B, T*L)  span-head mask, lane j = t*L + l
MROW_SCORE = MROW_SPAN + B          # (B*T, 128) block-diag x attention mask (lanes :B*L)
MASK_ROWS = MROW_SCORE + B * T      # 18

HEAD_NAMES = ("sub_start", "sub_end", "obj_start", "obj_end",
              "aspect_start", "aspect_end", "opinion_start", "opinion_end")


def _span_dtype():
    # bf16 tanh/broadcast-add uses the native bf16 EUP/VPU on v6e/v7x;
    # v5* has no bf16 EUP, so keep the span-head math in f32 there.
    try:
        kind = jax.devices()[0].device_kind.lower()
        if "v5" in kind:
            return jnp.float32
    except Exception:
        pass
    return jnp.bfloat16


SPAN_DTYPE = _span_dtype()


# =====================================================================
# Single fused kernel: GCN encoder -> block-masked cross-attn decoder
#   -> fused class head + folded span heads (MXU w3 reduction)
# =====================================================================
def fused_kernel(adj_ref, x_ref, wsq_ref, w2f_ref, whid_ref, consts_ref,
                 masks_ref, out_ref, m1_scr, m2_scr):
    f32 = jnp.float32
    bf16 = jnp.bfloat16

    # ---------- packed small-buffer slices (all static) ----------
    bg = consts_ref[ROW_BG:ROW_BG + 1, :]                          # (1, H)
    bc = consts_ref[ROW_BC:ROW_BC + 1, :]                          # (1, CPAD)
    q_all = consts_ref[ROW_QUERY:ROW_QUERY + B * T, :]             # (B*T, H)
    score_mask = masks_ref[MROW_SCORE:MROW_SCORE + B * T, :B * L]  # (B*T, B*L)

    # ---------- GCN encoder: enc = relu((A_b @ X_b) @ Wg + bg) ----------
    wg = wsq_ref[:, 0:H]                                           # (H, H) bf16
    ax_parts = []
    for b in range(B):                                             # B = 2, unrolled
        ax_parts.append(jnp.dot(adj_ref[b], x_ref[b * L:(b + 1) * L],
                                preferred_element_type=f32))       # (L, H)
    ax = jnp.concatenate(ax_parts, axis=0)                         # (B*L, H)
    enc = jnp.dot(ax.astype(bf16), wg, preferred_element_type=f32) + bg
    enc = jnp.maximum(enc, 0.0)
    enc_b16 = enc.astype(bf16)

    # ---------- decoder: block-masked single cross-attention ----------
    wq = wsq_ref[:, H:2 * H]                                       # (H, H)
    wkv = wsq_ref[:, 2 * H:4 * H]                                  # (H, 2H) = [wk | wv]
    qp = jnp.dot(q_all.astype(bf16), wq, preferred_element_type=f32)   # (B*T, H)
    kv = jnp.dot(enc_b16, wkv, preferred_element_type=f32)             # (B*L, 2H)
    kp = kv[:, 0:H].astype(bf16)                                       # (B*L, H)
    vp = kv[:, H:2 * H].astype(bf16)                                   # (B*L, H)

    scores = jax.lax.dot_general(
        qp.astype(bf16), kp, (((1,), (1,)), ((), ())),
        preferred_element_type=f32) * (1.0 / float(H) ** 0.5)          # (B*T, B*L)
    scores = jnp.where(score_mask == 0.0, NEG_INF_FILL, scores)
    scores = scores - jnp.max(scores, axis=-1, keepdims=True)
    p = jnp.exp(scores)
    p = p / jnp.sum(p, axis=-1, keepdims=True)                         # exact softmax
    hid = jnp.dot(p.astype(bf16), vp, preferred_element_type=f32)      # (B*T, H)
    hid_b16 = hid.astype(bf16)

    # ---------- class head + span-head-1 projection fused: [wc_pad | w1f] ----------
    z = jnp.dot(hid_b16, whid_ref[...], preferred_element_type=f32)    # (B*T, CPAD+NHH)
    cls = z[:, 0:CPAD] + bc                                            # (B*T, CPAD)
    m1_scr[...] = z[:, CPAD:].astype(SPAN_DTYPE)                       # stage in VMEM

    # ---------- span-head-2 projection, straight to VMEM scratch ----------
    m2 = jnp.dot(enc_b16, w2f_ref[...], preferred_element_type=f32)    # (B*L, NHH)
    m2_scr[...] = m2.astype(SPAN_DTYPE)

    # ---------- 8 span heads x B batches ----------
    # tanh in SPAN_DTYPE; the w3 contraction runs on the MXU and yields a
    # lane-dense (1, T*L=128) row per (batch, head) -- no XLU reduction.
    span_rows = []
    for b in range(B):                                                 # unrolled
        mask_row = masks_ref[MROW_SPAN + b:MROW_SPAN + b + 1, :]       # (1, T*L)
        for h in range(NH):                                            # unrolled
            m1_bh = m1_scr[b * T:(b + 1) * T, h * H:(h + 1) * H]       # (T, H)
            m2_bh = m2_scr[b * L:(b + 1) * L, h * H:(h + 1) * H]       # (L, H)
            b12_h = consts_ref[ROW_B12 + h:ROW_B12 + h + 1, :].astype(SPAN_DTYPE)
            s = jnp.tanh(m1_bh[:, None, :] + m2_bh[None, :, :]
                         + b12_h[None, :, :])                          # (T, L, H)
            s2 = s.reshape(TL, H).astype(bf16)                         # (T*L, H)
            w3_h = consts_ref[ROW_W3 + h:ROW_W3 + h + 1, :].astype(bf16)  # (1, H)
            r = jax.lax.dot_general(w3_h, s2, (((1,), (1,)), ((), ())),
                                    preferred_element_type=f32)        # (1, T*L)
            b3_h = consts_ref[ROW_B3 + h:ROW_B3 + h + 1, :]            # (1, T*L)
            r = jnp.where(mask_row == 0.0, NEG_INF_FILL, r + b3_h)
            span_rows.append(r)
    span = jnp.concatenate(span_rows, axis=0)                          # (B*NH, T*L)

    # ---------- single lane-dense output store ----------
    out_ref[...] = jnp.concatenate([cls, span], axis=0)                # (OUT_ROWS, 128)


def _fused_call(adj, x, wsq, w2f, whid, consts, masks):
    vmem = pl.BlockSpec(memory_space=pltpu.MemorySpace.VMEM)
    return pl.pallas_call(
        fused_kernel,
        out_shape=jax.ShapeDtypeStruct((OUT_ROWS, 128), jnp.float32),
        in_specs=[vmem] * 7,
        out_specs=vmem,
        scratch_shapes=[
            pltpu.VMEM((B * T, NHH), SPAN_DTYPE),   # m1 staging
            pltpu.VMEM((B * L, NHH), SPAN_DTYPE),   # m2 staging
        ],
    )(adj, x, wsq, w2f, whid, consts, masks)


# =====================================================================
# Parameter init (deterministic, PyTorch-shaped) + one-time folding
# =====================================================================
def init_params(key):
    ks = jax.random.split(key, 10)
    s = 0.02
    return {
        "emb": jax.random.normal(ks[0], (VOCAB, H), jnp.float32) * s,
        "wg": jax.random.normal(ks[1], (H, H), jnp.float32) * s,
        "bg": jnp.zeros((H,), jnp.float32),
        "query": jax.random.normal(ks[2], (T, H), jnp.float32) * s,
        "wq": jax.random.normal(ks[3], (H, H), jnp.float32) * s,
        "wk": jax.random.normal(ks[4], (H, H), jnp.float32) * s,
        "wv": jax.random.normal(ks[5], (H, H), jnp.float32) * s,
        "wc": jax.random.normal(ks[6], (H, C), jnp.float32) * s,
        "bc": jnp.zeros((C,), jnp.float32),
        # span-head stacks: (metric_1, metric_2, metric_3) triple per head
        "W1": jax.random.normal(ks[7], (NH, H, H), jnp.float32) * s,
        "b1": jnp.zeros((NH, H), jnp.float32),
        "W2": jax.random.normal(ks[8], (NH, H, H), jnp.float32) * s,
        "b2": jnp.zeros((NH, H), jnp.float32),
        "w3": jax.random.normal(ks[9], (NH, H), jnp.float32) * s,
        "b3": jnp.zeros((NH,), jnp.float32),
    }


def prepare_params(p):
    """Pre-cast / pre-fold weights ONCE (outside the jitted forward)."""
    bf16 = jnp.bfloat16
    wsq = jnp.concatenate([p["wg"], p["wq"], p["wk"], p["wv"]], axis=1).astype(bf16)   # (H, 4H)
    w2f = p["W2"].transpose(1, 0, 2).reshape(H, NHH).astype(bf16)                       # (H, NHH)
    wc_pad = jnp.zeros((H, CPAD), jnp.float32).at[:, :C].set(p["wc"])
    w1f = p["W1"].transpose(1, 0, 2).reshape(H, NHH)
    whid = jnp.concatenate([wc_pad, w1f], axis=1).astype(bf16)                          # (H, CPAD+NHH)

    consts = jnp.zeros((CONST_ROWS, 128), jnp.float32)
    consts = consts.at[ROW_BG, :H].set(p["bg"])
    consts = consts.at[ROW_BC, :C].set(p["bc"])
    consts = consts.at[ROW_B12:ROW_B12 + NH, :H].set(p["b1"] + p["b2"])
    consts = consts.at[ROW_W3:ROW_W3 + NH, :H].set(p["w3"])
    consts = consts.at[ROW_B3:ROW_B3 + NH, :].set(
        jnp.broadcast_to(p["b3"][:, None], (NH, 128)))
    consts = consts.at[ROW_QUERY:ROW_QUERY + B * T, :H].set(jnp.tile(p["query"], (B, 1)))

    return {"emb": p["emb"], "wsq": wsq, "w2f": w2f, "whid": whid, "consts": consts}


@jax.jit
def setpred4re_gcn_forward(prep, input_ids, attention_mask, dependency_graph):
    # ----- glue: embedding lookup + per-call mask packing (plain JAX) -----
    x = jnp.take(prep["emb"], input_ids, axis=0).reshape(B * L, H)          # (B*L, H) f32
    maskf = attention_mask.astype(jnp.float32)                              # (B, L)

    span_rows = jnp.tile(maskf, (1, T))                                     # (B, T*L)
    block = jnp.kron(jnp.eye(B, dtype=jnp.float32),
                     jnp.ones((T, L), jnp.float32))                         # (B*T, B*L)
    colm = jnp.broadcast_to(maskf.reshape(1, B * L), (B * T, B * L))
    score = block * colm                                                    # (B*T, B*L)
    score_pad = jnp.zeros((B * T, 128), jnp.float32).at[:, :B * L].set(score)
    masks = jnp.concatenate([span_rows, score_pad], axis=0)                 # (MASK_ROWS, 128)

    out = _fused_call(dependency_graph.astype(jnp.float32), x,
                      prep["wsq"], prep["w2f"], prep["whid"],
                      prep["consts"], masks)

    cls = out[:B * T, :].reshape(B, T, CPAD)[:, :, :C]                      # (B, T, C)
    span = out[B * T:, :].reshape(B, NH, T, L)                              # (B, NH, T, L)

    outputs = {"pred_rel_logits": cls}
    for i, name in enumerate(HEAD_NAMES):
        outputs[name + "_logits"] = span[:, i]                              # (B, T, L)
    return outputs


if __name__ == "__main__":
    key = jax.random.PRNGKey(0)
    kp, k_ids, k_adj = jax.random.split(key, 3)

    raw_params = init_params(kp)
    prep = prepare_params(raw_params)

    input_ids = jax.random.randint(k_ids, (B, L), 0, VOCAB, dtype=jnp.int32)

    # attention mask: batch 0 fully valid, batch 1 has padding on last 5 tokens
    attention_mask = jnp.ones((B, L), jnp.int32)
    attention_mask = attention_mask.at[1, L - 5:].set(0)

    # dependency graph: random symmetric binary adjacency + self loops, row-normalized
    adj = (jax.random.uniform(k_adj, (B, L, L)) > 0.7).astype(jnp.float32)
    adj = jnp.maximum(adj, jnp.transpose(adj, (0, 2, 1)))
    adj = adj + jnp.eye(L, dtype=jnp.float32)[None]
    adj = adj / jnp.sum(adj, axis=-1, keepdims=True)

    outputs = setpred4re_gcn_forward(prep, input_ids, attention_mask, adj)
    jax.block_until_ready(outputs)

    # sanity: shapes + masking applied
    assert outputs["pred_rel_logits"].shape == (B, T, C)
    assert outputs["sub_start_logits"].shape == (B, T, L)
    assert bool(jnp.all(outputs["opinion_end_logits"][1, :, L - 5:] == NEG_INF_FILL))
    assert bool(jnp.all(jnp.isfinite(outputs["pred_rel_logits"])))

    print("KERNEL_OK")
</pallas_src>

<mosaic_0001>
module attributes {stable_mosaic.version = 11 : i64} {
  func.func @fused_kernel(%arg0: memref<2x16x16xf32, #tpu.memory_space<vmem>>, %arg1: memref<32x128xf32, #tpu.memory_space<vmem>>, %arg2: memref<128x512xbf16, #tpu.memory_space<vmem>>, %arg3: memref<128x1024xbf16, #tpu.memory_space<vmem>>, %arg4: memref<128x1152xbf16, #tpu.memory_space<vmem>>, %arg5: memref<42x128xf32, #tpu.memory_space<vmem>>, %arg6: memref<18x128xf32, #tpu.memory_space<vmem>>, %arg7: memref<32x128xf32, #tpu.memory_space<vmem>>, %arg8: memref<16x1024xbf16, #tpu.memory_space<vmem>>, %arg9: memref<32x1024xbf16, #tpu.memory_space<vmem>>) attributes {dimension_semantics = [], scalar_prefetch = 0 : i64, scratch_operands = 2 : i64, tpu.core_type = #tpu.core_type<tc>} {
    %c0 = arith.constant 0 : index
    %c0_0 = arith.constant 0 : index
    %0 = vector.load %arg5[%c0, %c0_0] : memref<42x128xf32, #tpu.memory_space<vmem>>, vector<1x128xf32>
    %c1 = arith.constant 1 : index
    %c0_1 = arith.constant 0 : index
    %1 = vector.load %arg5[%c1, %c0_1] : memref<42x128xf32, #tpu.memory_space<vmem>>, vector<1x128xf32>
    %c26 = arith.constant 26 : index
    %c0_2 = arith.constant 0 : index
    %2 = vector.load %arg5[%c26, %c0_2] : memref<42x128xf32, #tpu.memory_space<vmem>>, vector<16x128xf32>
    %c2 = arith.constant 2 : index
    %c0_3 = arith.constant 0 : index
    %3 = vector.load %arg6[%c2, %c0_3] : memref<18x128xf32, #tpu.memory_space<vmem>>, vector<16x32xf32>
    %c0_4 = arith.constant 0 : index
    %c0_5 = arith.constant 0 : index
    %4 = vector.load %arg2[%c0_4, %c0_5] : memref<128x512xbf16, #tpu.memory_space<vmem>>, vector<128x128xbf16>
    %c0_6 = arith.constant 0 : index
    %c0_7 = arith.constant 0 : index
    %c0_8 = arith.constant 0 : index
    %5 = vector.load %arg0[%c0_6, %c0_7, %c0_8] : memref<2x16x16xf32, #tpu.memory_space<vmem>>, vector<1x16x16xf32>
    %6 = vector.shape_cast %5 : vector<1x16x16xf32> to vector<16x16xf32>
    %c0_9 = arith.constant 0 : index
    %c0_10 = arith.constant 0 : index
    %7 = vector.load %arg1[%c0_9, %c0_10] : memref<32x128xf32, #tpu.memory_space<vmem>>, vector<16x128xf32>
    %cst = arith.constant dense<0.000000e+00> : vector<16x128xf32>
    %8 = tpu.matmul %6, %7, %cst {dimension_numbers = #tpu.dot_dimension_numbers<[1], [0], [0], [1], [0, 0, 1, 1], [], []>} : vector<16x16xf32>, vector<16x128xf32>, vector<16x128xf32> -> vector<16x128xf32>
    %c1_11 = arith.constant 1 : index
    %c0_12 = arith.constant 0 : index
    %c0_13 = arith.constant 0 : index
    %9 = vector.load %arg0[%c1_11, %c0_12, %c0_13] : memref<2x16x16xf32, #tpu.memory_space<vmem>>, vector<1x16x16xf32>
    %10 = vector.shape_cast %9 : vector<1x16x16xf32> to vector<16x16xf32>
    %c16 = arith.constant 16 : index
    %c0_14 = arith.constant 0 : index
    %11 = vector.load %arg1[%c16, %c0_14] : memref<32x128xf32, #tpu.memory_space<vmem>>, vector<16x128xf32>
    %cst_15 = arith.constant dense<0.000000e+00> : vector<16x128xf32>
    %12 = tpu.matmul %10, %11, %cst_15 {dimension_numbers = #tpu.dot_dimension_numbers<[1], [0], [0], [1], [0, 0, 1, 1], [], []>} : vector<16x16xf32>, vector<16x128xf32>, vector<16x128xf32> -> vector<16x128xf32>
    %13 = tpu.concatenate %8, %12 in 0 : vector<16x128xf32>, vector<16x128xf32> -> vector<32x128xf32>
    %14 = arith.truncf %13 : vector<32x128xf32> to vector<32x128xbf16>
    %cst_16 = arith.constant dense<0.000000e+00> : vector<32x128xf32>
    %15 = tpu.matmul %14, %4, %cst_16 {dimension_numbers = #tpu.dot_dimension_numbers<[1], [0], [0], [1], [0, 0, 1, 1], [], []>} : vector<32x128xbf16>, vector<128x128xbf16>, vector<32x128xf32> -> vector<32x128xf32>
    %16 = vector.broadcast %0 : vector<1x128xf32> to vector<32x128xf32>
    %17 = arith.addf %15, %16 : vector<32x128xf32>
    %cst_17 = arith.constant 0.000000e+00 : f32
    %18 = vector.broadcast %cst_17 : f32 to vector<32x128xf32>
    %19 = arith.maximumf %17, %18 : vector<32x128xf32>
    %20 = arith.truncf %19 : vector<32x128xf32> to vector<32x128xbf16>
    %c0_18 = arith.constant 0 : index
    %c128 = arith.constant 128 : index
    %21 = vector.load %arg2[%c0_18, %c128] : memref<128x512xbf16, #tpu.memory_space<vmem>>, vector<128x128xbf16>
    %c0_19 = arith.constant 0 : index
    %c256 = arith.constant 256 : index
    %22 = vector.load %arg2[%c0_19, %c256] : memref<128x512xbf16, #tpu.memory_space<vmem>>, vector<128x256xbf16>
    %23 = arith.truncf %2 : vector<16x128xf32> to vector<16x128xbf16>
    %cst_20 = arith.constant dense<0.000000e+00> : vector<16x128xf32>
    %24 = tpu.matmul %23, %21, %cst_20 {dimension_numbers = #tpu.dot_dimension_numbers<[1], [0], [0], [1], [0, 0, 1, 1], [], []>} : vector<16x128xbf16>, vector<128x128xbf16>, vector<16x128xf32> -> vector<16x128xf32>
    %cst_21 = arith.constant dense<0.000000e+00> : vector<32x256xf32>
    %25 = tpu.matmul %20, %22, %cst_21 {dimension_numbers = #tpu.dot_dimension_numbers<[1], [0], [0], [1], [0, 0, 1, 1], [], []>} : vector<32x128xbf16>, vector<128x256xbf16>, vector<32x256xf32> -> vector<32x256xf32>
    %26 = vector.extract_strided_slice %25 {offsets = [0, 0], sizes = [32, 128], strides = [1, 1]} : vector<32x256xf32> to vector<32x128xf32>
    %27 = arith.truncf %26 : vector<32x128xf32> to vector<32x128xbf16>
    %28 = vector.extract_strided_slice %25 {offsets = [0, 128], sizes = [32, 128], strides = [1, 1]} : vector<32x256xf32> to vector<32x128xf32>
    %29 = arith.truncf %28 : vector<32x128xf32> to vector<32x128xbf16>
    %30 = arith.truncf %24 : vector<16x128xf32> to vector<16x128xbf16>
    %cst_22 = arith.constant dense<0.000000e+00> : vector<16x32xf32>
    %31 = tpu.matmul %30, %27, %cst_22 {dimension_numbers = #tpu.dot_dimension_numbers<[1], [1], [0], [0], [0, 0, 1, 0], [], []>} : vector<16x128xbf16>, vector<32x128xbf16>, vector<16x32xf32> -> vector<16x32xf32>
    %cst_23 = arith.constant 0.0883883461 : f32
    %32 = vector.broadcast %cst_23 : f32 to vector<16x32xf32>
    %33 = arith.mulf %31, %32 : vector<16x32xf32>
    %cst_24 = arith.constant 0.000000e+00 : f32
    %34 = vector.broadcast %cst_24 : f32 to vector<16x32xf32>
    %35 = arith.cmpf oeq, %3, %34 : vector<16x32xf32>
    %cst_25 = arith.constant -1.000000e+04 : f32
    %36 = vector.broadcast %cst_25 : f32 to vector<16x32xf32>
    %37 = arith.select %35, %36, %33 : vector<16x32xi1>, vector<16x32xf32>
    %cst_26 = arith.constant dense<0xFF800000> : vector<16xf32>
    %38 = vector.multi_reduction <maximumf>, %37, %cst_26 [1] : vector<16x32xf32> to vector<16xf32>
    %39 = vector.shape_cast %38 : vector<16xf32> to vector<16x1xf32>
    %40 = vector.broadcast %39 : vector<16x1xf32> to vector<16x32xf32>
    %41 = arith.subf %37, %40 : vector<16x32xf32>
    %42 = math.exp %41 : vector<16x32xf32>
    %cst_27 = arith.constant dense<0.000000e+00> : vector<16xf32>
    %43 = vector.multi_reduction <add>, %42, %cst_27 [1] : vector<16x32xf32> to vector<16xf32>
    %44 = vector.shape_cast %43 : vector<16xf32> to vector<16x1xf32>
    %45 = vector.broadcast %44 : vector<16x1xf32> to vector<16x32xf32>
    %46 = arith.divf %42, %45 : vector<16x32xf32>
    %47 = arith.truncf %46 : vector<16x32xf32> to vector<16x32xbf16>
    %cst_28 = arith.constant dense<0.000000e+00> : vector<16x128xf32>
    %48 = tpu.matmul %47, %29, %cst_28 {dimension_numbers = #tpu.dot_dimension_numbers<[1], [0], [0], [1], [0, 0, 1, 1], [], []>} : vector<16x32xbf16>, vector<32x128xbf16>, vector<16x128xf32> -> vector<16x128xf32>
    %49 = arith.truncf %48 : vector<16x128xf32> to vector<16x128xbf16>
    %c0_29 = arith.constant 0 : index
    %c0_30 = arith.constant 0 : index
    %50 = vector.load %arg4[%c0_29, %c0_30] : memref<128x1152xbf16, #tpu.memory_space<vmem>>, vector<128x1152xbf16>
    %cst_31 = arith.constant dense<0.000000e+00> : vector<16x1152xf32>
    %51 = tpu.matmul %49, %50, %cst_31 {dimension_numbers = #tpu.dot_dimension_numbers<[1], [0], [0], [1], [0, 0, 1, 1], [], []>} : vector<16x128xbf16>, vector<128x1152xbf16>, vector<16x1152xf32> -> vector<16x1152xf32>
    %52 = vector.extract_strided_slice %51 {offsets = [0, 0], sizes = [16, 128], strides = [1, 1]} : vector<16x1152xf32> to vector<16x128xf32>
    %53 = vector.broadcast %1 : vector<1x128xf32> to vector<16x128xf32>
    %54 = arith.addf %52, %53 : vector<16x128xf32>
    %55 = vector.extract_strided_slice %51 {offsets = [0, 128], sizes = [16, 1024], strides = [1, 1]} : vector<16x1152xf32> to vector<16x1024xf32>
    %56 = arith.truncf %55 : vector<16x1024xf32> to vector<16x1024xbf16>
    %c0_32 = arith.constant 0 : index
    %c0_33 = arith.constant 0 : index
    %57 = vector.load %arg8[%c0_32, %c0_33] : memref<16x1024xbf16, #tpu.memory_space<vmem>>, vector<16x1024xbf16>
    tpu.vector_store %arg8[%c0_32, %c0_33], %56 {strides = array<i32>} : memref<16x1024xbf16, #tpu.memory_space<vmem>>, vector<16x1024xbf16>,
    %c0_34 = arith.constant 0 : index
    %c0_35 = arith.constant 0 : index
    %58 = vector.load %arg3[%c0_34, %c0_35] : memref<128x1024xbf16, #tpu.memory_space<vmem>>, vector<128x1024xbf16>
    %cst_36 = arith.constant dense<0.000000e+00> : vector<32x1024xf32>
    %59 = tpu.matmul %20, %58, %cst_36 {dimension_numbers = #tpu.dot_dimension_numbers<[1], [0], [0], [1], [0, 0, 1, 1], [], []>} : vector<32x128xbf16>, vector<128x1024xbf16>, vector<32x1024xf32> -> vector<32x1024xf32>
    %60 = arith.truncf %59 : vector<32x1024xf32> to vector<32x1024xbf16>
    %c0_37 = arith.constant 0 : index
    %c0_38 = arith.constant 0 : index
    %61 = vector.load %arg9[%c0_37, %c0_38] : memref<32x1024xbf16, #tpu.memory_space<vmem>>, vector<32x1024xbf16>
    tpu.vector_store %arg9[%c0_37, %c0_38], %60 {strides = array<i32>} : memref<32x1024xbf16, #tpu.memory_space<vmem>>, vector<32x1024xbf16>,
    %c0_39 = arith.constant 0 : index
    %c0_40 = arith.constant 0 : index
    %62 = vector.load %arg6[%c0_39, %c0_40] : memref<18x128xf32, #tpu.memory_space<vmem>>, vector<1x128xf32>
    %c0_41 = arith.constant 0 : index
    %c0_42 = arith.constant 0 : index
    %63 = vector.load %arg8[%c0_41, %c0_42] : memref<16x1024xbf16, #tpu.memory_space<vmem>>, vector<8x128xbf16>
    %c0_43 = arith.constant 0 : index
    %c0_44 = arith.constant 0 : index
    %64 = vector.load %arg9[%c0_43, %c0_44] : memref<32x1024xbf16, #tpu.memory_space<vmem>>, vector<16x128xbf16>
    %c2_45 = arith.constant 2 : index
    %c0_46 = arith.constant 0 : index
    %65 = vector.load %arg5[%c2_45, %c0_46] : memref<42x128xf32, #tpu.memory_space<vmem>>, vector<1x128xf32>
    %66 = arith.truncf %65 : vector<1x128xf32> to vector<1x128xbf16>
    %67 = vector.shape_cast %63 : vector<8x128xbf16> to vector<8x1x128xbf16>
    %68 = vector.shape_cast %64 : vector<16x128xbf16> to vector<1x16x128xbf16>
    %69 = vector.broadcast %67 : vector<8x1x128xbf16> to vector<8x16x128xbf16>
    %70 = vector.broadcast %68 : vector<1x16x128xbf16> to vector<8x16x128xbf16>
    %71 = arith.addf %69, %70 : vector<8x16x128xbf16>
    %72 = vector.shape_cast %66 : vector<1x128xbf16> to vector<1x1x128xbf16>
    %73 = vector.broadcast %72 : vector<1x1x128xbf16> to vector<8x16x128xbf16>
    %74 = arith.addf %71, %73 : vector<8x16x128xbf16>
    %75 = math.tanh %74 : vector<8x16x128xbf16>
    %76 = vector.shape_cast %75 : vector<8x16x128xbf16> to vector<128x128xbf16>
    %c10 = arith.constant 10 : index
    %c0_47 = arith.constant 0 : index
    %77 = vector.load %arg5[%c10, %c0_47] : memref<42x128xf32, #tpu.memory_space<vmem>>, vector<1x128xf32>
    %78 = arith.truncf %77 : vector<1x128xf32> to vector<1x128xbf16>
    %cst_48 = arith.constant dense<0.000000e+00> : vector<1x128xf32>
    %79 = tpu.matmul %78, %76, %cst_48 {dimension_numbers = #tpu.dot_dimension_numbers<[1], [1], [0], [0], [0, 0, 1, 0], [], []>} : vector<1x128xbf16>, vector<128x128xbf16>, vector<1x128xf32> -> vector<1x128xf32>
    %c18 = arith.constant 18 : index
    %c0_49 = arith.constant 0 : index
    %80 = vector.load %arg5[%c18, %c0_49] : memref<42x128xf32, #tpu.memory_space<vmem>>, vector<1x128xf32>
    %cst_50 = arith.constant 0.000000e+00 : f32
    %81 = vector.broadcast %cst_50 : f32 to vector<1x128xf32>
    %82 = arith.cmpf oeq, %62, %81 : vector<1x128xf32>
    %83 = arith.addf %79, %80 : vector<1x128xf32>
    %cst_51 = arith.constant -1.000000e+04 : f32
    %84 = vector.broadcast %cst_51 : f32 to vector<1x128xf32>
    %85 = arith.select %82, %84, %83 : vector<1x128xi1>, vector<1x128xf32>
    %c0_52 = arith.constant 0 : index
    %c128_53 = arith.constant 128 : index
    %86 = vector.load %arg8[%c0_52, %c128_53] : memref<16x1024xbf16, #tpu.memory_space<vmem>>, vector<8x128xbf16>
    %c0_54 = arith.constant 0 : index
    %c128_55 = arith.constant 128 : index
    %87 = vector.load %arg9[%c0_54, %c128_55] : memref<32x1024xbf16, #tpu.memory_space<vmem>>, vector<16x128xbf16>
    %c3 = arith.constant 3 : index
    %c0_56 = arith.constant 0 : index
    %88 = vector.load %arg5[%c3, %c0_56] : memref<42x128xf32, #tpu.memory_space<vmem>>, vector<1x128xf32>
    %89 = arith.truncf %88 : vector<1x128xf32> to vector<1x128xbf16>
    %90 = vector.shape_cast %86 : vector<8x128xbf16> to vector<8x1x128xbf16>
    %91 = vector.shape_cast %87 : vector<16x128xbf16> to vector<1x16x128xbf16>
    %92 = vector.broadcast %90 : vector<8x1x128xbf16> to vector<8x16x128xbf16>
    %93 = vector.broadcast %91 : vector<1x16x128xbf16> to vector<8x16x128xbf16>
    %94 = arith.addf %92, %93 : vector<8x16x128xbf16>
    %95 = vector.shape_cast %89 : vector<1x128xbf16> to vector<1x1x128xbf16>
    %96 = vector.broadcast %95 : vector<1x1x128xbf16> to vector<8x16x128xbf16>
    %97 = arith.addf %94, %96 : vector<8x16x128xbf16>
    %98 = math.tanh %97 : vector<8x16x128xbf16>
    %99 = vector.shape_cast %98 : vector<8x16x128xbf16> to vector<128x128xbf16>
    %c11 = arith.constant 11 : index
    %c0_57 = arith.constant 0 : index
    %100 = vector.load %arg5[%c11, %c0_57] : memref<42x128xf32, #tpu.memory_space<vmem>>, vector<1x128xf32>
    %101 = arith.truncf %100 : vector<1x128xf32> to vector<1x128xbf16>
    %cst_58 = arith.constant dense<0.000000e+00> : vector<1x128xf32>
    %102 = tpu.matmul %101, %99, %cst_58 {dimension_numbers = #tpu.dot_dimension_numbers<[1], [1], [0], [0], [0, 0, 1, 0], [], []>} : vector<1x128xbf16>, vector<128x128xbf16>, vector<1x128xf32> -> vector<1x128xf32>
    %c19 = arith.constant 19 : index
    %c0_59 = arith.constant 0 : index
    %103 = vector.load %arg5[%c19, %c0_59] : memref<42x128xf32, #tpu.memory_space<vmem>>, vector<1x128xf32>
    %cst_60 = arith.constant 0.000000e+00 : f32
    %104 = vector.broadcast %cst_60 : f32 to vector<1x128xf32>
    %105 = arith.cmpf oeq, %62, %104 : vector<1x128xf32>
    %106 = arith.addf %102, %103 : vector<1x128xf32>
    %cst_61 = arith.constant -1.000000e+04 : f32
    %107 = vector.broadcast %cst_61 : f32 to vector<1x128xf32>
    %108 = arith.select %105, %107, %106 : vector<1x128xi1>, vector<1x128xf32>
    %c0_62 = arith.constant 0 : index
    %c256_63 = arith.constant 256 : index
    %109 = vector.load %arg8[%c0_62, %c256_63] : memref<16x1024xbf16, #tpu.memory_space<vmem>>, vector<8x128xbf16>
    %c0_64 = arith.constant 0 : index
    %c256_65 = arith.constant 256 : index
    %110 = vector.load %arg9[%c0_64, %c256_65] : memref<32x1024xbf16, #tpu.memory_space<vmem>>, vector<16x128xbf16>
    %c4 = arith.constant 4 : index
    %c0_66 = arith.constant 0 : index
    %111 = vector.load %arg5[%c4, %c0_66] : memref<42x128xf32, #tpu.memory_space<vmem>>, vector<1x128xf32>
    %112 = arith.truncf %111 : vector<1x128xf32> to vector<1x128xbf16>
    %113 = vector.shape_cast %109 : vector<8x128xbf16> to vector<8x1x128xbf16>
    %114 = vector.shape_cast %110 : vector<16x128xbf16> to vector<1x16x128xbf16>
    %115 = vector.broadcast %113 : vector<8x1x128xbf16> to vector<8x16x128xbf16>
    %116 = vector.broadcast %114 : vector<1x16x128xbf16> to vector<8x16x128xbf16>
    %117 = arith.addf %115, %116 : vector<8x16x128xbf16>
    %118 = vector.shape_cast %112 : vector<1x128xbf16> to vector<1x1x128xbf16>
    %119 = vector.broadcast %118 : vector<1x1x128xbf16> to vector<8x16x128xbf16>
    %120 = arith.addf %117, %119 : vector<8x16x128xbf16>
    %121 = math.tanh %120 : vector<8x16x128xbf16>
    %122 = vector.shape_cast %121 : vector<8x16x128xbf16> to vector<128x128xbf16>
    %c12 = arith.constant 12 : index
    %c0_67 = arith.constant 0 : index
    %123 = vector.load %arg5[%c12, %c0_67] : memref<42x128xf32, #tpu.memory_space<vmem>>, vector<1x128xf32>
    %124 = arith.truncf %123 : vector<1x128xf32> to vector<1x128xbf16>
    %cst_68 = arith.constant dense<0.000000e+00> : vector<1x128xf32>
    %125 = tpu.matmul %124, %122, %cst_68 {dimension_numbers = #tpu.dot_dimension_numbers<[1], [1], [0], [0], [0, 0, 1, 0], [], []>} : vector<1x128xbf16>, vector<128x128xbf16>, vector<1x128xf32> -> vector<1x128xf32>
    %c20 = arith.constant 20 : index
    %c0_69 = arith.constant 0 : index
    %126 = vector.load %arg5[%c20, %c0_69] : memref<42x128xf32, #tpu.memory_space<vmem>>, vector<1x128xf32>
    %cst_70 = arith.constant 0.000000e+00 : f32
    %127 = vector.broadcast %cst_70 : f32 to vector<1x128xf32>
    %128 = arith.cmpf oeq, %62, %127 : vector<1x128xf32>
    %129 = arith.addf %125, %126 : vector<1x128xf32>
    %cst_71 = arith.constant -1.000000e+04 : f32
    %130 = vector.broadcast %cst_71 : f32 to vector<1x128xf32>
    %131 = arith.select %128, %130, %129 : vector<1x128xi1>, vector<1x128xf32>
    %c0_72 = arith.constant 0 : index
    %c384 = arith.constant 384 : index
    %132 = vector.load %arg8[%c0_72, %c384] : memref<16x1024xbf16, #tpu.memory_space<vmem>>, vector<8x128xbf16>
    %c0_73 = arith.constant 0 : index
    %c384_74 = arith.constant 384 : index
    %133 = vector.load %arg9[%c0_73, %c384_74] : memref<32x1024xbf16, #tpu.memory_space<vmem>>, vector<16x128xbf16>
    %c5 = arith.constant 5 : index
    %c0_75 = arith.constant 0 : index
    %134 = vector.load %arg5[%c5, %c0_75] : memref<42x128xf32, #tpu.memory_space<vmem>>, vector<1x128xf32>
    %135 = arith.truncf %134 : vector<1x128xf32> to vector<1x128xbf16>
    %136 = vector.shape_cast %132 : vector<8x128xbf16> to vector<8x1x128xbf16>
    %137 = vector.shape_cast %133 : vector<16x128xbf16> to vector<1x16x128xbf16>
    %138 = vector.broadcast %136 : vector<8x1x128xbf16> to vector<8x16x128xbf16>
    %139 = vector.broadcast %137 : vector<1x16x128xbf16> to vector<8x16x128xbf16>
    %140 = arith.addf %138, %139 : vector<8x16x128xbf16>
    %141 = vector.shape_cast %135 : vector<1x128xbf16> to vector<1x1x128xbf16>
    %142 = vector.broadcast %141 : vector<1x1x128xbf16> to vector<8x16x128xbf16>
    %143 = arith.addf %140, %142 : vector<8x16x128xbf16>
    %144 = math.tanh %143 : vector<8x16x128xbf16>
    %145 = vector.shape_cast %144 : vector<8x16x128xbf16> to vector<128x128xbf16>
    %c13 = arith.constant 13 : index
    %c0_76 = arith.constant 0 : index
    %146 = vector.load %arg5[%c13, %c0_76] : memref<42x128xf32, #tpu.memory_space<vmem>>, vector<1x128xf32>
    %147 = arith.truncf %146 : vector<1x128xf32> to vector<1x128xbf16>
    %cst_77 = arith.constant dense<0.000000e+00> : vector<1x128xf32>
    %148 = tpu.matmul %147, %145, %cst_77 {dimension_numbers = #tpu.dot_dimension_numbers<[1], [1], [0], [0], [0, 0, 1, 0], [], []>} : vector<1x128xbf16>, vector<128x128xbf16>, vector<1x128xf32> -> vector<1x128xf32>
    %c21 = arith.constant 21 : index
    %c0_78 = arith.constant 0 : index
    %149 = vector.load %arg5[%c21, %c0_78] : memref<42x128xf32, #tpu.memory_space<vmem>>, vector<1x128xf32>
    %cst_79 = arith.constant 0.000000e+00 : f32
    %150 = vector.broadcast %cst_79 : f32 to vector<1x128xf32>
    %151 = arith.cmpf oeq, %62, %150 : vector<1x128xf32>
    %152 = arith.addf %148, %149 : vector<1x128xf32>
    %cst_80 = arith.constant -1.000000e+04 : f32
    %153 = vector.broadcast %cst_80 : f32 to vector<1x128xf32>
    %154 = arith.select %151, %153, %152 : vector<1x128xi1>, vector<1x128xf32>
    %c0_81 = arith.constant 0 : index
    %c512 = arith.constant 512 : index
    %155 = vector.load %arg8[%c0_81, %c512] : memref<16x1024xbf16, #tpu.memory_space<vmem>>, vector<8x128xbf16>
    %c0_82 = arith.constant 0 : index
    %c512_83 = arith.constant 512 : index
    %156 = vector.load %arg9[%c0_82, %c512_83] : memref<32x1024xbf16, #tpu.memory_space<vmem>>, vector<16x128xbf16>
    %c6 = arith.constant 6 : index
    %c0_84 = arith.constant 0 : index
    %157 = vector.load %arg5[%c6, %c0_84] : memref<42x128xf32, #tpu.memory_space<vmem>>, vector<1x128xf32>
    %158 = arith.truncf %157 : vector<1x128xf32> to vector<1x128xbf16>
    %159 = vector.shape_cast %155 : vector<8x128xbf16> to vector<8x1x128xbf16>
    %160 = vector.shape_cast %156 : vector<16x128xbf16> to vector<1x16x128xbf16>
    %161 = vector.broadcast %159 : vector<8x1x128xbf16> to vector<8x16x128xbf16>
    %162 = vector.broadcast %160 : vector<1x16x128xbf16> to vector<8x16x128xbf16>
    %163 = arith.addf %161, %162 : vector<8x16x128xbf16>
    %164 = vector.shape_cast %158 : vector<1x128xbf16> to vector<1x1x128xbf16>
    %165 = vector.broadcast %164 : vector<1x1x128xbf16> to vector<8x16x128xbf16>
    %166 = arith.addf %163, %165 : vector<8x16x128xbf16>
    %167 = math.tanh %166 : vector<8x16x128xbf16>
    %168 = vector.shape_cast %167 : vector<8x16x128xbf16> to vector<128x128xbf16>
    %c14 = arith.constant 14 : index
    %c0_85 = arith.constant 0 : index
    %169 = vector.load %arg5[%c14, %c0_85] : memref<42x128xf32, #tpu.memory_space<vmem>>, vector<1x128xf32>
    %170 = arith.truncf %169 : vector<1x128xf32> to vector<1x128xbf16>
    %cst_86 = arith.constant dense<0.000000e+00> : vector<1x128xf32>
    %171 = tpu.matmul %170, %168, %cst_86 {dimension_numbers = #tpu.dot_dimension_numbers<[1], [1], [0], [0], [0, 0, 1, 0], [], []>} : vector<1x128xbf16>, vector<128x128xbf16>, vector<1x128xf32> -> vector<1x128xf32>
    %c22 = arith.constant 22 : index
    %c0_87 = arith.constant 0 : index
    %172 = vector.load %arg5[%c22, %c0_87] : memref<42x128xf32, #tpu.memory_space<vmem>>, vector<1x128xf32>
    %cst_88 = arith.constant 0.000000e+00 : f32
    %173 = vector.broadcast %cst_88 : f32 to vector<1x128xf32>
    %174 = arith.cmpf oeq, %62, %173 : vector<1x128xf32>
    %175 = arith.addf %171, %172 : vector<1x128xf32>
    %cst_89 = arith.constant -1.000000e+04 : f32
    %176 = vector.broadcast %cst_89 : f32 to vector<1x128xf32>
    %177 = arith.select %174, %176, %175 : vector<1x128xi1>, vector<1x128xf32>
    %c0_90 = arith.constant 0 : index
    %c640 = arith.constant 640 : index
    %178 = vector.load %arg8[%c0_90, %c640] : memref<16x1024xbf16, #tpu.memory_space<vmem>>, vector<8x128xbf16>
    %c0_91 = arith.constant 0 : index
    %c640_92 = arith.constant 640 : index
    %179 = vector.load %arg9[%c0_91, %c640_92] : memref<32x1024xbf16, #tpu.memory_space<vmem>>, vector<16x128xbf16>
    %c7 = arith.constant 7 : index
    %c0_93 = arith.constant 0 : index
    %180 = vector.load %arg5[%c7, %c0_93] : memref<42x128xf32, #tpu.memory_space<vmem>>, vector<1x128xf32>
    %181 = arith.truncf %180 : vector<1x128xf32> to vector<1x128xbf16>
    %182 = vector.shape_cast %178 : vector<8x128xbf16> to vector<8x1x128xbf16>
    %183 = vector.shape_cast %179 : vector<16x128xbf16> to vector<1x16x128xbf16>
    %184 = vector.broadcast %182 : vector<8x1x128xbf16> to vector<8x16x128xbf16>
    %185 = vector.broadcast %183 : vector<1x16x128xbf16> to vector<8x16x128xbf16>
    %186 = arith.addf %184, %185 : vector<8x16x128xbf16>
    %187 = vector.shape_cast %181 : vector<1x128xbf16> to vector<1x1x128xbf16>
    %188 = vector.broadcast %187 : vector<1x1x128xbf16> to vector<8x16x128xbf16>
    %189 = arith.addf %186, %188 : vector<8x16x128xbf16>
    %190 = math.tanh %189 : vector<8x16x128xbf16>
    %191 = vector.shape_cast %190 : vector<8x16x128xbf16> to vector<128x128xbf16>
    %c15 = arith.constant 15 : index
    %c0_94 = arith.constant 0 : index
    %192 = vector.load %arg5[%c15, %c0_94] : memref<42x128xf32, #tpu.memory_space<vmem>>, vector<1x128xf32>
    %193 = arith.truncf %192 : vector<1x128xf32> to vector<1x128xbf16>
    %cst_95 = arith.constant dense<0.000000e+00> : vector<1x128xf32>
    %194 = tpu.matmul %193, %191, %cst_95 {dimension_numbers = #tpu.dot_dimension_numbers<[1], [1], [0], [0], [0, 0, 1, 0], [], []>} : vector<1x128xbf16>, vector<128x128xbf16>, vector<1x128xf32> -> vector<1x128xf32>
    %c23 = arith.constant 23 : index
    %c0_96 = arith.constant 0 : index
    %195 = vector.load %arg5[%c23, %c0_96] : memref<42x128xf32, #tpu.memory_space<vmem>>, vector<1x128xf32>
    %cst_97 = arith.constant 0.000000e+00 : f32
    %196 = vector.broadcast %cst_97 : f32 to vector<1x128xf32>
    %197 = arith.cmpf oeq, %62, %196 : vector<1x128xf32>
    %198 = arith.addf %194, %195 : vector<1x128xf32>
    %cst_98 = arith.constant -1.000000e+04 : f32
    %199 = vector.broadcast %cst_98 : f32 to vector<1x128xf32>
    %200 = arith.select %197, %199, %198 : vector<1x128xi1>, vector<1x128xf32>
    %c0_99 = arith.constant 0 : index
    %c768 = arith.constant 768 : index
    %201 = vector.load %arg8[%c0_99, %c768] : memref<16x1024xbf16, #tpu.memory_space<vmem>>, vector<8x128xbf16>
    %c0_100 = arith.constant 0 : index
    %c768_101 = arith.constant 768 : index
    %202 = vector.load %arg9[%c0_100, %c768_101] : memref<32x1024xbf16, #tpu.memory_space<vmem>>, vector<16x128xbf16>
    %c8 = arith.constant 8 : index
    %c0_102 = arith.constant 0 : index
    %203 = vector.load %arg5[%c8, %c0_102] : memref<42x128xf32, #tpu.memory_space<vmem>>, vector<1x128xf32>
    %204 = arith.truncf %203 : vector<1x128xf32> to vector<1x128xbf16>
    %205 = vector.shape_cast %201 : vector<8x128xbf16> to vector<8x1x128xbf16>
    %206 = vector.shape_cast %202 : vector<16x128xbf16> to vector<1x16x128xbf16>
    %207 = vector.broadcast %205 : vector<8x1x128xbf16> to vector<8x16x128xbf16>
    %208 = vector.broadcast %206 : vector<1x16x128xbf16> to vector<8x16x128xbf16>
    %209 = arith.addf %207, %208 : vector<8x16x128xbf16>
    %210 = vector.shape_cast %204 : vector<1x128xbf16> to vector<1x1x128xbf16>
    %211 = vector.broadcast %210 : vector<1x1x128xbf16> to vector<8x16x128xbf16>
    %212 = arith.addf %209, %211 : vector<8x16x128xbf16>
    %213 = math.tanh %212 : vector<8x16x128xbf16>
    %214 = vector.shape_cast %213 : vector<8x16x128xbf16> to vector<128x128xbf16>
    %c16_103 = arith.constant 16 : index
    %c0_104 = arith.constant 0 : index
    %215 = vector.load %arg5[%c16_103, %c0_104] : memref<42x128xf32, #tpu.memory_space<vmem>>, vector<1x128xf32>
    %216 = arith.truncf %215 : vector<1x128xf32> to vector<1x128xbf16>
    %cst_105 = arith.constant dense<0.000000e+00> : vector<1x128xf32>
    %217 = tpu.matmul %216, %214, %cst_105 {dimension_numbers = #tpu.dot_dimension_numbers<[1], [1], [0], [0], [0, 0, 1, 0], [], []>} : vector<1x128xbf16>, vector<128x128xbf16>, vector<1x128xf32> -> vector<1x128xf32>
    %c24 = arith.constant 24 : index
    %c0_106 = arith.constant 0 : index
    %218 = vector.load %arg5[%c24, %c0_106] : memref<42x128xf32, #tpu.memory_space<vmem>>, vector<1x128xf32>
    %cst_107 = arith.constant 0.000000e+00 : f32
    %219 = vector.broadcast %cst_107 : f32 to vector<1x128xf32>
    %220 = arith.cmpf oeq, %62, %219 : vector<1x128xf32>
    %221 = arith.addf %217, %218 : vector<1x128xf32>
    %cst_108 = arith.constant -1.000000e+04 : f32
    %222 = vector.broadcast %cst_108 : f32 to vector<1x128xf32>
    %223 = arith.select %220, %222, %221 : vector<1x128xi1>, vector<1x128xf32>
    %c0_109 = arith.constant 0 : index
    %c896 = arith.constant 896 : index
    %224 = vector.load %arg8[%c0_109, %c896] : memref<16x1024xbf16, #tpu.memory_space<vmem>>, vector<8x128xbf16>
    %c0_110 = arith.constant 0 : index
    %c896_111 = arith.constant 896 : index
    %225 = vector.load %arg9[%c0_110, %c896_111] : memref<32x1024xbf16, #tpu.memory_space<vmem>>, vector<16x128xbf16>
    %c9 = arith.constant 9 : index
    %c0_112 = arith.constant 0 : index
    %226 = vector.load %arg5[%c9, %c0_112] : memref<42x128xf32, #tpu.memory_space<vmem>>, vector<1x128xf32>
    %227 = arith.truncf %226 : vector<1x128xf32> to vector<1x128xbf16>
    %228 = vector.shape_cast %224 : vector<8x128xbf16> to vector<8x1x128xbf16>
    %229 = vector.shape_cast %225 : vector<16x128xbf16> to vector<1x16x128xbf16>
    %230 = vector.broadcast %228 : vector<8x1x128xbf16> to vector<8x16x128xbf16>
    %231 = vector.broadcast %229 : vector<1x16x128xbf16> to vector<8x16x128xbf16>
    %232 = arith.addf %230, %231 : vector<8x16x128xbf16>
    %233 = vector.shape_cast %227 : vector<1x128xbf16> to vector<1x1x128xbf16>
    %234 = vector.broadcast %233 : vector<1x1x128xbf16> to vector<8x16x128xbf16>
    %235 = arith.addf %232, %234 : vector<8x16x128xbf16>
    %236 = math.tanh %235 : vector<8x16x128xbf16>
    %237 = vector.shape_cast %236 : vector<8x16x128xbf16> to vector<128x128xbf16>
    %c17 = arith.constant 17 : index
    %c0_113 = arith.constant 0 : index
    %238 = vector.load %arg5[%c17, %c0_113] : memref<42x128xf32, #tpu.memory_space<vmem>>, vector<1x128xf32>
    %239 = arith.truncf %238 : vector<1x128xf32> to vector<1x128xbf16>
    %cst_114 = arith.constant dense<0.000000e+00> : vector<1x128xf32>
    %240 = tpu.matmul %239, %237, %cst_114 {dimension_numbers = #tpu.dot_dimension_numbers<[1], [1], [0], [0], [0, 0, 1, 0], [], []>} : vector<1x128xbf16>, vector<128x128xbf16>, vector<1x128xf32> -> vector<1x128xf32>
    %c25 = arith.constant 25 : index
    %c0_115 = arith.constant 0 : index
    %241 = vector.load %arg5[%c25, %c0_115] : memref<42x128xf32, #tpu.memory_space<vmem>>, vector<1x128xf32>
    %cst_116 = arith.constant 0.000000e+00 : f32
    %242 = vector.broadcast %cst_116 : f32 to vector<1x128xf32>
    %243 = arith.cmpf oeq, %62, %242 : vector<1x128xf32>
    %244 = arith.addf %240, %241 : vector<1x128xf32>
    %cst_117 = arith.constant -1.000000e+04 : f32
    %245 = vector.broadcast %cst_117 : f32 to vector<1x128xf32>
    %246 = arith.select %243, %245, %244 : vector<1x128xi1>, vector<1x128xf32>
    %c1_118 = arith.constant 1 : index
    %c0_119 = arith.constant 0 : index
    %247 = vector.load %arg6[%c1_118, %c0_119] : memref<18x128xf32, #tpu.memory_space<vmem>>, vector<1x128xf32>
    %c8_120 = arith.constant 8 : index
    %c0_121 = arith.constant 0 : index
    %248 = vector.load %arg8[%c8_120, %c0_121] : memref<16x1024xbf16, #tpu.memory_space<vmem>>, vector<8x128xbf16>
    %c16_122 = arith.constant 16 : index
    %c0_123 = arith.constant 0 : index
    %249 = vector.load %arg9[%c16_122, %c0_123] : memref<32x1024xbf16, #tpu.memory_space<vmem>>, vector<16x128xbf16>
    %c2_124 = arith.constant 2 : index
    %c0_125 = arith.constant 0 : index
    %250 = vector.load %arg5[%c2_124, %c0_125] : memref<42x128xf32, #tpu.memory_space<vmem>>, vector<1x128xf32>
    %251 = arith.truncf %250 : vector<1x128xf32> to vector<1x128xbf16>
    %252 = vector.shape_cast %248 : vector<8x128xbf16> to vector<8x1x128xbf16>
    %253 = vector.shape_cast %249 : vector<16x128xbf16> to vector<1x16x128xbf16>
    %254 = vector.broadcast %252 : vector<8x1x128xbf16> to vector<8x16x128xbf16>
    %255 = vector.broadcast %253 : vector<1x16x128xbf16> to vector<8x16x128xbf16>
    %256 = arith.addf %254, %255 : vector<8x16x128xbf16>
    %257 = vector.shape_cast %251 : vector<1x128xbf16> to vector<1x1x128xbf16>
    %258 = vector.broadcast %257 : vector<1x1x128xbf16> to vector<8x16x128xbf16>
    %259 = arith.addf %256, %258 : vector<8x16x128xbf16>
    %260 = math.tanh %259 : vector<8x16x128xbf16>
    %261 = vector.shape_cast %260 : vector<8x16x128xbf16> to vector<128x128xbf16>
    %c10_126 = arith.constant 10 : index
    %c0_127 = arith.constant 0 : index
    %262 = vector.load %arg5[%c10_126, %c0_127] : memref<42x128xf32, #tpu.memory_space<vmem>>, vector<1x128xf32>
    %263 = arith.truncf %262 : vector<1x128xf32> to vector<1x128xbf16>
    %cst_128 = arith.constant dense<0.000000e+00> : vector<1x128xf32>
    %264 = tpu.matmul %263, %261, %cst_128 {dimension_numbers = #tpu.dot_dimension_numbers<[1], [1], [0], [0], [0, 0, 1, 0], [], []>} : vector<1x128xbf16>, vector<128x128xbf16>, vector<1x128xf32> -> vector<1x128xf32>
    %c18_129 = arith.constant 18 : index
    %c0_130 = arith.constant 0 : index
    %265 = vector.load %arg5[%c18_129, %c0_130] : memref<42x128xf32, #tpu.memory_space<vmem>>, vector<1x128xf32>
    %cst_131 = arith.constant 0.000000e+00 : f32
    %266 = vector.broadcast %cst_131 : f32 to vector<1x128xf32>
    %267 = arith.cmpf oeq, %247, %266 : vector<1x128xf32>
    %268 = arith.addf %264, %265 : vector<1x128xf32>
    %cst_132 = arith.constant -1.000000e+04 : f32
    %269 = vector.broadcast %cst_132 : f32 to vector<1x128xf32>
    %270 = arith.select %267, %269, %268 : vector<1x128xi1>, vector<1x128xf32>
    %c8_133 = arith.constant 8 : index
    %c128_134 = arith.constant 128 : index
    %271 = vector.load %arg8[%c8_133, %c128_134] : memref<16x1024xbf16, #tpu.memory_space<vmem>>, vector<8x128xbf16>
    %c16_135 = arith.constant 16 : index
    %c128_136 = arith.constant 128 : index
    %272 = vector.load %arg9[%c16_135, %c128_136] : memref<32x1024xbf16, #tpu.memory_space<vmem>>, vector<16x128xbf16>
    %c3_137 = arith.constant 3 : index
    %c0_138 = arith.constant 0 : index
    %273 = vector.load %arg5[%c3_137, %c0_138] : memref<42x128xf32, #tpu.memory_space<vmem>>, vector<1x128xf32>
    %274 = arith.truncf %273 : vector<1x128xf32> to vector<1x128xbf16>
    %275 = vector.shape_cast %271 : vector<8x128xbf16> to vector<8x1x128xbf16>
    %276 = vector.shape_cast %272 : vector<16x128xbf16> to vector<1x16x128xbf16>
    %277 = vector.broadcast %275 : vector<8x1x128xbf16> to vector<8x16x128xbf16>
    %278 = vector.broadcast %276 : vector<1x16x128xbf16> to vector<8x16x128xbf16>
    %279 = arith.addf %277, %278 : vector<8x16x128xbf16>
    %280 = vector.shape_cast %274 : vector<1x128xbf16> to vector<1x1x128xbf16>
    %281 = vector.broadcast %280 : vector<1x1x128xbf16> to vector<8x16x128xbf16>
    %282 = arith.addf %279, %281 : vector<8x16x128xbf16>
    %283 = math.tanh %282 : vector<8x16x128xbf16>
    %284 = vector.shape_cast %283 : vector<8x16x128xbf16> to vector<128x128xbf16>
    %c11_139 = arith.constant 11 : index
    %c0_140 = arith.constant 0 : index
    %285 = vector.load %arg5[%c11_139, %c0_140] : memref<42x128xf32, #tpu.memory_space<vmem>>, vector<1x128xf32>
    %286 = arith.truncf %285 : vector<1x128xf32> to vector<1x128xbf16>
    %cst_141 = arith.constant dense<0.000000e+00> : vector<1x128xf32>
    %287 = tpu.matmul %286, %284, %cst_141 {dimension_numbers = #tpu.dot_dimension_numbers<[1], [1], [0], [0], [0, 0, 1, 0], [], []>} : vector<1x128xbf16>, vector<128x128xbf16>, vector<1x128xf32> -> vector<1x128xf32>
    %c19_142 = arith.constant 19 : index
    %c0_143 = arith.constant 0 : index
    %288 = vector.load %arg5[%c19_142, %c0_143] : memref<42x128xf32, #tpu.memory_space<vmem>>, vector<1x128xf32>
    %cst_144 = arith.constant 0.000000e+00 : f32
    %289 = vector.broadcast %cst_144 : f32 to vector<1x128xf32>
    %290 = arith.cmpf oeq, %247, %289 : vector<1x128xf32>
    %291 = arith.addf %287, %288 : vector<1x128xf32>
    %cst_145 = arith.constant -1.000000e+04 : f32
    %292 = vector.broadcast %cst_145 : f32 to vector<1x128xf32>
    %293 = arith.select %290, %292, %291 : vector<1x128xi1>, vector<1x128xf32>
    %c8_146 = arith.constant 8 : index
    %c256_147 = arith.constant 256 : index
    %294 = vector.load %arg8[%c8_146, %c256_147] : memref<16x1024xbf16, #tpu.memory_space<vmem>>, vector<8x128xbf16>
    %c16_148 = arith.constant 16 : index
    %c256_149 = arith.constant 256 : index
    %295 = vector.load %arg9[%c16_148, %c256_149] : memref<32x1024xbf16, #tpu.memory_space<vmem>>, vector<16x128xbf16>
    %c4_150 = arith.constant 4 : index
    %c0_151 = arith.constant 0 : index
    %296 = vector.load %arg5[%c4_150, %c0_151] : memref<42x128xf32, #tpu.memory_space<vmem>>, vector<1x128xf32>
    %297 = arith.truncf %296 : vector<1x128xf32> to vector<1x128xbf16>
    %298 = vector.shape_cast %294 : vector<8x128xbf16> to vector<8x1x128xbf16>
    %299 = vector.shape_cast %295 : vector<16x128xbf16> to vector<1x16x128xbf16>
    %300 = vector.broadcast %298 : vector<8x1x128xbf16> to vector<8x16x128xbf16>
    %301 = vector.broadcast %299 : vector<1x16x128xbf16> to vector<8x16x128xbf16>
    %302 = arith.addf %300, %301 : vector<8x16x128xbf16>
    %303 = vector.shape_cast %297 : vector<1x128xbf16> to vector<1x1x128xbf16>
    %304 = vector.broadcast %303 : vector<1x1x128xbf16> to vector<8x16x128xbf16>
    %305 = arith.addf %302, %304 : vector<8x16x128xbf16>
    %306 = math.tanh %305 : vector<8x16x128xbf16>
    %307 = vector.shape_cast %306 : vector<8x16x128xbf16> to vector<128x128xbf16>
    %c12_152 = arith.constant 12 : index
    %c0_153 = arith.constant 0 : index
    %308 = vector.load %arg5[%c12_152, %c0_153] : memref<42x128xf32, #tpu.memory_space<vmem>>, vector<1x128xf32>
    %309 = arith.truncf %308 : vector<1x128xf32> to vector<1x128xbf16>
    %cst_154 = arith.constant dense<0.000000e+00> : vector<1x128xf32>
    %310 = tpu.matmul %309, %307, %cst_154 {dimension_numbers = #tpu.dot_dimension_numbers<[1], [1], [0], [0], [0, 0, 1, 0], [], []>} : vector<1x128xbf16>, vector<128x128xbf16>, vector<1x128xf32> -> vector<1x128xf32>
    %c20_155 = arith.constant 20 : index
    %c0_156 = arith.constant 0 : index
    %311 = vector.load %arg5[%c20_155, %c0_156] : memref<42x128xf32, #tpu.memory_space<vmem>>, vector<1x128xf32>
    %cst_157 = arith.constant 0.000000e+00 : f32
    %312 = vector.broadcast %cst_157 : f32 to vector<1x128xf32>
    %313 = arith.cmpf oeq, %247, %312 : vector<1x128xf32>
    %314 = arith.addf %310, %311 : vector<1x128xf32>
    %cst_158 = arith.constant -1.000000e+04 : f32
    %315 = vector.broadcast %cst_158 : f32 to vector<1x128xf32>
    %316 = arith.select %313, %315, %314 : vector<1x128xi1>, vector<1x128xf32>
    %c8_159 = arith.constant 8 : index
    %c384_160 = arith.constant 384 : index
    %317 = vector.load %arg8[%c8_159, %c384_160] : memref<16x1024xbf16, #tpu.memory_space<vmem>>, vector<8x128xbf16>
    %c16_161 = arith.constant 16 : index
    %c384_162 = arith.constant 384 : index
    %318 = vector.load %arg9[%c16_161, %c384_162] : memref<32x1024xbf16, #tpu.memory_space<vmem>>, vector<16x128xbf16>
    %c5_163 = arith.constant 5 : index
    %c0_164 = arith.constant 0 : index
    %319 = vector.load %arg5[%c5_163, %c0_164] : memref<42x128xf32, #tpu.memory_space<vmem>>, vector<1x128xf32>
    %320 = arith.truncf %319 : vector<1x128xf32> to vector<1x128xbf16>
    %321 = vector.shape_cast %317 : vector<8x128xbf16> to vector<8x1x128xbf16>
    %322 = vector.shape_cast %318 : vector<16x128xbf16> to vector<1x16x128xbf16>
    %323 = vector.broadcast %321 : vector<8x1x128xbf16> to vector<8x16x128xbf16>
    %324 = vector.broadcast %322 : vector<1x16x128xbf16> to vector<8x16x128xbf16>
    %325 = arith.addf %323, %324 : vector<8x16x128xbf16>
    %326 = vector.shape_cast %320 : vector<1x128xbf16> to vector<1x1x128xbf16>
    %327 = vector.broadcast %326 : vector<1x1x128xbf16> to vector<8x16x128xbf16>
    %328 = arith.addf %325, %327 : vector<8x16x128xbf16>
    %329 = math.tanh %328 : vector<8x16x128xbf16>
    %330 = vector.shape_cast %329 : vector<8x16x128xbf16> to vector<128x128xbf16>
    %c13_165 = arith.constant 13 : index
    %c0_166 = arith.constant 0 : index
    %331 = vector.load %arg5[%c13_165, %c0_166] : memref<42x128xf32, #tpu.memory_space<vmem>>, vector<1x128xf32>
    %332 = arith.truncf %331 : vector<1x128xf32> to vector<1x128xbf16>
    %cst_167 = arith.constant dense<0.000000e+00> : vector<1x128xf32>
    %333 = tpu.matmul %332, %330, %cst_167 {dimension_numbers = #tpu.dot_dimension_numbers<[1], [1], [0], [0], [0, 0, 1, 0], [], []>} : vector<1x128xbf16>, vector<128x128xbf16>, vector<1x128xf32> -> vector<1x128xf32>
    %c21_168 = arith.constant 21 : index
    %c0_169 = arith.constant 0 : index
    %334 = vector.load %arg5[%c21_168, %c0_169] : memref<42x128xf32, #tpu.memory_space<vmem>>, vector<1x128xf32>
    %cst_170 = arith.constant 0.000000e+00 : f32
    %335 = vector.broadcast %cst_170 : f32 to vector<1x128xf32>
    %336 = arith.cmpf oeq, %247, %335 : vector<1x128xf32>
    %337 = arith.addf %333, %334 : vector<1x128xf32>
    %cst_171 = arith.constant -1.000000e+04 : f32
    %338 = vector.broadcast %cst_171 : f32 to vector<1x128xf32>
    %339 = arith.select %336, %338, %337 : vector<1x128xi1>, vector<1x128xf32>
    %c8_172 = arith.constant 8 : index
    %c512_173 = arith.constant 512 : index
    %340 = vector.load %arg8[%c8_172, %c512_173] : memref<16x1024xbf16, #tpu.memory_space<vmem>>, vector<8x128xbf16>
    %c16_174 = arith.constant 16 : index
    %c512_175 = arith.constant 512 : index
    %341 = vector.load %arg9[%c16_174, %c512_175] : memref<32x1024xbf16, #tpu.memory_space<vmem>>, vector<16x128xbf16>
    %c6_176 = arith.constant 6 : index
    %c0_177 = arith.constant 0 : index
    %342 = vector.load %arg5[%c6_176, %c0_177] : memref<42x128xf32, #tpu.memory_space<vmem>>, vector<1x128xf32>
    %343 = arith.truncf %342 : vector<1x128xf32> to vector<1x128xbf16>
    %344 = vector.shape_cast %340 : vector<8x128xbf16> to vector<8x1x128xbf16>
    %345 = vector.shape_cast %341 : vector<16x128xbf16> to vector<1x16x128xbf16>
    %346 = vector.broadcast %344 : vector<8x1x128xbf16> to vector<8x16x128xbf16>
    %347 = vector.broadcast %345 : vector<1x16x128xbf16> to vector<8x16x128xbf16>
    %348 = arith.addf %346, %347 : vector<8x16x128xbf16>
    %349 = vector.shape_cast %343 : vector<1x128xbf16> to vector<1x1x128xbf16>
    %350 = vector.broadcast %349 : vector<1x1x128xbf16> to vector<8x16x128xbf16>
    %351 = arith.addf %348, %350 : vector<8x16x128xbf16>
    %352 = math.tanh %351 : vector<8x16x128xbf16>
    %353 = vector.shape_cast %352 : vector<8x16x128xbf16> to vector<128x128xbf16>
    %c14_178 = arith.constant 14 : index
    %c0_179 = arith.constant 0 : index
    %354 = vector.load %arg5[%c14_178, %c0_179] : memref<42x128xf32, #tpu.memory_space<vmem>>, vector<1x128xf32>
    %355 = arith.truncf %354 : vector<1x128xf32> to vector<1x128xbf16>
    %cst_180 = arith.constant dense<0.000000e+00> : vector<1x128xf32>
    %356 = tpu.matmul %355, %353, %cst_180 {dimension_numbers = #tpu.dot_dimension_numbers<[1], [1], [0], [0], [0, 0, 1, 0], [], []>} : vector<1x128xbf16>, vector<128x128xbf16>, vector<1x128xf32> -> vector<1x128xf32>
    %c22_181 = arith.constant 22 : index
    %c0_182 = arith.constant 0 : index
    %357 = vector.load %arg5[%c22_181, %c0_182] : memref<42x128xf32, #tpu.memory_space<vmem>>, vector<1x128xf32>
    %cst_183 = arith.constant 0.000000e+00 : f32
    %358 = vector.broadcast %cst_183 : f32 to vector<1x128xf32>
    %359 = arith.cmpf oeq, %247, %358 : vector<1x128xf32>
    %360 = arith.addf %356, %357 : vector<1x128xf32>
    %cst_184 = arith.constant -1.000000e+04 : f32
    %361 = vector.broadcast %cst_184 : f32 to vector<1x128xf32>
    %362 = arith.select %359, %361, %360 : vector<1x128xi1>, vector<1x128xf32>
    %c8_185 = arith.constant 8 : index
    %c640_186 = arith.constant 640 : index
    %363 = vector.load %arg8[%c8_185, %c640_186] : memref<16x1024xbf16, #tpu.memory_space<vmem>>, vector<8x128xbf16>
    %c16_187 = arith.constant 16 : index
    %c640_188 = arith.constant 640 : index
    %364 = vector.load %arg9[%c16_187, %c640_188] : memref<32x1024xbf16, #tpu.memory_space<vmem>>, vector<16x128xbf16>
    %c7_189 = arith.constant 7 : index
    %c0_190 = arith.constant 0 : index
    %365 = vector.load %arg5[%c7_189, %c0_190] : memref<42x128xf32, #tpu.memory_space<vmem>>, vector<1x128xf32>
    %366 = arith.truncf %365 : vector<1x128xf32> to vector<1x128xbf16>
    %367 = vector.shape_cast %363 : vector<8x128xbf16> to vector<8x1x128xbf16>
    %368 = vector.shape_cast %364 : vector<16x128xbf16> to vector<1x16x128xbf16>
    %369 = vector.broadcast %367 : vector<8x1x128xbf16> to vector<8x16x128xbf16>
    %370 = vector.broadcast %368 : vector<1x16x128xbf16> to vector<8x16x128xbf16>
    %371 = arith.addf %369, %370 : vector<8x16x128xbf16>
    %372 = vector.shape_cast %366 : vector<1x128xbf16> to vector<1x1x128xbf16>
    %373 = vector.broadcast %372 : vector<1x1x128xbf16> to vector<8x16x128xbf16>
    %374 = arith.addf %371, %373 : vector<8x16x128xbf16>
    %375 = math.tanh %374 : vector<8x16x128xbf16>
    %376 = vector.shape_cast %375 : vector<8x16x128xbf16> to vector<128x128xbf16>
    %c15_191 = arith.constant 15 : index
    %c0_192 = arith.constant 0 : index
    %377 = vector.load %arg5[%c15_191, %c0_192] : memref<42x128xf32, #tpu.memory_space<vmem>>, vector<1x128xf32>
    %378 = arith.truncf %377 : vector<1x128xf32> to vector<1x128xbf16>
    %cst_193 = arith.constant dense<0.000000e+00> : vector<1x128xf32>
    %379 = tpu.matmul %378, %376, %cst_193 {dimension_numbers = #tpu.dot_dimension_numbers<[1], [1], [0], [0], [0, 0, 1, 0], [], []>} : vector<1x128xbf16>, vector<128x128xbf16>, vector<1x128xf32> -> vector<1x128xf32>
    %c23_194 = arith.constant 23 : index
    %c0_195 = arith.constant 0 : index
    %380 = vector.load %arg5[%c23_194, %c0_195] : memref<42x128xf32, #tpu.memory_space<vmem>>, vector<1x128xf32>
    %cst_196 = arith.constant 0.000000e+00 : f32
    %381 = vector.broadcast %cst_196 : f32 to vector<1x128xf32>
    %382 = arith.cmpf oeq, %247, %381 : vector<1x128xf32>
    %383 = arith.addf %379, %380 : vector<1x128xf32>
    %cst_197 = arith.constant -1.000000e+04 : f32
    %384 = vector.broadcast %cst_197 : f32 to vector<1x128xf32>
    %385 = arith.select %382, %384, %383 : vector<1x128xi1>, vector<1x128xf32>
    %c8_198 = arith.constant 8 : index
    %c768_199 = arith.constant 768 : index
    %386 = vector.load %arg8[%c8_198, %c768_199] : memref<16x1024xbf16, #tpu.memory_space<vmem>>, vector<8x128xbf16>
    %c16_200 = arith.constant 16 : index
    %c768_201 = arith.constant 768 : index
    %387 = vector.load %arg9[%c16_200, %c768_201] : memref<32x1024xbf16, #tpu.memory_space<vmem>>, vector<16x128xbf16>
    %c8_202 = arith.constant 8 : index
    %c0_203 = arith.constant 0 : index
    %388 = vector.load %arg5[%c8_202, %c0_203] : memref<42x128xf32, #tpu.memory_space<vmem>>, vector<1x128xf32>
    %389 = arith.truncf %388 : vector<1x128xf32> to vector<1x128xbf16>
    %390 = vector.shape_cast %386 : vector<8x128xbf16> to vector<8x1x128xbf16>
    %391 = vector.shape_cast %387 : vector<16x128xbf16> to vector<1x16x128xbf16>
    %392 = vector.broadcast %390 : vector<8x1x128xbf16> to vector<8x16x128xbf16>
    %393 = vector.broadcast %391 : vector<1x16x128xbf16> to vector<8x16x128xbf16>
    %394 = arith.addf %392, %393 : vector<8x16x128xbf16>
    %395 = vector.shape_cast %389 : vector<1x128xbf16> to vector<1x1x128xbf16>
    %396 = vector.broadcast %395 : vector<1x1x128xbf16> to vector<8x16x128xbf16>
    %397 = arith.addf %394, %396 : vector<8x16x128xbf16>
    %398 = math.tanh %397 : vector<8x16x128xbf16>
    %399 = vector.shape_cast %398 : vector<8x16x128xbf16> to vector<128x128xbf16>
    %c16_204 = arith.constant 16 : index
    %c0_205 = arith.constant 0 : index
    %400 = vector.load %arg5[%c16_204, %c0_205] : memref<42x128xf32, #tpu.memory_space<vmem>>, vector<1x128xf32>
    %401 = arith.truncf %400 : vector<1x128xf32> to vector<1x128xbf16>
    %cst_206 = arith.constant dense<0.000000e+00> : vector<1x128xf32>
    %402 = tpu.matmul %401, %399, %cst_206 {dimension_numbers = #tpu.dot_dimension_numbers<[1], [1], [0], [0], [0, 0, 1, 0], [], []>} : vector<1x128xbf16>, vector<128x128xbf16>, vector<1x128xf32> -> vector<1x128xf32>
    %c24_207 = arith.constant 24 : index
    %c0_208 = arith.constant 0 : index
    %403 = vector.load %arg5[%c24_207, %c0_208] : memref<42x128xf32, #tpu.memory_space<vmem>>, vector<1x128xf32>
    %cst_209 = arith.constant 0.000000e+00 : f32
    %404 = vector.broadcast %cst_209 : f32 to vector<1x128xf32>
    %405 = arith.cmpf oeq, %247, %404 : vector<1x128xf32>
    %406 = arith.addf %402, %403 : vector<1x128xf32>
    %cst_210 = arith.constant -1.000000e+04 : f32
    %407 = vector.broadcast %cst_210 : f32 to vector<1x128xf32>
    %408 = arith.select %405, %407, %406 : vector<1x128xi1>, vector<1x128xf32>
    %c8_211 = arith.constant 8 : index
    %c896_212 = arith.constant 896 : index
    %409 = vector.load %arg8[%c8_211, %c896_212] : memref<16x1024xbf16, #tpu.memory_space<vmem>>, vector<8x128xbf16>
    %c16_213 = arith.constant 16 : index
    %c896_214 = arith.constant 896 : index
    %410 = vector.load %arg9[%c16_213, %c896_214] : memref<32x1024xbf16, #tpu.memory_space<vmem>>, vector<16x128xbf16>
    %c9_215 = arith.constant 9 : index
    %c0_216 = arith.constant 0 : index
    %411 = vector.load %arg5[%c9_215, %c0_216] : memref<42x128xf32, #tpu.memory_space<vmem>>, vector<1x128xf32>
    %412 = arith.truncf %411 : vector<1x128xf32> to vector<1x128xbf16>
    %413 = vector.shape_cast %409 : vector<8x128xbf16> to vector<8x1x128xbf16>
    %414 = vector.shape_cast %410 : vector<16x128xbf16> to vector<1x16x128xbf16>
    %415 = vector.broadcast %413 : vector<8x1x128xbf16> to vector<8x16x128xbf16>
    %416 = vector.broadcast %414 : vector<1x16x128xbf16> to vector<8x16x128xbf16>
    %417 = arith.addf %415, %416 : vector<8x16x128xbf16>
    %418 = vector.shape_cast %412 : vector<1x128xbf16> to vector<1x1x128xbf16>
    %419 = vector.broadcast %418 : vector<1x1x128xbf16> to vector<8x16x128xbf16>
    %420 = arith.addf %417, %419 : vector<8x16x128xbf16>
    %421 = math.tanh %420 : vector<8x16x128xbf16>
    %422 = vector.shape_cast %421 : vector<8x16x128xbf16> to vector<128x128xbf16>
    %c17_217 = arith.constant 17 : index
    %c0_218 = arith.constant 0 : index
    %423 = vector.load %arg5[%c17_217, %c0_218] : memref<42x128xf32, #tpu.memory_space<vmem>>, vector<1x128xf32>
    %424 = arith.truncf %423 : vector<1x128xf32> to vector<1x128xbf16>
    %cst_219 = arith.constant dense<0.000000e+00> : vector<1x128xf32>
    %425 = tpu.matmul %424, %422, %cst_219 {dimension_numbers = #tpu.dot_dimension_numbers<[1], [1], [0], [0], [0, 0, 1, 0], [], []>} : vector<1x128xbf16>, vector<128x128xbf16>, vector<1x128xf32> -> vector<1x128xf32>
    %c25_220 = arith.constant 25 : index
    %c0_221 = arith.constant 0 : index
    %426 = vector.load %arg5[%c25_220, %c0_221] : memref<42x128xf32, #tpu.memory_space<vmem>>, vector<1x128xf32>
    %cst_222 = arith.constant 0.000000e+00 : f32
    %427 = vector.broadcast %cst_222 : f32 to vector<1x128xf32>
    %428 = arith.cmpf oeq, %247, %427 : vector<1x128xf32>
    %429 = arith.addf %425, %426 : vector<1x128xf32>
    %cst_223 = arith.constant -1.000000e+04 : f32
    %430 = vector.broadcast %cst_223 : f32 to vector<1x128xf32>
    %431 = arith.select %428, %430, %429 : vector<1x128xi1>, vector<1x128xf32>
    %432 = tpu.concatenate %85, %108, %131, %154, %177, %200, %223, %246, %270, %293, %316, %339, %362, %385, %408, %431 in 0 : vector<1x128xf32>, vector<1x128xf32>, vector<1x128xf32>, vector<1x128xf32>, vector<1x128xf32>, vector<1x128xf32>, vector<1x128xf32>, vector<1x128xf32>, vector<1x128xf32>, vector<1x128xf32>, vector<1x128xf32>, vector<1x128xf32>, vector<1x128xf32>, vector<1x128xf32>, vector<1x128xf32>, vector<1x128xf32> -> vector<16x128xf32>
    %433 = tpu.concatenate %54, %432 in 0 : vector<16x128xf32>, vector<16x128xf32> -> vector<32x128xf32>
    %c0_224 = arith.constant 0 : index
    %c0_225 = arith.constant 0 : index
    %434 = vector.load %arg7[%c0_224, %c0_225] : memref<32x128xf32, #tpu.memory_space<vmem>>, vector<32x128xf32>
    tpu.vector_store %arg7[%c0_224, %c0_225], %433 {strides = array<i32>} : memref<32x128xf32, #tpu.memory_space<vmem>>, vector<32x128xf32>,
    return
  }
}

</mosaic_0001>

<bundles_post_ra>
// kernel: tile.9
= control target key start
LH: loop header
LB: loop body
LE: loop exit
PB: predicated region body
PF: predicated region fallthrough
CT: control target
= control target key end

     0   :  { %s7_s6 = smov 3  ;;  %s21_s9 = smov 3  ;;  %vm4_vm0 = vcmask 130048   ;;  %vm11_vm1 = vcmask 1048448   ;;  %vm18_vm2 = vcmask 917248   ;;  %vm25_vm3 = vcmask 786048   ;;  %s119_s0 = inlined_call_operand.vmem [shape: f32[2,8,16], index: 0, kind: input, shape index: {}]   ;;  %s120_s1 = inlined_call_operand.vmem [shape: f32[2,128], index: 1, kind: output, shape index: {}]  }
   0x1   :  { %v61_v0 = vld [vmem:[%s119_s0 + $0x7] ss:$8 sm:%s7_s6]   ;;  %s75_s10 = smov 112   ;;  %v63_v1 = vld [vmem:[%s119_s0 + $0x5] ss:$8 sm:%s21_s9]   ;;  %s14_s13 = smov 3 }
   0x2   :  { %9 = vrot.lane.b32.xlu0 %v61_v0, %s75_s10  ;;  %s76_s14 = smov 80   ;;  %v62_v2 = vld [vmem:[%s119_s0 + $0x6] ss:$8 sm:%s14_s13]   ;;  %s28_s17 = smov 3  ;;  %vm32_vm4 = vcmask 654848   ;;  %vm39_vm5 = vcmask 523648  }
   0x3   :  { %23 = vrot.lane.b32.xlu1 %v63_v1, %s76_s14  ;;  %v64_v3 = vld [vmem:[%s119_s0 + $0x4] ss:$8 sm:%s28_s17]   ;;  %s35_s20 = smov 3  ;;  %s42_s21 = smov 3  ;;  %vm46_vm6 = vcmask 392448   ;;  %vm53_vm7 = vcmask 261248  }
   0x4   :  { %s77_s22 = smov 96   ;;  %s78_s23 = smov 64   ;;  %v65_v4 = vld [vmem:[%s119_s0 + $0x3] ss:$8 sm:%s35_s20]   ;;  %v66_v5 = vld [vmem:[%s119_s0 + $0x2] ss:$8 sm:%s42_s21]  }
   0x5   :  { %s2_s26 = smov 3  ;;  %s49_s29 = smov 3 }
   0x6   :  { %16 = vrot.lane.b32.xlu0 %v62_v2, %s77_s22  ;;  %v3_v6 = vld [vmem:[%s119_s0] ss:$8 sm:%s2_s26]   ;;  %s79_s3 = smov 48   ;;  %s80_s4 = smov 32  }
   0x7   :  { %30 = vrot.lane.b32.xlu1 %v64_v3, %s78_s23  ;;  %5 = vst.msk [vmem:[#allocation0] sm:$0x3] %vm4_vm0, %v3_v6   ;;  %v67_v7 = vld [vmem:[%s119_s0 + $0x1] ss:$8 sm:%s49_s29]   ;;  %s81_s0 = smov 16  }
   0xa   :  { %37 = vrot.lane.b32.xlu0 %v65_v4, %s79_s3 }
   0xb   :  { %44 = vrot.lane.b32.xlu1 %v66_v5, %s80_s4 }
   0xe   :  { %51 = vrot.lane.b32.xlu0 %v67_v7, %s81_s0 }
  0x74   :  { %v10_v8 = vpop.permute.xlu0 %9  }
  0x75   :  { %12 = vst.msk [vmem:[#allocation0] sm:$0x3] %vm11_vm1, %v10_v8   ;;  %v24_v9 = vpop.permute.xlu1 %23  }
  0x78   :  { %v17_v10 = vpop.permute.xlu0 %16  }
  0x79   :  { %19 = vst.msk [vmem:[#allocation0] sm:$0x3] %vm18_vm2, %v17_v10   ;;  %v31_v11 = vpop.permute.xlu1 %30  }
  0x7a   :  { %26 = vst.msk [vmem:[#allocation0] sm:$0x3] %vm25_vm3, %v24_v9  }
  0x7b   :  { %33 = vst.msk [vmem:[#allocation0] sm:$0x3] %vm32_vm4, %v31_v11  }
  0x7c   :  { %v38_v12 = vpop.permute.xlu0 %37  }
  0x7d   :  { %40 = vst.msk [vmem:[#allocation0] sm:$0x3] %vm39_vm5, %v38_v12   ;;  %v45_v13 = vpop.permute.xlu1 %44  }
  0x7e   :  { %47 = vst.msk [vmem:[#allocation0] sm:$0x3] %vm46_vm6, %v45_v13  }
  0x80   :  { %v52_v14 = vpop.permute.xlu0 %51  }
  0x81   :  { %54 = vst.msk [vmem:[#allocation0] sm:$0x3] %vm53_vm7, %v52_v14  }
  0x88   :  { %v58_v15 = vld [vmem:[#allocation0] sm:$0x3] }
  0x89   :  { %60 = vst [vmem:[%s120_s1] sm:$0x3] %v58_v15 }

// kernel: setpred4re_gcn_forward.1
= control target key start
LH: loop header
LB: loop body
LE: loop exit
PB: predicated region body
PF: predicated region fallthrough
CT: control target
= control target key end

     0   :  { %12 = vsyncpa [#allocation5], 0  ;;  %s8427_s0 = inlined_call_operand.vmem [shape: f32[2,16,16], index: 0, kind: input, shape index: {}]   ;;  %s8428_s1 = inlined_call_operand.vmem [shape: f32[32,128], index: 1, kind: input, shape index: {}]   ;;  %s8429_s2 = inlined_call_operand.hbm [shape: bf16[128,512], index: 2, kind: input, shape index: {}]   ;;  %s8430_s3 = inlined_call_operand.hbm [shape: bf16[128,1024], index: 3, kind: input, shape index: {}]   ;;  %s8431_s4 = inlined_call_operand.vmem [shape: bf16[128,1152], index: 4, kind: input, shape index: {}]   ;;  %s8432_s5 = inlined_call_operand.hbm [shape: f32[42,128], index: 5, kind: input, shape index: {}]   ;;  %s8433_s6 = inlined_call_operand.vmem [shape: f32[18,128], index: 6, kind: input, shape index: {}]   ;;  %s8434_s7 = inlined_call_operand.vmem [shape: f32[32,128], index: 7, kind: output, shape index: {}]  }
   0x1   :  { %13 = vsyncpa [#allocation7], 0  ;;  %s6727_s24 = smov [#allocation6]   ;;  %s6657_s28 = scalar_lea.hbm %s8430_s3, 8192 }
   0x2   :  { %s35_s25 = sshll.u32 %s6727_s24, 4  ;;  %p6658_p0 = scmp.ne.s32.totalorder %s8430_s3, %s6657_s28  ;;  %s36_s25 = int_to_ptr.vmem [resolvable:$true] %s35_s25 }
   0x3   :  { %p6661_p1 = scmp.lt.u32.totalorder %s6657_s28, %s8430_s3 }
   0x5   :  { %p6663_p2 = pnand %p6661_p1, %p6658_p0 }
   0x7   :  { %6666 = shalt.err (!%p6663_p2)
}
   0x8   :  { %s6667_s10 = scalar_lea.vmem %s36_s25, 8192  ;;  %p6672_p4 = scmp.lt.s32.totalorder %s36_s25, %s36_s25 }
   0x9   :  { %p6668_p3 = scmp.ne.s32.totalorder %s36_s25, %s6667_s10  ;;  %p6673_p5 = scmp.lt.s32.totalorder %s6667_s10, %s6667_s10 }
   0xb   :  { %p6674_p6 = por %p6673_p5, %p6672_p4 }
   0xd   :  { %p6675_p7 = pnand %p6674_p6, %p6668_p3 }
   0xf   :  { %6678 = shalt.err (!%p6675_p7)
}
  0x10   :  { %s6728_s11 = smov 512   ;;  %s6729_s12 = smov 32  }
  0x11   :  { %41 = dma.hbm_to_vmem [thread:$0]  %s8430_s3, 8192, %s36_s25, [#allocation7], %s6728_s11, %s6728_s11, %s6729_s12  }
  0x12   :  { %s6730_s15 = smov [#allocation4]   ;;  %s6679_s19 = scalar_lea.hbm %s8429_s2, 4096 }
  0x13   :  { %s23_s16 = sshll.u32 %s6730_s15, 4  ;;  %p6680_p8 = scmp.ne.s32.totalorder %s8429_s2, %s6679_s19  ;;  %s24_s16 = int_to_ptr.vmem [resolvable:$true] %s23_s16 }
  0x14   :  { %p6683_p9 = scmp.lt.u32.totalorder %s6679_s19, %s8429_s2 }
  0x16   :  { %p6685_p10 = pnand %p6683_p9, %p6680_p8 }
  0x18   :  { %6688 = shalt.err (!%p6685_p10)
}
  0x19   :  { %s6689_s24 = scalar_lea.vmem %s24_s16, 4096  ;;  %p6694_p12 = scmp.lt.s32.totalorder %s24_s16, %s24_s16 }
  0x1a   :  { %p6690_p11 = scmp.ne.s32.totalorder %s24_s16, %s6689_s24  ;;  %p6695_p13 = scmp.lt.s32.totalorder %s6689_s24, %s6689_s24 }
  0x1c   :  { %p6696_p0 = por %p6695_p13, %p6694_p12 }
  0x1e   :  { %p6697_p1 = pnand %p6696_p0, %p6690_p11 }
  0x20   :  { %6700 = shalt.err (!%p6697_p1)
}
  0x21   :  { %s6731_s3 = smov 256   ;;  %s6732_s25 = smov 16  }
  0x22   :  { %29 = dma.hbm_to_vmem [thread:$0]  %s8429_s2, 4096, %s24_s16, [#allocation5], %s6731_s3, %s6731_s3, %s6732_s25  }
  0x23   :  { %s6733_s28 = smov [#allocation8]   ;;  %s6701_s9 = scalar_lea.hbm %s8432_s5, 768 }
  0x24   :  { %s49_s29 = sshll.u32 %s6733_s28, 4  ;;  %p6702_p2 = scmp.ne.s32.totalorder %s8432_s5, %s6701_s9  ;;  %s50_s29 = int_to_ptr.vmem [resolvable:$true] %s49_s29 }
  0x25   :  { %p6705_p3 = scmp.lt.u32.totalorder %s6701_s9, %s8432_s5 }
  0x27   :  { %p6707_p4 = pnand %p6705_p3, %p6702_p2 }
  0x29   :  { %6710 = shalt.err (!%p6707_p4)
}
  0x2a   :  { %s6711_s14 = scalar_lea.vmem %s50_s29, 768  ;;  %p6716_p6 = scmp.lt.s32.totalorder %s50_s29, %s50_s29 }
  0x2b   :  { %p6712_p5 = scmp.ne.s32.totalorder %s50_s29, %s6711_s14  ;;  %p6717_p7 = scmp.lt.s32.totalorder %s6711_s14, %s6711_s14 }
  0x2d   :  { %p6718_p8 = por %p6717_p7, %p6716_p6 }
  0x2f   :  { %p6719_p9 = pnand %p6718_p8, %p6712_p5 }
  0x31   :  { %6722 = shalt.err (!%p6719_p9)
}
  0x32   :  { %s6734_s2 = smov 128   ;;  %s6735_s15 = smov 8  }
  0x33   :  { %55 = dma.hbm_to_vmem [thread:$0]  %s8432_s5, 768, %s50_s29, [#allocation7], %s6734_s2, %s6734_s2, %s6735_s15  }
  0x34   :  { %6723 = dma.done.wait [#allocation5], 4096  }
  0x35   :  { %6724 = vsyncadd [#allocation5], 4294963200 }
  0x36   :  { %6725 = dma.done.wait [#allocation7], 8960  }
  0x37   :  { %6726 = vsyncadd [#allocation7], 4294958336  ;;  %vm94_vm0 = vcmask 130048   ;;  %v92_v0 = vld [vmem:[%s8428_s1] sm:$0xff]  ;;  %v93_v1 = vld [vmem:[%s8428_s1 + $0x8] sm:$0xff]  ;;  %v8435_v19 = vmov 0.0  }
  0x38   :  { %v90_v2 = vld [vmem:[%s8427_s0] sm:$0xff]  ;;  %v6220_v3 = vpack.c.bf16 %v93_v1, %v92_v0  ;;  %v179_v4 = vld [vmem:[%s8428_s1 + $0x10] sm:$0xff]  ;;  %v180_v5 = vld [vmem:[%s8428_s1 + $0x18] sm:$0xff]  ;;  %v6737_v46 = vmov 0   ;;  %vm6738_vm1 = vmmov 0   ;;  %vm678_vm3 = vcmask 261120  }
  0x39   :  { %5814 = vmatprep.mubr.msk.f32.mxu1 %vm94_vm0, %v90_v2  ;;  %v91_v6 = vld [vmem:[%s8427_s0 + $0x8] sm:$0xff]  ;;  %v6224_v7 = vpack.c.bf16 %v180_v5, %v179_v4  ;;  %v6241_v8 = vld [vmem:[#allocation4] ss:$16 sps:$4 sm:$0xff]   ;;  %v5378_v12 = vld [vmem:[%s8427_s0 + $0x18] sm:$0xff]  ;;  %vm5344_vm6 = vcmask 1040384   ;;  %vm5346_vm7 = vcmask 1041408  }
  0x3a   :  { %6221 = vmatprep.subr.bf16.mxu1 %v6220_v3  ;;  %v6242_v9 = vld [vmem:[#allocation4 + $0x20] ss:$16 sps:$4 sm:$0xff]   ;;  %5824 = vmatprep.subr.bf16.mxu0 %v6241_v8  ;;  %v6251_v18 = vld [vmem:[#allocation4 + $0xc] ss:$16 sps:$4 sm:$0xff]   ;;  %v6261_v20 = vld [vmem:[#allocation4 + $0x4] ss:$16 sps:$4 sm:$0xff]  }
  0x3b   :  { %6223 = vmatpush3.bf16.msra.mxu1 %v6220_v3  ;;  %v5377_v10 = vld [vmem:[%s8427_s0 + $0x10] sm:$0xff]  ;;  %5825 = vmatpush3.bf16.msra.mxu0 %v6241_v8  ;;  %v6249_v27 = vld [vmem:[#allocation4 + $0x8] ss:$16 sps:$4 sm:$0xff]   ;;  %v6254_v29 = vld [vmem:[#allocation4 + $0x2c] ss:$16 sps:$4 sm:$0xff]   ;;  %vm5348_vm8 = vcmask 1042432  }
  0x3c   :  { %6225 = vmatprep.subr.bf16.mxu1 %v6224_v7  ;;  %5826 = vmatprep.subr.bf16.mxu0 %v6242_v9  ;;  %v6243_v11 = vld [vmem:[#allocation4 + $0x40] ss:$16 sps:$4 sm:$0xff]   ;;  %v6265_v21 = vld [vmem:[#allocation4 + $0x24] ss:$16 sps:$4 sm:$0xff]   ;;  %v6252_v30 = vld [vmem:[#allocation4 + $0x28] ss:$16 sps:$4 sm:$0xff]  }
  0x3d   :  { %v6244_v13 = vld [vmem:[#allocation4 + $0x60] ss:$16 sps:$4 sm:$0xff]   ;;  %v6257_v31 = vld [vmem:[#allocation4 + $0x4c] ss:$16 sps:$4 sm:$0xff]   ;;  %v6255_v32 = vld [vmem:[#allocation4 + $0x48] ss:$16 sps:$4 sm:$0xff]  }
  0x3e   :  { %5815 = vmatmul.mubr.msk.f32.vlgmr.msra.gmra.mrb[0].mxu1 %vm94_vm0, %v91_v6  ;;  %v6245_v14 = vld [vmem:[#allocation4 + $0x80] ss:$16 sps:$4 sm:$0xff]   ;;  %v6260_v33 = vld [vmem:[#allocation4 + $0x6c] ss:$16 sps:$4 sm:$0xff]   ;;  %v6258_v34 = vld [vmem:[#allocation4 + $0x68] ss:$16 sps:$4 sm:$0xff]  }
  0x3f   :  { %6227 = vmatpush3.bf16.msra.mxu1 %v6224_v7  ;;  %5821 = vmatprep.mubr.msk.f32.mxu1 %vm94_vm0, %v5377_v10  ;;  %v6246_v15 = vld [vmem:[#allocation4 + $0xa0] ss:$16 sps:$4 sm:$0xff]   ;;  %v6264_v35 = vld [vmem:[#allocation4 + $0x8c] ss:$16 sps:$4 sm:$0xff]   ;;  %v6262_v36 = vld [vmem:[#allocation4 + $0x88] ss:$16 sps:$4 sm:$0xff]  }
  0x40   :  { %5827 = vmatpush3.bf16.msra.mxu0 %v6242_v9  ;;  %v6247_v16 = vld [vmem:[#allocation4 + $0xc0] ss:$16 sps:$4 sm:$0xff]   ;;  %5844 = vmatprep.subr.bf16.mxu1 %v8435_v19  ;;  %v6268_v37 = vld [vmem:[#allocation4 + $0xac] ss:$16 sps:$4 sm:$0xff]   ;;  %v6266_v38 = vld [vmem:[#allocation4 + $0xa8] ss:$16 sps:$4 sm:$0xff]  }
  0x41   :  { %5828 = vmatprep.subr.bf16.mxu0 %v6243_v11  ;;  %v6248_v17 = vld [vmem:[#allocation4 + $0xe0] ss:$16 sps:$4 sm:$0xff]   ;;  %v6269_v39 = vld [vmem:[#allocation4 + $0x44] ss:$16 sps:$4 sm:$0xff]   ;;  %v6272_v40 = vld [vmem:[#allocation4 + $0xcc] ss:$16 sps:$4 sm:$0xff]  }
  0x42   :  { %5822 = vmatmul.mubr.msk.f32.vlgmr.msra.gmra.mrb[2].mxu1 %vm94_vm0, %v5378_v12  ;;  %v6270_v41 = vld [vmem:[#allocation4 + $0xc8] ss:$16 sps:$4 sm:$0xff]   ;;  %v6273_v42 = vld [vmem:[#allocation4 + $0x64] ss:$16 sps:$4 sm:$0xff]   ;;  %v6276_v43 = vld [vmem:[#allocation4 + $0xec] ss:$16 sps:$4 sm:$0xff]  }
  0x43   :  { %5845 = vmatpush3.bf16.msra.mxu1 %v6261_v20  ;;  %v6274_v44 = vld [vmem:[#allocation4 + $0xe8] ss:$16 sps:$4 sm:$0xff]   ;;  %v6277_v45 = vld [vmem:[#allocation4 + $0x84] ss:$16 sps:$4 sm:$0xff]   ;;  %5860 = vmatprep.mubr.msk.bf16.mxu1 %vm6738_vm1, %v8435_v19  ;;  %v5381_v53 = vld [vmem:[#allocation8] ss:$0 sm:$0xff] }
  0x44   :  { %5829 = vmatpush3.bf16.msra.mxu0 %v6243_v11  ;;  %5846 = vmatprep.subr.bf16.mxu1 %v8435_v19  ;;  %v6278_v47 = vld [vmem:[#allocation4 + $0xa4] ss:$16 sps:$4 sm:$0xff]   ;;  %v70_v50 = vld [vmem:[#allocation8 + $0x1a] sm:$0xff]  ;;  %vm5350_vm9 = vcmask 1043456   ;;  %vm5352_vm10 = vcmask 1044480   ;;  %vm5354_vm11 = vcmask 1045504  }
  0x45   :  { %5830 = vmatprep.subr.bf16.mxu0 %v6244_v13  ;;  %v6279_v48 = vld [vmem:[#allocation4 + $0xc4] ss:$16 sps:$4 sm:$0xff]   ;;  %vm5356_vm12 = vcmask 1046528  }
  0x46   :  { %v6280_v49 = vld [vmem:[#allocation4 + $0xe4] ss:$16 sps:$4 sm:$0xff]  }
  0x47   :  { %5847 = vmatpush3.bf16.msra.mxu1 %v6265_v21  ;;  %v71_v51 = vld [vmem:[#allocation8 + $0x22] sm:$0xff] }
  0x48   :  { %5831 = vmatpush3.bf16.msra.mxu0 %v6244_v13  ;;  %5848 = vmatprep.subr.bf16.mxu1 %v8435_v19  ;;  %v403_v52 = vpack.c.bf16 %v71_v51, %v70_v50  ;;  %v6298_v50 = vld [vmem:[%s8431_s4 + $0x9c] ss:$36 sps:$4 sm:$0xff]  }
  0x49   :  { %5832 = vmatprep.subr.bf16.mxu0 %v6245_v14  ;;  %v6296_v51 = vld [vmem:[%s8431_s4 + $0x98] ss:$36 sps:$4 sm:$0xff]  }
  0x4b   :  { %5849 = vmatpush3.bf16.msra.mxu1 %v6269_v39 }
  0x4c   :  { %5833 = vmatpush3.bf16.msra.mxu0 %v6245_v14  ;;  %5850 = vmatprep.subr.bf16.mxu1 %v8435_v19 }
  0x4d   :  { %5834 = vmatprep.subr.bf16.mxu0 %v6246_v15 }
  0x4f   :  { %5851 = vmatpush3.bf16.msra.mxu1 %v6273_v42 }
  0x50   :  { %5835 = vmatpush3.bf16.msra.mxu0 %v6246_v15  ;;  %5852 = vmatprep.subr.bf16.mxu1 %v8435_v19 }
  0x51   :  { %5836 = vmatprep.subr.bf16.mxu0 %v6247_v16 }
  0x53   :  { %5853 = vmatpush3.bf16.msra.mxu1 %v6277_v45  ;;  %v6284_v45 = vld [vmem:[%s8431_s4 + $0x8] ss:$36 sps:$4 sm:$0xff]  }
  0x54   :  { %5837 = vmatpush3.bf16.msra.mxu0 %v6247_v16  ;;  %5854 = vmatprep.subr.bf16.mxu1 %v8435_v19 }
  0x55   :  { %5838 = vmatprep.subr.bf16.mxu0 %v6248_v17 }
  0x57   :  { %5855 = vmatpush3.bf16.msra.mxu1 %v6278_v47  ;;  %v6286_v47 = vld [vmem:[%s8431_s4 + $0xc] ss:$36 sps:$4 sm:$0xff]  }
  0x58   :  { %5839 = vmatpush3.bf16.msra.mxu0 %v6248_v17  ;;  %5856 = vmatprep.subr.bf16.mxu1 %v8435_v19 }
  0x59   :  { %573 = vmatprep.subr.bf16.mxu0 %v6251_v18 }
  0x5b   :  { %5857 = vmatpush3.bf16.msra.mxu1 %v6279_v48  ;;  %v6292_v48 = vld [vmem:[%s8431_s4 + $0x54] ss:$36 sps:$4 sm:$0xff]  }
  0x5c   :  { %5858 = vmatprep.subr.bf16.mxu1 %v8435_v19 }
  0x5f   :  { %5859 = vmatpush3.bf16.msra.mxu1 %v6280_v49  ;;  %v6290_v49 = vld [vmem:[%s8431_s4 + $0x50] ss:$36 sps:$4 sm:$0xff]  }
  0x60   :  { %5872 = vmatprep.subr.bf16.mxu1 %v8435_v19 }
  0x62   :  { %5861 = vmatmul.mubr.bf16.vlgmr.msra.gmra.mrb[4].mxu1 %v403_v52  ;;  %v6304_v52 = vld [vmem:[%s8431_s4 + $0xe4] ss:$36 sps:$4 sm:$0xff]  }
  0x63   :  { %5876 = vmatprep.mubr.msk.bf16.mxu1 %vm6738_vm1, %v8435_v19 }
 0x111   :  { %v5816_v22 = vpop.f32.mrb[0].mxu1 }
 0x112   :  { %v167_v23 = vpop.f32.mrb[1].mxu1 }
 0x113   :  { %v262_v24 = vpack.c.bf16 %v5816_v22, %v167_v23  ;;  %v72_v22 = vld [vmem:[%s8433_s6 + $0x2] sm:$0xff]  ;;  %v73_v23 = vld [vmem:[%s8433_s6 + $0xa] sm:$0xff] }
 0x114   :  { %vm674_vm2 = vcmp.eq.f32.partialorder %v72_v22, 0.0  ;;  %vm675_vm4 = vcmp.eq.f32.partialorder %v73_v23, 0.0  ;;  %v6326_v22 = vld [vmem:[%s8431_s4 + $0x200] ss:$36 sps:$4 sm:$0xff]   ;;  %v6331_v23 = vld [vmem:[%s8431_s4 + $0x14] ss:$36 sps:$4 sm:$0xff]  }
 0x115   :  { %v5823_v25 = vpop.f32.mrb[2].mxu1  ;;  %5840 = vmatprep.mubr.bf16.mxu0 %v262_v24 }
 0x116   :  { %v253_v26 = vpop.f32.mrb[3].mxu1 }
 0x117   :  { %v263_v28 = vpack.c.bf16 %v5823_v25, %v253_v26 }
 0x119   :  { %5841 = vmatmul.mubr.bf16.vlgmr.msra.gmra.mrb[0].mxu0 %v263_v28 }
 0x11a   :  { %574 = vmatpush1.bf16.msra.mxu0 %v6249_v27  ;;  %605 = vmatprep.mubr.bf16.mxu0 %v6737_v46 }
 0x11b   :  { %575 = vmatprep.subr.bf16.mxu0 %v6254_v29 }
 0x11e   :  { %576 = vmatpush1.bf16.msra.mxu0 %v6252_v30 }
 0x11f   :  { %577 = vmatprep.subr.bf16.mxu0 %v6257_v31 }
 0x122   :  { %578 = vmatpush1.bf16.msra.mxu0 %v6255_v32 }
 0x123   :  { %579 = vmatprep.subr.bf16.mxu0 %v6260_v33 }
 0x126   :  { %580 = vmatpush1.bf16.msra.mxu0 %v6258_v34 }
 0x127   :  { %581 = vmatprep.subr.bf16.mxu0 %v6264_v35 }
 0x12a   :  { %582 = vmatpush1.bf16.msra.mxu0 %v6262_v36 }
 0x12b   :  { %583 = vmatprep.subr.bf16.mxu0 %v6268_v37 }
 0x12e   :  { %584 = vmatpush1.bf16.msra.mxu0 %v6266_v38 }
 0x12f   :  { %585 = vmatprep.subr.bf16.mxu0 %v6272_v40 }
 0x132   :  { %586 = vmatpush1.bf16.msra.mxu0 %v6270_v41 }
 0x133   :  { %587 = vmatprep.subr.bf16.mxu0 %v6276_v43 }
 0x135   :  { %v486_v4 = vpop.f32.mrb[4].mxu1 }
 0x136   :  { %588 = vmatpush1.bf16.msra.mxu0 %v6274_v44  ;;  %v5862_v5 = vpop.f32.mrb[5].mxu1  ;;  %v6283_v44 = vld [vmem:[%s8431_s4 + $0x4] ss:$36 sps:$4 sm:$0xff]  }
 0x137   :  { %5864 = vmatprep.subr.bf16.mxu0 %v8435_v19  ;;  %v489_v6 = vpop.f32.mrb[6].mxu1 }
 0x138   :  { %v630_v7 = vpack.c.bf16 %v489_v6, %v486_v4  ;;  %v5863_v8 = vpop.f32.mrb[7].mxu1  ;;  %v6281_v4 = vld [vmem:[%s8431_s4] ss:$36 sps:$4 sm:$0xff]   ;;  %v6289_v6 = vld [vmem:[%s8431_s4 + $0x4c] ss:$36 sps:$4 sm:$0xff]  }
 0x139   :  { %v6295_v8 = vld [vmem:[%s8431_s4 + $0x94] ss:$36 sps:$4 sm:$0xff]  }
 0x1ec   :  { %v5842_v54 = vpop.f32.mrb[0].mxu0 }
 0x1ed   :  { %v359_v55 = vadd.f32 %v5842_v54, %v5381_v53  ;;  %v350_v56 = vpop.f32.mrb[1].mxu0  ;;  %v6310_v54 = vld [vmem:[%s8431_s4 + $0x12c] ss:$36 sps:$4 sm:$0xff]  }
 0x1ee   :  { %v351_v57 = vadd.f32 %v5381_v53, %v350_v56  ;;  %v5843_v58 = vpop.f32.mrb[2].mxu0  ;;  %v6316_v56 = vld [vmem:[%s8431_s4 + $0x174] ss:$36 sps:$4 sm:$0xff]  }
 0x1ef   :  { %v362_v59 = vadd.f32 %v5843_v58, %v5381_v53  ;;  %v353_v60 = vpop.f32.mrb[3].mxu0  ;;  %v367_v62 = vmax.f32 %v359_v55, 0.0  ;;  %v6308_v55 = vld [vmem:[%s8431_s4 + $0x128] ss:$36 sps:$4 sm:$0xff]   ;;  %v6322_v58 = vld [vmem:[%s8431_s4 + $0x1bc] ss:$36 sps:$4 sm:$0xff]  }
 0x1f0   :  { %v354_v61 = vadd.f32 %v5381_v53, %v353_v60  ;;  %v365_v0 = vmax.f32 %v351_v57, 0.0  ;;  %v6302_v53 = vld [vmem:[%s8431_s4 + $0xe0] ss:$36 sps:$4 sm:$0xff]   ;;  %v6314_v57 = vld [vmem:[%s8431_s4 + $0x170] ss:$36 sps:$4 sm:$0xff]  }
 0x1f1   :  { %v368_v63 = vmax.f32 %v362_v59, 0.0  ;;  %v6320_v59 = vld [vmem:[%s8431_s4 + $0x1b8] ss:$36 sps:$4 sm:$0xff]  }
 0x1f2   :  { %v366_v1 = vmax.f32 %v354_v61, 0.0 }
 0x1f3   :  { %v6859_v2 = vpack.c.bf16 %v368_v63, %v367_v62 }
 0x1f4   :  { %v6861_v3 = vpack.c.bf16 %v366_v1, %v365_v0 }
 0x1f6   :  { %606 = vmatmul.mubr.bf16.vlgmr.msra.gmra.mrb[4].mxu0 %v6861_v3 }
 0x1f7   :  { %615 = vmatprep.mubr.bf16.mxu0 %v6737_v46 }
 0x1fe   :  { %616 = vmatmul.mubr.bf16.gmra.mrb[8].mxu0 %v6859_v2 }
 0x1ff   :  { %5868 = vmatprep.mubr.msk.bf16.mxu0 %vm6738_vm1, %v8435_v19 }
 0x2c9   :  { %v607_v9 = vpop.f32.mrb[4].mxu0 }
 0x2ca   :  { %v609_v10 = vpop.f32.mrb[5].mxu0 }
 0x2cb   :  { %v611_v11 = vpop.f32.mrb[6].mxu0 }
 0x2cc   :  { %v626_v12 = vpack.c.bf16 %v611_v11, %v607_v9  ;;  %v613_v13 = vpop.f32.mrb[7].mxu0  ;;  %v6293_v9 = vld [vmem:[%s8431_s4 + $0x90] ss:$36 sps:$4 sm:$0xff]   ;;  %v6299_v11 = vld [vmem:[%s8431_s4 + $0xd8] ss:$36 sps:$4 sm:$0xff]  }
 0x2cd   :  { %v628_v14 = vpack.c.bf16 %v613_v13, %v609_v10  ;;  %v6301_v10 = vld [vmem:[%s8431_s4 + $0xdc] ss:$36 sps:$4 sm:$0xff]  }
 0x2ce   :  { %5865 = vmatpush3.bf16.xpose.msra.mxu0 %v626_v12  ;;  %v6307_v12 = vld [vmem:[%s8431_s4 + $0x124] ss:$36 sps:$4 sm:$0xff]  }
 0x2cf   :  { %5873 = vmatpush3.bf16.msra.mxu1 %v628_v14  ;;  %5866 = vmatprep.subr.bf16.mxu0 %v8435_v19  ;;  %v6305_v13 = vld [vmem:[%s8431_s4 + $0x120] ss:$36 sps:$4 sm:$0xff]   ;;  %v6313_v14 = vld [vmem:[%s8431_s4 + $0x16c] ss:$36 sps:$4 sm:$0xff]  }
 0x2d0   :  { %5874 = vmatprep.subr.bf16.mxu1 %v8435_v19 }
 0x2d1   :  { %v617_v15 = vpop.f32.mrb[8].mxu0 }
 0x2d2   :  { %v619_v16 = vpop.f32.mrb[9].mxu0 }
 0x2d3   :  { %v621_v17 = vpop.f32.mrb[10].mxu0 }
 0x2d4   :  { %v627_v18 = vpack.c.bf16 %v621_v17, %v617_v15  ;;  %v623_v20 = vpop.f32.mrb[11].mxu0  ;;  %v6311_v15 = vld [vmem:[%s8431_s4 + $0x168] ss:$36 sps:$4 sm:$0xff]   ;;  %v6317_v17 = vld [vmem:[%s8431_s4 + $0x1b0] ss:$36 sps:$4 sm:$0xff]  }
 0x2d5   :  { %v629_v21 = vpack.c.bf16 %v623_v20, %v619_v16  ;;  %v6319_v16 = vld [vmem:[%s8431_s4 + $0x1b4] ss:$36 sps:$4 sm:$0xff]   ;;  %v6328_v20 = vld [vmem:[%s8431_s4 + $0x204] ss:$36 sps:$4 sm:$0xff]  }
 0x2d6   :  { %5867 = vmatpush3.bf16.xpose.msra.mxu0 %v627_v18  ;;  %v6325_v18 = vld [vmem:[%s8431_s4 + $0x1fc] ss:$36 sps:$4 sm:$0xff]  }
 0x2d7   :  { %5875 = vmatpush3.bf16.msra.mxu1 %v629_v21  ;;  %1238 = vmatprep.subr.bf16.mxu0 %v6286_v47  ;;  %v6323_v21 = vld [vmem:[%s8431_s4 + $0x1f8] ss:$36 sps:$4 sm:$0xff]   ;;  %v6353_v47 = vld [vmem:[%s8431_s4 + $0x130] ss:$36 sps:$4 sm:$0xff]  }
 0x2d8   :  { %1195 = vmatprep.subr.bf16.mxu1 %v6283_v44  ;;  %v6355_v44 = vld [vmem:[%s8431_s4 + $0x134] ss:$36 sps:$4 sm:$0xff]  }
 0x2dd   :  { %5869 = vmatmul.mubr.bf16.vlgmr.msra.gmra.mrb[12].mxu0 %v630_v7  ;;  %v6287_v7 = vld [vmem:[%s8431_s4 + $0x48] ss:$36 sps:$4 sm:$0xff]  }
 0x2de   :  { %1270 = vmatprep.mubr.bf16.mxu0 %v6737_v46  ;;  %1239 = vmatpush1.bf16.msra.mxu0 %v6284_v45  ;;  %v6358_v45 = vld [vmem:[%s8431_s4 + $0x13c] ss:$36 sps:$4 sm:$0xff]  }
 0x2df   :  { %1240 = vmatprep.subr.bf16.mxu0 %v6292_v48  ;;  %v6356_v48 = vld [vmem:[%s8431_s4 + $0x138] ss:$36 sps:$4 sm:$0xff]  }
 0x2e2   :  { %1241 = vmatpush1.bf16.msra.mxu0 %v6290_v49  ;;  %v6361_v49 = vld [vmem:[%s8431_s4 + $0x17c] ss:$36 sps:$4 sm:$0xff]  }
 0x2e3   :  { %1242 = vmatprep.subr.bf16.mxu0 %v6298_v50  ;;  %v6364_v50 = vld [vmem:[%s8431_s4 + $0x184] ss:$36 sps:$4 sm:$0xff]  }
 0x2e6   :  { %1243 = vmatpush1.bf16.msra.mxu0 %v6296_v51  ;;  %v6359_v51 = vld [vmem:[%s8431_s4 + $0x178] ss:$36 sps:$4 sm:$0xff]  }
 0x2e7   :  { %1244 = vmatprep.subr.bf16.mxu0 %v6304_v52  ;;  %v6362_v52 = vld [vmem:[%s8431_s4 + $0x180] ss:$36 sps:$4 sm:$0xff]  }
 0x2ea   :  { %1245 = vmatpush1.bf16.msra.mxu0 %v6302_v53  ;;  %v6367_v53 = vld [vmem:[%s8431_s4 + $0x1c4] ss:$36 sps:$4 sm:$0xff]  }
 0x2eb   :  { %1246 = vmatprep.subr.bf16.mxu0 %v6310_v54  ;;  %v6370_v54 = vld [vmem:[%s8431_s4 + $0x1cc] ss:$36 sps:$4 sm:$0xff]  }
 0x2ee   :  { %1247 = vmatpush1.bf16.msra.mxu0 %v6308_v55  ;;  %v6365_v55 = vld [vmem:[%s8431_s4 + $0x1c0] ss:$36 sps:$4 sm:$0xff]  }
 0x2ef   :  { %1248 = vmatprep.subr.bf16.mxu0 %v6316_v56  ;;  %v6368_v56 = vld [vmem:[%s8431_s4 + $0x1c8] ss:$36 sps:$4 sm:$0xff]  }
 0x2f2   :  { %1249 = vmatpush1.bf16.msra.mxu0 %v6314_v57  ;;  %v6373_v57 = vld [vmem:[%s8431_s4 + $0x20c] ss:$36 sps:$4 sm:$0xff]  }
 0x2f3   :  { %1250 = vmatprep.subr.bf16.mxu0 %v6322_v58  ;;  %v6376_v58 = vld [vmem:[%s8431_s4 + $0x214] ss:$36 sps:$4 sm:$0xff]  }
 0x2f6   :  { %1251 = vmatpush1.bf16.msra.mxu0 %v6320_v59  ;;  %v1430_v59 = vld [vmem:[#allocation6] sm:$0xff] }
 0x2f7   :  { %1252 = vmatprep.subr.bf16.mxu0 %v6328_v20 }
 0x2fa   :  { %1253 = vmatpush1.bf16.msra.mxu0 %v6326_v22 }
 0x3b0   :  { %v665_v24 = vpop.f32.mrb[12].mxu0 }
 0x3b1   :  { %v672_v25 = vmul.f32 0.088388346, %v665_v24  ;;  %v5870_v26 = vpop.f32.mrb[13].mxu0  ;;  %v6334_v24 = vld [vmem:[%s8431_s4 + $0x1c] ss:$36 sps:$4 sm:$0xff]  }
 0x3b2   :  { %v668_v27 = vpop.f32.mrb[14].mxu0  ;;  %1324 = vmatprep.subr.bf16.mxu0 %v6334_v24  ;;  %v1474_v24 = vld [vmem:[#allocation6 + $0x160] sm:$0xff] }
 0x3b3   :  { %v673_v28 = vmul.f32 0.088388346, %v668_v27  ;;  %v5871_v29 = vpop.f32.mrb[15].mxu0  ;;  %v676_v30 = vsel %vm674_vm2, -10000.0, %v672_v25 }
 0x3b4   :  { %v679_v31 = vsel %vm678_vm3, %v676_v30, -inf  ;;  %v6332_v29 = vld [vmem:[%s8431_s4 + $0x18] ss:$36 sps:$4 sm:$0xff]  }
 0x3b5   :  { %680 = vmax.xlane.f32.xlu0 %v679_v31  ;;  %v677_v32 = vsel %vm675_vm4, -10000.0, %v673_v28  ;;  %v6329_v28 = vld [vmem:[%s8431_s4 + $0x10] ss:$36 sps:$4 sm:$0xff]  }
 0x3b6   :  { %v682_v33 = vsel %vm678_vm3, %v677_v32, -inf }
 0x3b9   :  { %683 = vmax.xlane.f32.xlu0 %v682_v33  ;;  %v6340_v33 = vld [vmem:[%s8431_s4 + $0x64] ss:$36 sps:$4 sm:$0xff]  }
 0x442   :  { %v681_v34 = vpop.xlane.xlu0 %680 }
 0x443   :  { %v685_v35 = vsub.f32 %v676_v30, %v681_v34  ;;  %v6335_v34 = vld [vmem:[%s8431_s4 + $0x58] ss:$36 sps:$4 sm:$0xff]  }
 0x445   :  { %v687_v36 = vmul.f32 1.442695, %v685_v35  ;;  %v6338_v35 = vld [vmem:[%s8431_s4 + $0x60] ss:$36 sps:$4 sm:$0xff]  }
 0x446   :  { %v684_v37 = vpop.xlane.xlu0 %683 }
 0x447   :  { %6393 = vpow2.f32 %v687_v36  ;;  %v686_v38 = vsub.f32 %v677_v32, %v684_v37  ;;  %v6337_v32 = vld [vmem:[%s8431_s4 + $0x5c] ss:$36 sps:$4 sm:$0xff]   ;;  %v6343_v36 = vld [vmem:[%s8431_s4 + $0xa4] ss:$36 sps:$4 sm:$0xff]   ;;  %v6346_v37 = vld [vmem:[%s8431_s4 + $0xac] ss:$36 sps:$4 sm:$0xff]  }
 0x449   :  { %v689_v39 = vmul.f32 1.442695, %v686_v38  ;;  %v6341_v38 = vld [vmem:[%s8431_s4 + $0xa0] ss:$36 sps:$4 sm:$0xff]  }
 0x44b   :  { %6395 = vpow2.f32 %v689_v39  ;;  %v6344_v39 = vld [vmem:[%s8431_s4 + $0xa8] ss:$36 sps:$4 sm:$0xff]  }
 0x451   :  { %v6394_v40 = vpop.eup %6393 }
 0x452   :  { %v691_v41 = vsel %vm678_vm3, %v6394_v40, 0.0 }
 0x453   :  { %692 = vadd.xlane.f32.xlu1 %v691_v41  ;;  %v6352_v41 = vld [vmem:[%s8431_s4 + $0xf4] ss:$36 sps:$4 sm:$0xff]  }
 0x455   :  { %v6396_v42 = vpop.eup %6395 }
 0x456   :  { %v694_v43 = vsel %vm678_vm3, %v6396_v42, 0.0 }
 0x457   :  { %695 = vadd.xlane.f32.xlu1 %v694_v43  ;;  %v6350_v43 = vld [vmem:[%s8431_s4 + $0xf0] ss:$36 sps:$4 sm:$0xff]  }
 0x4e0   :  { %v693_v60 = vpop.xlane.xlu1 %692 }
 0x4e1   :  { %6397 = vrcp.f32 %v693_v60  ;;  %v1434_v60 = vld [vmem:[#allocation6 + $0x20] sm:$0xff] }
 0x4e4   :  { %v696_v61 = vpop.xlane.xlu1 %695 }
 0x4e5   :  { %6399 = vrcp.f32 %v696_v61  ;;  %v6371_v61 = vld [vmem:[%s8431_s4 + $0x208] ss:$36 sps:$4 sm:$0xff]  }
 0x4eb   :  { %v6398_v62 = vpop.eup %6397 }
 0x4ec   :  { %v698_v0 = vmul.f32 %v6398_v62, %v6394_v40  ;;  %v6349_v40 = vld [vmem:[%s8431_s4 + $0xec] ss:$36 sps:$4 sm:$0xff]  }
 0x4ed   :  { %v6374_v62 = vld [vmem:[%s8431_s4 + $0x210] ss:$36 sps:$4 sm:$0xff]  }
 0x4ef   :  { %v6400_v63 = vpop.eup %6399 }
 0x4f0   :  { %v700_v1 = vmul.f32 %v6400_v63, %v6396_v42  ;;  %v6347_v42 = vld [vmem:[%s8431_s4 + $0xe8] ss:$36 sps:$4 sm:$0xff]   ;;  %v5489_v63 = vcombine.high %v1430_v59, %v1434_v60 }
 0x4f2   :  { %v701_v5 = vpack.c.bf16 %v700_v1, %v698_v0  ;;  %v1438_v0 = vld [vmem:[#allocation6 + $0x40] sm:$0xff] }
 0x4f3   :  { %v1442_v1 = vld [vmem:[#allocation6 + $0x60] sm:$0xff] }
 0x4f4   :  { %5877 = vmatmul.mubr.msk.bf16.vlgmr.msra.gmra.mrb[8].mxu1 %vm678_vm3, %v701_v5  ;;  %v6377_v5 = vld [vmem:[%s8431_s4 + $0x20] ss:$36 sps:$4 sm:$0xff]  }
 0x4f5   :  { %1196 = vmatpush1.bf16.msra.mxu1 %v6281_v4  ;;  %1227 = vmatprep.mubr.bf16.mxu1 %v6737_v46  ;;  %v5488_v4 = vcombine.low %v1430_v59, %v1434_v60  ;;  %v1452_v59 = vld [vmem:[#allocation6 + $0xb0] sm:$0xff] }
 0x4f6   :  { %1197 = vmatprep.subr.bf16.mxu1 %v6289_v6  ;;  %v5497_v6 = vcombine.high %v1438_v0, %v1442_v1 }
 0x4f9   :  { %1198 = vmatpush1.bf16.msra.mxu1 %v6287_v7  ;;  %v1446_v7 = vld [vmem:[#allocation6 + $0x80] sm:$0xff] }
 0x4fa   :  { %1199 = vmatprep.subr.bf16.mxu1 %v6295_v8  ;;  %v1450_v8 = vld [vmem:[#allocation6 + $0xa0] sm:$0xff] }
 0x4fd   :  { %1200 = vmatpush1.bf16.msra.mxu1 %v6293_v9  ;;  %v5496_v9 = vcombine.low %v1438_v0, %v1442_v1  ;;  %v1455_v0 = vld [vmem:[#allocation6 + $0xc8] sm:$0xff] }
 0x4fe   :  { %1201 = vmatprep.subr.bf16.mxu1 %v6301_v10  ;;  %v6378_v10 = vld [vmem:[%s8431_s4 + $0x68] ss:$36 sps:$4 sm:$0xff]  }
 0x4ff   :  { %v1459_v1 = vld [vmem:[#allocation6 + $0xe8] sm:$0xff] }
 0x501   :  { %1202 = vmatpush1.bf16.msra.mxu1 %v6299_v11  ;;  %v5505_v11 = vcombine.high %v1446_v7, %v1450_v8 }
 0x502   :  { %1203 = vmatprep.subr.bf16.mxu1 %v6307_v12  ;;  %v1454_v12 = vld [vmem:[#allocation6 + $0xc0] sm:$0xff] }
 0x505   :  { %1204 = vmatpush1.bf16.msra.mxu1 %v6305_v13  ;;  %v1458_v13 = vld [vmem:[#allocation6 + $0xe0] sm:$0xff] }
 0x506   :  { %1205 = vmatprep.subr.bf16.mxu1 %v6313_v14  ;;  %v5504_v14 = vcombine.low %v1446_v7, %v1450_v8  ;;  %v5512_v20 = vcombine.low %v1454_v12, %v1458_v13  ;;  %v5515_v7 = vcombine.high %v1455_v0, %v1459_v1 }
 0x509   :  { %1206 = vmatpush1.bf16.msra.mxu1 %v6311_v15  ;;  %v6379_v15 = vld [vmem:[%s8431_s4 + $0xb0] ss:$36 sps:$4 sm:$0xff]  }
 0x50a   :  { %1207 = vmatprep.subr.bf16.mxu1 %v6319_v16  ;;  %v5513_v16 = vcombine.high %v1454_v12, %v1458_v13  ;;  %v1468_v12 = vld [vmem:[#allocation6 + $0x130] sm:$0xff]  ;;  %v5514_v13 = vcombine.low %v1455_v0, %v1459_v1  ;;  %v1473_v1 = vld [vmem:[#allocation6 + $0x158] sm:$0xff] }
 0x50d   :  { %1208 = vmatpush1.bf16.msra.mxu1 %v6317_v17  ;;  %v1462_v17 = vld [vmem:[#allocation6 + $0x100] sm:$0xff] }
 0x50e   :  { %1209 = vmatprep.subr.bf16.mxu1 %v6325_v18  ;;  %v1466_v18 = vld [vmem:[#allocation6 + $0x120] sm:$0xff] }
 0x50f   :  { %v5521_v22 = vcombine.high %v1462_v17, %v1466_v18 }
 0x511   :  { %1210 = vmatpush1.bf16.msra.mxu1 %v6323_v21  ;;  %v6380_v21 = vld [vmem:[%s8431_s4 + $0xf8] ss:$36 sps:$4 sm:$0xff]  }
 0x512   :  { %1281 = vmatprep.subr.bf16.mxu1 %v6331_v23  ;;  %v1470_v23 = vld [vmem:[#allocation6 + $0x140] sm:$0xff] }
 0x5c7   :  { %v739_v25 = vpop.f32.mrb[8].mxu1 }
 0x5c8   :  { %v5878_v26 = vpop.f32.mrb[9].mxu1 }
 0x5c9   :  { %v742_v27 = vpop.f32.mrb[10].mxu1  ;;  %v6381_v26 = vld [vmem:[%s8431_s4 + $0x140] ss:$36 sps:$4 sm:$0xff]  }
 0x5ca   :  { %v6991_v30 = vpack.c.bf16 %v742_v27, %v739_v25  ;;  %v5879_v31 = vpop.f32.mrb[11].mxu1  ;;  %v5520_v25 = vcombine.low %v1462_v17, %v1466_v18  ;;  %v5529_v27 = vcombine.high %v1470_v23, %v1474_v24  ;;  %v1471_v17 = vld [vmem:[#allocation6 + $0x148] sm:$0xff] }
 0x5cb   :  { %v5528_v31 = vcombine.low %v1470_v23, %v1474_v24  ;;  %v1475_v18 = vld [vmem:[#allocation6 + $0x168] sm:$0xff] }
 0x5cc   :  { %1228 = vmatmul.mubr.bf16.vlgmr.msra.gmra.mrb[12].mxu1 %v6991_v30  ;;  %1271 = vmatmul.mubr.bf16.vlgmr.msra.gmra.mrb[16].mxu0 %v6991_v30  ;;  %v5531_v24 = vcombine.high %v1471_v17, %v1475_v18 }
 0x5cd   :  { %1282 = vmatpush1.bf16.msra.mxu1 %v6329_v28  ;;  %1325 = vmatpush1.bf16.msra.mxu0 %v6332_v29  ;;  %v1478_v28 = vld [vmem:[#allocation6 + $0x180] sm:$0xff] }
 0x5ce   :  { %1283 = vmatprep.subr.bf16.mxu1 %v6337_v32  ;;  %1326 = vmatprep.subr.bf16.mxu0 %v6340_v33  ;;  %v1482_v29 = vld [vmem:[#allocation6 + $0x1a0] sm:$0xff]  ;;  %v6382_v32 = vld [vmem:[%s8431_s4 + $0x188] ss:$36 sps:$4 sm:$0xff]  }
 0x5cf   :  { %1313 = vmatprep.mubr.bf16.mxu1 %v6737_v46  ;;  %1356 = vmatprep.mubr.bf16.mxu0 %v6737_v46  ;;  %v5537_v33 = vcombine.high %v1478_v28, %v1482_v29 }
 0x5d1   :  { %1284 = vmatpush1.bf16.msra.mxu1 %v6335_v34  ;;  %1327 = vmatpush1.bf16.msra.mxu0 %v6338_v35  ;;  %v1486_v34 = vld [vmem:[#allocation6 + $0x1c0] sm:$0xff] }
 0x5d2   :  { %1285 = vmatprep.subr.bf16.mxu1 %v6343_v36  ;;  %1328 = vmatprep.subr.bf16.mxu0 %v6346_v37  ;;  %v1490_v35 = vld [vmem:[#allocation6 + $0x1e0] sm:$0xff]  ;;  %v5536_v36 = vcombine.low %v1478_v28, %v1482_v29  ;;  %v6383_v37 = vld [vmem:[%s8431_s4 + $0x1d0] ss:$36 sps:$4 sm:$0xff]  }
 0x5d3   :  { %v1480_v28 = vld [vmem:[#allocation6 + $0x190] sm:$0xff] }
 0x5d4   :  { %v1484_v29 = vld [vmem:[#allocation6 + $0x1b0] sm:$0xff] }
 0x5d5   :  { %1286 = vmatpush1.bf16.msra.mxu1 %v6341_v38  ;;  %1329 = vmatpush1.bf16.msra.mxu0 %v6344_v39  ;;  %v5545_v38 = vcombine.high %v1486_v34, %v1490_v35  ;;  %v1431_v39 = vld [vmem:[#allocation6 + $0x8] sm:$0xff] }
 0x5d6   :  { %1287 = vmatprep.subr.bf16.mxu1 %v6349_v40  ;;  %1330 = vmatprep.subr.bf16.mxu0 %v6352_v41  ;;  %v1435_v40 = vld [vmem:[#allocation6 + $0x28] sm:$0xff]  ;;  %v1432_v41 = vld [vmem:[#allocation6 + $0x10] sm:$0xff] }
 0x5d9   :  { %1288 = vmatpush1.bf16.msra.mxu1 %v6347_v42  ;;  %1331 = vmatpush1.bf16.msra.mxu0 %v6350_v43  ;;  %v1436_v42 = vld [vmem:[#allocation6 + $0x30] sm:$0xff]  ;;  %v5544_v43 = vcombine.low %v1486_v34, %v1490_v35  ;;  %v5541_v34 = vcombine.high %v1480_v28, %v1484_v29  ;;  %v1487_v35 = vld [vmem:[#allocation6 + $0x1c8] sm:$0xff] }
 0x5da   :  { %1289 = vmatprep.subr.bf16.mxu1 %v6355_v44  ;;  %1332 = vmatprep.subr.bf16.mxu0 %v6358_v45  ;;  %v6384_v44 = vld [vmem:[%s8431_s4 + $0x218] ss:$36 sps:$4 sm:$0xff]   ;;  %v5491_v45 = vcombine.high %v1431_v39, %v1435_v40 }
 0x5dd   :  { %1290 = vmatpush1.bf16.msra.mxu1 %v6353_v47  ;;  %1333 = vmatpush1.bf16.msra.mxu0 %v6356_v48  ;;  %v5493_v47 = vcombine.high %v1432_v41, %v1436_v42  ;;  %v1439_v48 = vld [vmem:[#allocation6 + $0x48] sm:$0xff] }
 0x5de   :  { %1291 = vmatprep.subr.bf16.mxu1 %v6361_v49  ;;  %1334 = vmatprep.subr.bf16.mxu0 %v6364_v50  ;;  %v1443_v49 = vld [vmem:[#allocation6 + $0x68] sm:$0xff]  ;;  %v1440_v50 = vld [vmem:[#allocation6 + $0x50] sm:$0xff] }
 0x5df   :  { %v5498_v60 = vcombine.low %v1439_v48, %v1443_v49 }
 0x5e1   :  { %1292 = vmatpush1.bf16.msra.mxu1 %v6359_v51  ;;  %1335 = vmatpush1.bf16.msra.mxu0 %v6362_v52  ;;  %v1444_v51 = vld [vmem:[#allocation6 + $0x70] sm:$0xff]  ;;  %v5490_v52 = vcombine.low %v1431_v39, %v1435_v40  ;;  %v5540_v40 = vcombine.low %v1480_v28, %v1484_v29  ;;  %v2075_v29 = vlaneseq }
 0x5e2   :  { %1293 = vmatprep.subr.bf16.mxu1 %v6367_v53  ;;  %1336 = vmatprep.subr.bf16.mxu0 %v6370_v54  ;;  %v5492_v53 = vcombine.low %v1432_v41, %v1436_v42  ;;  %v5499_v54 = vcombine.high %v1439_v48, %v1443_v49  ;;  %v1441_v49 = vld [vmem:[#allocation6 + $0x58] sm:$0xff] }
 0x5e5   :  { %1294 = vmatpush1.bf16.msra.mxu1 %v6365_v55  ;;  %1337 = vmatpush1.bf16.msra.mxu0 %v6368_v56  ;;  %v5501_v55 = vcombine.high %v1440_v50, %v1444_v51  ;;  %v1447_v56 = vld [vmem:[#allocation6 + $0x88] sm:$0xff] }
 0x5e6   :  { %1295 = vmatprep.subr.bf16.mxu1 %v6373_v57  ;;  %1338 = vmatprep.subr.bf16.mxu0 %v6376_v58  ;;  %v1451_v57 = vld [vmem:[#allocation6 + $0xa8] sm:$0xff]  ;;  %v1448_v58 = vld [vmem:[#allocation6 + $0x90] sm:$0xff] }
 0x5e9   :  { %1296 = vmatpush1.bf16.msra.mxu1 %v6371_v61  ;;  %1339 = vmatpush1.bf16.msra.mxu0 %v6374_v62  ;;  %v5500_v61 = vcombine.low %v1440_v50, %v1444_v51  ;;  %v5507_v62 = vcombine.high %v1447_v56, %v1451_v57  ;;  %v1445_v50 = vld [vmem:[#allocation6 + $0x78] sm:$0xff] }
 0x5ea   :  { %5880 = vmatprep.subr.bf16.mxu1 %v8435_v19  ;;  %1814 = vmatprep.subr.bf16.mxu0 %v5489_v63  ;;  %v5509_v63 = vcombine.high %v1448_v58, %v1452_v59 }
 0x5ec   :  { %1314 = vmatmul.mubr.bf16.vlgmr.msra.gmra.mrb[16].mxu1 %v6991_v30  ;;  %1357 = vmatmul.mubr.bf16.vlgmr.msra.gmra.mrb[20].mxu0 %v6991_v30 }
 0x5ed   :  { %5881 = vmatpush3.bf16.msra.mxu1 %v6377_v5  ;;  %1815 = vmatpush1.bf16.msra.mxu0 %v5488_v4  ;;  %v1456_v4 = vld [vmem:[#allocation6 + $0xd0] sm:$0xff] }
 0x5ee   :  { %5882 = vmatprep.subr.bf16.mxu1 %v8435_v19  ;;  %1816 = vmatprep.subr.bf16.mxu0 %v5497_v6  ;;  %v1460_v5 = vld [vmem:[#allocation6 + $0xf0] sm:$0xff]  ;;  %v5508_v6 = vcombine.low %v1448_v58, %v1452_v59  ;;  %v1461_v58 = vld [vmem:[#allocation6 + $0xf8] sm:$0xff] }
 0x5ef   :  { %5896 = vmatprep.mubr.msk.bf16.mxu1 %vm6738_vm1, %v8435_v19  ;;  %1846 = vmatprep.mubr.bf16.mxu0 %v6737_v46  ;;  %v5517_v8 = vcombine.high %v1456_v4, %v1460_v5 }
 0x5f1   :  { %5883 = vmatpush3.bf16.msra.mxu1 %v6378_v10  ;;  %1817 = vmatpush1.bf16.msra.mxu0 %v5496_v9  ;;  %v1463_v9 = vld [vmem:[#allocation6 + $0x108] sm:$0xff] }
 0x5f2   :  { %5884 = vmatprep.subr.bf16.mxu1 %v8435_v19  ;;  %1818 = vmatprep.subr.bf16.mxu0 %v5505_v11  ;;  %v1467_v10 = vld [vmem:[#allocation6 + $0x128] sm:$0xff]  ;;  %v1464_v11 = vld [vmem:[#allocation6 + $0x110] sm:$0xff] }
 0x5f3   :  { %v5524_v23 = vcombine.low %v1464_v11, %v1468_v12 }
 0x5f5   :  { %5885 = vmatpush3.bf16.msra.mxu1 %v6379_v15  ;;  %1819 = vmatpush1.bf16.msra.mxu0 %v5504_v14  ;;  %v5516_v14 = vcombine.low %v1456_v4, %v1460_v5  ;;  %v5523_v15 = vcombine.high %v1463_v9, %v1467_v10  ;;  %v1477_v4 = vld [vmem:[#allocation6 + $0x178] sm:$0xff] }
 0x5f6   :  { %5886 = vmatprep.subr.bf16.mxu1 %v8435_v19  ;;  %1820 = vmatprep.subr.bf16.mxu0 %v5513_v16  ;;  %v5525_v16 = vcombine.high %v1464_v11, %v1468_v12  ;;  %v1493_v11 = vld [vmem:[#allocation6 + $0x1f8] sm:$0xff] }
 0x5f9   :  { %5887 = vmatpush3.bf16.msra.mxu1 %v6380_v21  ;;  %1821 = vmatpush1.bf16.msra.mxu0 %v5512_v20  ;;  %v1472_v20 = vld [vmem:[#allocation6 + $0x150] sm:$0xff] }
 0x5fa   :  { %5888 = vmatprep.subr.bf16.mxu1 %v8435_v19  ;;  %1822 = vmatprep.subr.bf16.mxu0 %v5521_v22  ;;  %v1476_v21 = vld [vmem:[#allocation6 + $0x170] sm:$0xff]  ;;  %v5522_v22 = vcombine.low %v1463_v9, %v1467_v10  ;;  %v1489_v10 = vld [vmem:[#allocation6 + $0x1d8] sm:$0xff] }
 0x5fd   :  { %5889 = vmatpush3.bf16.msra.mxu1 %v6381_v26  ;;  %1823 = vmatpush1.bf16.msra.mxu0 %v5520_v25  ;;  %v5533_v25 = vcombine.high %v1472_v20, %v1476_v21  ;;  %v1479_v26 = vld [vmem:[#allocation6 + $0x188] sm:$0xff] }
 0x5fe   :  { %5890 = vmatprep.subr.bf16.mxu1 %v8435_v19  ;;  %1824 = vmatprep.subr.bf16.mxu0 %v5529_v27  ;;  %v1483_v27 = vld [vmem:[#allocation6 + $0x1a8] sm:$0xff] }
 0x5ff   :  { %v5538_v39 = vcombine.low %v1479_v26, %v1483_v27 }
 0x601   :  { %5891 = vmatpush3.bf16.msra.mxu1 %v6382_v32  ;;  %1825 = vmatpush1.bf16.msra.mxu0 %v5528_v31  ;;  %v5530_v31 = vcombine.low %v1471_v17, %v1475_v18  ;;  %v5532_v32 = vcombine.low %v1472_v20, %v1476_v21 }
 0x602   :  { %5892 = vmatprep.subr.bf16.mxu1 %v8435_v19  ;;  %1826 = vmatprep.subr.bf16.mxu0 %v5537_v33  ;;  %v5539_v33 = vcombine.high %v1479_v26, %v1483_v27  ;;  %v6739_v27 = vmov 1966171168  }
 0x603   :  { %v2073_v28 = vunpack.c.l.s4 %v6739_v27 }
 0x605   :  { %5893 = vmatpush3.bf16.msra.mxu1 %v6383_v37  ;;  %1827 = vmatpush1.bf16.msra.mxu0 %v5536_v36  ;;  %v1491_v36 = vld [vmem:[#allocation6 + $0x1e8] sm:$0xff]  ;;  %v1488_v37 = vld [vmem:[#allocation6 + $0x1d0] sm:$0xff] }
 0x606   :  { %5894 = vmatprep.subr.bf16.mxu1 %v8435_v19  ;;  %1828 = vmatprep.subr.bf16.mxu0 %v5545_v38  ;;  %v1492_v38 = vld [vmem:[#allocation6 + $0x1f0] sm:$0xff]  ;;  %v5547_v41 = vcombine.high %v1487_v35, %v1491_v36 }
 0x607   :  { %v5549_v42 = vcombine.high %v1488_v37, %v1492_v38 }
 0x609   :  { %5895 = vmatpush3.bf16.msra.mxu1 %v6384_v44  ;;  %1829 = vmatpush1.bf16.msra.mxu0 %v5544_v43  ;;  %v1433_v43 = vld [vmem:[#allocation6 + $0x18] sm:$0xff] }
 0x60a   :  { %1867 = vmatprep.subr.bf16.mxu1 %v5491_v45  ;;  %1920 = vmatprep.subr.bf16.mxu0 %v5493_v47  ;;  %v1437_v44 = vld [vmem:[#allocation6 + $0x38] sm:$0xff]  ;;  %v5546_v45 = vcombine.low %v1487_v35, %v1491_v36  ;;  %v5548_v47 = vcombine.low %v1488_v37, %v1492_v38 }
 0x60b   :  { %v5495_v48 = vcombine.high %v1433_v43, %v1437_v44  ;;  %v5494_v51 = vcombine.low %v1433_v43, %v1437_v44 }
 0x60c   :  { %5897 = vmatmul.mubr.bf16.vlgmr.msra.gmra.mrb[20].mxu1 %v6991_v30  ;;  %1847 = vmatmul.mubr.bf16.vlgmr.msra.gmra.mrb[24].mxu0 %v6861_v3  ;;  %v5506_v30 = vcombine.low %v1447_v56, %v1451_v57  ;;  %v1457_v57 = vld [vmem:[#allocation6 + $0xd8] sm:$0xff] }
 0x60d   :  { %1868 = vmatpush1.bf16.msra.mxu1 %v5490_v52  ;;  %1921 = vmatpush1.bf16.msra.mxu0 %v5492_v53  ;;  %v5503_v52 = vcombine.high %v1441_v49, %v1445_v50  ;;  %v1449_v53 = vld [vmem:[#allocation6 + $0x98] sm:$0xff] }
 0x60e   :  { %1869 = vmatprep.subr.bf16.mxu1 %v5499_v54  ;;  %1922 = vmatprep.subr.bf16.mxu0 %v5501_v55  ;;  %v1453_v54 = vld [vmem:[#allocation6 + $0xb8] sm:$0xff]  ;;  %v5502_v55 = vcombine.low %v1441_v49, %v1445_v50  ;;  %v2061_v50 = vld [vmem:[#allocation8 + $0x2] sm:$0x1] }
 0x60f   :  { %1856 = vmatprep.mubr.bf16.mxu0 %v6737_v46  ;;  %1899 = vmatprep.mubr.bf16.mxu1 %v6737_v46  ;;  %v5511_v56 = vcombine.high %v1449_v53, %v1453_v54  ;;  %v5510_v59 = vcombine.low %v1449_v53, %v1453_v54  ;;  %v2270_v54 = vld [vmem:[#allocation8 + $0x3] sm:$0x1] }
 0x611   :  { %1870 = vmatpush1.bf16.msra.mxu1 %v5498_v60  ;;  %1923 = vmatpush1.bf16.msra.mxu0 %v5500_v61  ;;  %v5519_v60 = vcombine.high %v1457_v57, %v1461_v58  ;;  %v1465_v61 = vld [vmem:[#allocation6 + $0x118] sm:$0xff] }
 0x612   :  { %1871 = vmatprep.subr.bf16.mxu1 %v5507_v62  ;;  %1924 = vmatprep.subr.bf16.mxu0 %v5509_v63  ;;  %v1469_v62 = vld [vmem:[#allocation6 + $0x138] sm:$0xff]  ;;  %v5518_v63 = vcombine.low %v1457_v57, %v1461_v58 }
 0x613   :  { %v5527_v0 = vcombine.high %v1465_v61, %v1469_v62  ;;  %v5526_v5 = vcombine.low %v1465_v61, %v1469_v62  ;;  %v2271_v61 = vpack.c.bf16 %v2270_v54, %v2270_v54 }
 0x614   :  { %1857 = vmatmul.mubr.bf16.gmra.mrb[28].mxu0 %v6859_v2 }
 0x615   :  { %1872 = vmatpush1.bf16.msra.mxu1 %v5506_v30  ;;  %1925 = vmatpush1.bf16.msra.mxu0 %v5508_v6  ;;  %v5535_v30 = vcombine.high %v1473_v1, %v1477_v4  ;;  %v1481_v6 = vld [vmem:[#allocation6 + $0x198] sm:$0xff] }
 0x616   :  { %1873 = vmatprep.subr.bf16.mxu1 %v5515_v7  ;;  %1926 = vmatprep.subr.bf16.mxu0 %v5517_v8  ;;  %v1485_v7 = vld [vmem:[#allocation6 + $0x1b8] sm:$0xff]  ;;  %v5534_v8 = vcombine.low %v1473_v1, %v1477_v4 }
 0x617   :  { %1952 = vmatprep.mubr.bf16.mxu0 %v6737_v46  ;;  %v5543_v9 = vcombine.high %v1481_v6, %v1485_v7  ;;  %v5542_v12 = vcombine.low %v1481_v6, %v1485_v7 }
 0x619   :  { %1874 = vmatpush1.bf16.msra.mxu1 %v5514_v13  ;;  %1927 = vmatpush1.bf16.msra.mxu0 %v5516_v14  ;;  %v5551_v13 = vcombine.high %v1489_v10, %v1493_v11  ;;  %v5550_v14 = vcombine.low %v1489_v10, %v1493_v11  ;;  %v2410_v10 = vpack.i.b16 %v2271_v61, %v2271_v61 }
 0x61a   :  { %1875 = vmatprep.subr.bf16.mxu1 %v5523_v15  ;;  %1928 = vmatprep.subr.bf16.mxu0 %v5525_v16  ;;  %v5487_v15 = vld [vmem:[#allocation8 + $0x1] ss:$0 sm:$0xff] }
 0x61d   :  { %1876 = vmatpush1.bf16.msra.mxu1 %v5522_v22  ;;  %1929 = vmatpush1.bf16.msra.mxu0 %v5524_v23 }
 0x61e   :  { %1877 = vmatprep.subr.bf16.mxu1 %v5531_v24  ;;  %1930 = vmatprep.subr.bf16.mxu0 %v5533_v25 }
 0x621   :  { %1878 = vmatpush1.bf16.msra.mxu1 %v5530_v31  ;;  %1931 = vmatpush1.bf16.msra.mxu0 %v5532_v32  ;;  %v2074_v31 = vunpack.c.0.s8 %v2073_v28  ;;  %v2076_v32 = vshrl.u32 %v2075_v29, 7 }
 0x622   :  { %1879 = vmatprep.subr.bf16.mxu1 %v5539_v33  ;;  %1932 = vmatprep.subr.bf16.mxu0 %v5541_v34 }
 0x623   :  { %v7157_v4 = vsub.s32 0, %v2076_v32 }
 0x625   :  { %1880 = vmatpush1.bf16.msra.mxu1 %v5538_v39  ;;  %1933 = vmatpush1.bf16.msra.mxu0 %v5540_v40  ;;  %v7146_v40 = vsub.s32 %v2074_v31, %v2076_v32 }
 0x626   :  { %1881 = vmatprep.subr.bf16.mxu1 %v5547_v41  ;;  %1934 = vmatprep.subr.bf16.mxu0 %v5549_v42 }
 0x629   :  { %1882 = vmatpush1.bf16.msra.mxu1 %v5546_v45  ;;  %1935 = vmatpush1.bf16.msra.mxu0 %v5548_v47 }
 0x62a   :  { %1973 = vmatprep.subr.bf16.mxu1 %v5495_v48  ;;  %5900 = vmatprep.subr.bf16.mxu0 %v8435_v19 }
 0x62c   :  { %1900 = vmatmul.mubr.bf16.vlgmr.msra.gmra.mrb[24].mxu1 %v6861_v3  ;;  %1953 = vmatmul.mubr.bf16.vlgmr.msra.gmra.mrb[32].mxu0 %v6861_v3 }
 0x62d   :  { %1974 = vmatpush1.bf16.msra.mxu1 %v5494_v51  ;;  %1909 = vmatprep.mubr.bf16.mxu1 %v6737_v46 }
 0x62e   :  { %1975 = vmatprep.subr.bf16.mxu1 %v5503_v52  ;;  %1962 = vmatprep.mubr.bf16.mxu0 %v6737_v46 }
 0x631   :  { %1976 = vmatpush1.bf16.msra.mxu1 %v5502_v55  ;;  %v2062_v55 = vpack.c.bf16 %v2061_v50, %v2061_v50 }
 0x632   :  { %1977 = vmatprep.subr.bf16.mxu1 %v5511_v56 }
 0x634   :  { %1910 = vmatmul.mubr.bf16.gmra.mrb[28].mxu1 %v6859_v2  ;;  %1963 = vmatmul.mubr.bf16.gmra.mrb[36].mxu0 %v6859_v2 }
 0x635   :  { %1978 = vmatpush1.bf16.msra.mxu1 %v5510_v59  ;;  %2005 = vmatprep.mubr.bf16.mxu1 %v6737_v46 }
 0x636   :  { %1979 = vmatprep.subr.bf16.mxu1 %v5519_v60  ;;  %5916 = vmatprep.mubr.msk.bf16.mxu0 %vm6738_vm1, %v8435_v19 }
 0x639   :  { %1980 = vmatpush1.bf16.msra.mxu1 %v5518_v63 }
 0x63a   :  { %1981 = vmatprep.subr.bf16.mxu1 %v5527_v0 }
 0x63d   :  { %1982 = vmatpush1.bf16.msra.mxu1 %v5526_v5  ;;  %v2201_v5 = vpack.i.b16 %v2062_v55, %v2062_v55 }
 0x63e   :  { %1983 = vmatprep.subr.bf16.mxu1 %v5535_v30 }
 0x641   :  { %1984 = vmatpush1.bf16.msra.mxu1 %v5534_v8 }
 0x642   :  { %1985 = vmatprep.subr.bf16.mxu1 %v5543_v9 }
 0x645   :  { %1986 = vmatpush1.bf16.msra.mxu1 %v5542_v12 }
 0x646   :  { %1987 = vmatprep.subr.bf16.mxu1 %v5551_v13 }
 0x649   :  { %1988 = vmatpush1.bf16.msra.mxu1 %v5550_v14 }
 0x64a   :  { %5920 = vmatprep.subr.bf16.mxu1 %v8435_v19 }
 0x64c   :  { %2006 = vmatmul.mubr.bf16.vlgmr.msra.gmra.mrb[32].mxu1 %v6861_v3 }
 0x64d   :  { %2015 = vmatprep.mubr.bf16.mxu1 %v6737_v46 }
 0x654   :  { %2016 = vmatmul.mubr.bf16.gmra.mrb[36].mxu1 %v6859_v2 }
 0x655   :  { %5936 = vmatprep.mubr.msk.bf16.mxu1 %vm6738_vm1, %v8435_v19 }
 0x69f   :  { %v1229_v16 = vpop.f32.mrb[12].mxu1  ;;  %v1272_v17 = vpop.f32.mrb[16].mxu0 }
 0x6a0   :  { %v1412_v18 = vadd.f32 %v5487_v15, %v1229_v16  ;;  %v1231_v20 = vpop.f32.mrb[13].mxu1  ;;  %v1274_v21 = vpop.f32.mrb[17].mxu0  ;;  %v7167_v16 = vrot.slane %v2201_v5, %v7157_v4 }
 0x6a1   :  { %v1233_v22 = vpop.f32.mrb[14].mxu1  ;;  %v1276_v23 = vpop.f32.mrb[18].mxu0 }
 0x6a2   :  { %5365 = vst [vmem:[%s8434_s7] sm:$0xff] %v1412_v18  ;;  %v1413_v3 = vadd.f32 %v5487_v15, %v1233_v22  ;;  %v1415_v24 = vpack.c.bf16 %v1276_v23, %v1272_v17  ;;  %v1235_v46 = vpop.f32.mrb[15].mxu1  ;;  %v1278_v25 = vpop.f32.mrb[19].mxu0 }
 0x6a3   :  { %v1414_v2 = vpack.c.bf16 %v1235_v46, %v1231_v20  ;;  %v1416_v26 = vpack.c.bf16 %v1278_v25, %v1274_v21 }
 0x6a4   :  { %5366 = vst [vmem:[%s8434_s7 + $0x8] sm:$0xff] %v1413_v3  ;;  %1423 = vst [vmem:[#allocation2 + $0x8] sm:$0xff] %v1415_v24  ;;  %v7176_v24 = vrot.slane %v2410_v10, %v7157_v4 }
 0x6a5   :  { %1422 = vst [vmem:[#allocation2] sm:$0xff] %v1414_v2  ;;  %1424 = vst [vmem:[#allocation2 + $0x10] sm:$0xff] %v1416_v26 }
 0x6ab   :  { %v5557_v51 = vld.sshfl [vmem:[#allocation2 + $0x8] sm:$0x33 pattern:$0x75316420]  ;;  %v6385_v59 = vld [vmem:[#allocation2 + $0xc] ss:$0 sps:$4 sm:$0xff]  }
 0x6ac   :  { %v5552_v37 = vld.sshfl [vmem:[#allocation2] sm:$0x33 pattern:$0x75316420]  ;;  %v6386_v52 = vld [vmem:[#allocation2 + $0x4] ss:$0 sps:$4 sm:$0xff]   ;;  %v2280_v56 = vcombine.high %v5557_v51, %v5557_v51  ;;  %v2287_v57 = vrot.slane %v5557_v51, %v7146_v40  ;;  %v3933_v8 = vrot.slane %v6385_v59, %v7146_v40 }
 0x6ad   :  { %v2071_v48 = vcombine.high %v5552_v37, %v5552_v37  ;;  %v2078_v49 = vrot.slane %v5552_v37, %v7146_v40  ;;  %v3735_v60 = vrot.slane %v6386_v52, %v7146_v40 }
 0x6ae   :  { %v7160_v30 = vrot.slane %v2280_v56, %v7146_v40  ;;  %v2298_v7 = vunpack.i.h.s16 %v2287_v57  ;;  %v5558_v18 = vpack.i.b16 %v2287_v57, %v2287_v57  ;;  %v7172_v22 = vcombine.high %v2287_v57, %v2287_v57 }
 0x6af   :  { %v7150_v53 = vrot.slane %v2071_v48, %v7146_v40  ;;  %v2089_v58 = vunpack.i.h.s16 %v2078_v49  ;;  %v2086_v62 = vcombine.high %v2078_v49, %v2078_v49  ;;  %v5553_v0 = vpack.i.b16 %v2078_v49, %v2078_v49 }
 0x6b0   :  { %v3736_v9 = vcombine.high %v3735_v60, %v3735_v60  ;;  %v3743_v11 = vrot.slane %v3735_v60, %v7146_v40  ;;  %v2306_v20 = vpack.i.b16 %v2298_v7, %v2298_v7  ;;  %v5559_v21 = vpack.i.b16 %v7160_v30, %v7160_v30 }
 0x6b1   :  { %v2091_v63 = vunpack.i.h.s16 %v7150_v53  ;;  %v5554_v1 = vpack.i.b16 %v7150_v53, %v7150_v53  ;;  %v2097_v6 = vpack.i.b16 %v2089_v58, %v2089_v58  ;;  %v5555_v13 = vpack.i.b16 %v2086_v62, %v2086_v62 }
 0x6b2   :  { %v2107_v14 = vrot.slane %v5553_v0, %v7157_v4  ;;  %v3934_v23 = vcombine.high %v3933_v8, %v3933_v8  ;;  %v3750_v3 = vrot.slane %v3736_v9, %v7146_v40  ;;  %v2093_v46 = vunpack.i.h.s16 %v2086_v62 }
 0x6b3   :  { %v2099_v12 = vpack.i.b16 %v2091_v63, %v2091_v63  ;;  %v2115_v15 = vrot.slane %v5554_v1, %v7157_v4  ;;  %v2111_v17 = vrot.slane %v2097_v6, %v7157_v4  ;;  %v7180_v2 = vrot.slane %v5555_v13, %v7157_v4 }
 0x6b4   :  { %v3751_v26 = vcombine.high %v3743_v11, %v3743_v11  ;;  %v7183_v27 = vrot.slane %v3933_v8, %v7146_v40  ;;  %v2137_v28 = vpack.i.b16 %v2107_v14, %v2107_v14  ;;  %v2300_v31 = vunpack.i.h.s16 %v7160_v30 }
 0x6b5   :  { %v2119_v25 = vrot.slane %v2099_v12, %v7157_v4  ;;  %v2151_v29 = vpack.i.b16 %v2115_v15, %v2115_v15  ;;  %v2144_v32 = vpack.i.b16 %v2111_v17, %v2111_v17  ;;  %v3752_v37 = vcombine.high %v3750_v3, %v3750_v3 }
 0x6b6   :  { %v2308_v48 = vpack.i.b16 %v2300_v31, %v2300_v31  ;;  %v5592_v49 = vpack.i.b16 %v3743_v11, %v3743_v11  ;;  %v5593_v57 = vpack.i.b16 %v3750_v3, %v3750_v3  ;;  %v5594_v60 = vpack.i.b16 %v3751_v26, %v3751_v26 }
 0x6b7   :  { %v7201_v50 = vrot.slane %v2144_v32, %v7157_v4  ;;  %v3760_v55 = vunpack.i.h.s16 %v3752_v37  ;;  %v5595_v62 = vpack.i.b16 %v3752_v37, %v3752_v37  ;;  %v3949_v1 = vcombine.high %v7183_v27, %v7183_v27 }
 0x6b8   :  { %v7207_v63 = vrot.slane %v2308_v48, %v7157_v4  ;;  %v3772_v0 = vrot.slane %v5592_v49, %v7157_v4  ;;  %v3952_v9 = vunpack.i.h.s16 %v7183_v27  ;;  %v3780_v14 = vrot.slane %v5593_v57, %v7157_v4 }
 0x6b9   :  { %v3768_v12 = vpack.i.b16 %v3760_v55, %v3760_v55  ;;  %v5596_v31 = vpack.i.b16 %v7183_v27, %v7183_v27 }
 0x6ba   :  { %v3960_v37 = vpack.i.b16 %v3952_v9, %v3952_v9  ;;  %v3816_v48 = vpack.i.b16 %v3780_v14, %v3780_v14 }
 0x6bb   :  { %v3970_v57 = vrot.slane %v5596_v31, %v7157_v4 }
 0x6bf   :  { %v1315_v33 = vpop.f32.mrb[16].mxu1  ;;  %v1358_v34 = vpop.f32.mrb[20].mxu0 }
 0x6c0   :  { %v1317_v35 = vpop.f32.mrb[17].mxu1  ;;  %v1360_v36 = vpop.f32.mrb[21].mxu0 }
 0x6c1   :  { %v1319_v38 = vpop.f32.mrb[18].mxu1  ;;  %v1362_v39 = vpop.f32.mrb[22].mxu0 }
 0x6c2   :  { %v1417_v41 = vpack.c.bf16 %v1319_v38, %v1315_v33  ;;  %v1419_v42 = vpack.c.bf16 %v1362_v39, %v1358_v34  ;;  %v1321_v43 = vpop.f32.mrb[19].mxu1  ;;  %v1364_v44 = vpop.f32.mrb[23].mxu0  ;;  %v2316_v33 = vrot.slane %v5558_v18, %v7157_v4  ;;  %v2320_v34 = vrot.slane %v2306_v20, %v7157_v4 }
 0x6c3   :  { %v1418_v45 = vpack.c.bf16 %v1321_v43, %v1317_v35  ;;  %v1420_v47 = vpack.c.bf16 %v1364_v44, %v1360_v36  ;;  %v2324_v35 = vrot.slane %v5559_v21, %v7157_v4  ;;  %v7190_v36 = vrot.slane %v3934_v23, %v7146_v40 }
 0x6c4   :  { %1425 = vst [vmem:[#allocation2 + $0x18] sm:$0xff] %v1417_v41  ;;  %1427 = vst [vmem:[#allocation2 + $0x28] sm:$0xff] %v1419_v42  ;;  %v3754_v38 = vunpack.i.h.s16 %v3743_v11  ;;  %v3756_v39 = vunpack.i.h.s16 %v3750_v3  ;;  %v7192_v41 = vpack.i.b16 %v2093_v46, %v2093_v46  ;;  %v2158_v42 = vpack.i.b16 %v2119_v25, %v2119_v25 }
 0x6c5   :  { %1426 = vst [vmem:[#allocation2 + $0x20] sm:$0xff] %v1418_v45  ;;  %1428 = vst [vmem:[#allocation2 + $0x30] sm:$0xff] %v1420_v47  ;;  %v2165_v43 = vpack.i.b16 %v7180_v2, %v7180_v2  ;;  %v3758_v44 = vunpack.i.h.s16 %v3751_v26  ;;  %v2142_v45 = vrot.slane %v2137_v28, %v7157_v4  ;;  %v7198_v47 = vrot.slane %v2151_v29, %v7157_v4 }
 0x6c6   :  { %v2346_v51 = vpack.i.b16 %v2316_v33, %v2316_v33  ;;  %v2353_v52 = vpack.i.b16 %v2320_v34, %v2320_v34  ;;  %v2360_v54 = vpack.i.b16 %v2324_v35, %v2324_v35  ;;  %v3762_v56 = vpack.i.b16 %v3754_v38, %v3754_v38 }
 0x6c7   :  { %v3764_v58 = vpack.i.b16 %v3756_v39, %v3756_v39  ;;  %v7204_v59 = vrot.slane %v2158_v42, %v7157_v4  ;;  %v3766_v61 = vpack.i.b16 %v3758_v44, %v3758_v44  ;;  %v3950_v5 = vcombine.high %v7190_v36, %v7190_v36 }
 0x6c8   :  { %v7215_v6 = vrot.slane %v2346_v51, %v7157_v4  ;;  %v7218_v7 = vrot.slane %v2353_v52, %v7157_v4  ;;  %v7221_v8 = vrot.slane %v2360_v54, %v7157_v4  ;;  %v3776_v13 = vrot.slane %v3762_v56, %v7157_v4 }
 0x6c9   :  { %v3784_v15 = vrot.slane %v3764_v58, %v7157_v4  ;;  %v3788_v20 = vrot.slane %v5594_v60, %v7157_v4  ;;  %v3792_v21 = vrot.slane %v3766_v61, %v7157_v4  ;;  %v3796_v23 = vrot.slane %v5595_v62, %v7157_v4 }
 0x6ca   :  { %v3954_v3 = vunpack.i.h.s16 %v7190_v36  ;;  %v3802_v26 = vpack.i.b16 %v3772_v0, %v3772_v0  ;;  %v3956_v28 = vunpack.i.h.s16 %v3949_v1  ;;  %v3958_v29 = vunpack.i.h.s16 %v3950_v5 }
 0x6cb   :  { %v5597_v38 = vpack.i.b16 %v7190_v36, %v7190_v36  ;;  %v3800_v42 = vrot.slane %v3768_v12, %v7157_v4  ;;  %v3809_v44 = vpack.i.b16 %v3776_v13, %v3776_v13  ;;  %v3823_v51 = vpack.i.b16 %v3784_v15, %v3784_v15 }
 0x6cc   :  { %v3962_v27 = vpack.i.b16 %v3954_v3, %v3954_v3  ;;  %v5598_v52 = vpack.i.b16 %v3949_v1, %v3949_v1  ;;  %v7242_v54 = vrot.slane %v3802_v26, %v7157_v4  ;;  %v3964_v55 = vpack.i.b16 %v3956_v28, %v3956_v28 }
 0x6cd   :  { %v5599_v56 = vpack.i.b16 %v3950_v5, %v3950_v5  ;;  %v3966_v58 = vpack.i.b16 %v3958_v29, %v3958_v29  ;;  %v3974_v60 = vrot.slane %v3960_v37, %v7157_v4  ;;  %v3978_v61 = vrot.slane %v5597_v38, %v7157_v4 }
 0x6ce   :  { %v3814_v0 = vrot.slane %v3809_v44, %v7157_v4  ;;  %v3830_v1 = vpack.i.b16 %v3788_v20, %v3788_v20  ;;  %v3837_v9 = vpack.i.b16 %v3792_v21, %v3792_v21  ;;  %v3986_v12 = vrot.slane %v5598_v52, %v7157_v4 }
 0x6cf   :  { %v3844_v14 = vpack.i.b16 %v3796_v23, %v3796_v23  ;;  %v3851_v15 = vpack.i.b16 %v3800_v42, %v3800_v42  ;;  %v3990_v3 = vrot.slane %v3964_v55, %v7157_v4  ;;  %v3998_v20 = vrot.slane %v3966_v58, %v7157_v4 }
 0x6d0   :  { %v4007_v21 = vpack.i.b16 %v3974_v60, %v3974_v60  ;;  %v3828_v26 = vrot.slane %v3823_v51, %v7157_v4  ;;  %v3835_v28 = vrot.slane %v3830_v1, %v7157_v4  ;;  %v3842_v29 = vrot.slane %v3837_v9, %v7157_v4 }
 0x6d2   :  { %v4012_v42 = vrot.slane %v4007_v21, %v7157_v4 }
 0x6df   :  { %v1401_v10 = vpop.f32.mrb[20].mxu1  ;;  %v1848_v11 = vpop.f32.mrb[24].mxu0 }
 0x6e0   :  { %v5898_v17 = vpop.f32.mrb[21].mxu1  ;;  %v1850_v18 = vpop.f32.mrb[25].mxu0 }
 0x6e1   :  { %v1404_v46 = vpop.f32.mrb[22].mxu1  ;;  %v1852_v25 = vpop.f32.mrb[26].mxu0  ;;  %v3994_v17 = vrot.slane %v5599_v56, %v7157_v4 }
 0x6e2   :  { %v1421_v32 = vpack.c.bf16 %v1404_v46, %v1401_v10  ;;  %v7233_v33 = vpack.c.bf16 %v1852_v25, %v1848_v11  ;;  %v5899_v34 = vpop.f32.mrb[23].mxu1  ;;  %v1854_v35 = vpop.f32.mrb[27].mxu0  ;;  %v3982_v11 = vrot.slane %v3962_v27, %v7157_v4  ;;  %v4014_v46 = vpack.i.b16 %v3978_v61, %v3978_v61 }
 0x6e3   :  { %v7237_v39 = vpack.c.bf16 %v1854_v35, %v1850_v18  ;;  %v3821_v25 = vrot.slane %v3816_v48, %v7157_v4  ;;  %v3849_v34 = vrot.slane %v3844_v14, %v7157_v4  ;;  %v3856_v35 = vrot.slane %v3851_v15, %v7157_v4 }
 0x6e4   :  { %1429 = vst [vmem:[#allocation2 + $0x38] sm:$0xff] %v1421_v32  ;;  %v2192_v49 = vadd.bf16 %v2142_v45, %v7233_v33  ;;  %v2193_v45 = vadd.bf16 %v7201_v50, %v7233_v33  ;;  %v4000_v50 = vpack.i.b16 %v3970_v57, %v3970_v57  ;;  %v4021_v31 = vpack.i.b16 %v3982_v11, %v3982_v11 }
 0x6e5   :  { %v2401_v5 = vadd.bf16 %v7215_v6, %v7237_v39  ;;  %v4028_v32 = vpack.i.b16 %v3986_v12, %v3986_v12  ;;  %v4042_v38 = vpack.i.b16 %v3994_v17, %v3994_v17  ;;  %v4019_v44 = vrot.slane %v4014_v46, %v7157_v4 }
 0x6e6   :  { %v2207_v36 = vadd.bf16 %v7167_v16, %v2192_v49  ;;  %v2208_v6 = vadd.bf16 %v7167_v16, %v2193_v45  ;;  %v4005_v37 = vrot.slane %v4000_v50, %v7157_v4  ;;  %v4035_v48 = vpack.i.b16 %v3990_v3, %v3990_v3 }
 0x6e7   :  { %v1858_v62 = vpop.f32.mrb[28].mxu0  ;;  %v2416_v23 = vadd.bf16 %v7176_v24, %v2401_v5  ;;  %v4049_v49 = vpack.i.b16 %v3998_v20, %v3998_v20  ;;  %v2194_v51 = vadd.bf16 %v7198_v47, %v7233_v33  ;;  %v2402_v55 = vadd.bf16 %v7218_v7, %v7237_v39 }
 0x6e8   :  { %6401 = vtanh.bf16 %v2207_v36  ;;  %v1860_v10 = vpop.f32.mrb[29].mxu0  ;;  %v4026_v56 = vrot.slane %v4021_v31, %v7157_v4  ;;  %v4033_v57 = vrot.slane %v4028_v32, %v7157_v4  ;;  %v4047_v61 = vrot.slane %v4042_v38, %v7157_v4 }
 0x6e9   :  { %v1862_v13 = vpop.f32.mrb[30].mxu0  ;;  %6403 = vtanh.bf16 %v2208_v6  ;;  %v4040_v47 = vrot.slane %v4035_v48, %v7157_v4  ;;  %v2209_v7 = vadd.bf16 %v7167_v16, %v2194_v51  ;;  %v2417_v12 = vadd.bf16 %v7176_v24, %v2402_v55 }
 0x6ea   :  { %v1864_v18 = vpop.f32.mrb[31].mxu0  ;;  %v2034_v27 = vpack.c.bf16 %v1862_v13, %v1858_v62  ;;  %6405 = vtanh.bf16 %v2416_v23  ;;  %v4054_v62 = vrot.slane %v4049_v49, %v7157_v4  ;;  %v2195_v14 = vadd.bf16 %v7204_v59, %v7233_v33 }
 0x6eb   :  { %v2035_v52 = vpack.c.bf16 %v1864_v18, %v1860_v10  ;;  %v2403_v18 = vadd.bf16 %v7221_v8, %v7237_v39  ;;  %6407 = vtanh.bf16 %v2209_v7  ;;  %v5560_v23 = vpack.i.b16 %v7172_v22, %v7172_v22 }
 0x6ec   :  { %v3857_v36 = vadd.bf16 %v7242_v54, %v2034_v27  ;;  %v3858_v58 = vadd.bf16 %v3814_v0, %v2034_v27  ;;  %v3859_v60 = vadd.bf16 %v3821_v25, %v2034_v27  ;;  %v3860_v45 = vadd.bf16 %v3828_v26, %v2034_v27 }
 0x6ed   :  { %v3861_v1 = vadd.bf16 %v3835_v28, %v2034_v27  ;;  %v3862_v5 = vadd.bf16 %v3842_v29, %v2034_v27  ;;  %v3863_v10 = vadd.bf16 %v3849_v34, %v2034_v27  ;;  %v3864_v11 = vadd.bf16 %v3856_v35, %v2034_v27 }
 0x6ee   :  { %v7282_v54 = vadd.bf16 %v3857_v36, %v7167_v16  ;;  %v7285_v0 = vadd.bf16 %v3858_v58, %v7167_v16  ;;  %v7288_v13 = vadd.bf16 %v3859_v60, %v7167_v16  ;;  %v7293_v15 = vadd.bf16 %v3860_v45, %v7167_v16 }
 0x6ef   :  { %v7296_v17 = vadd.bf16 %v3861_v1, %v7167_v16  ;;  %v7299_v50 = vadd.bf16 %v3862_v5, %v7167_v16  ;;  %v7305_v3 = vadd.bf16 %v3863_v10, %v7167_v16  ;;  %v7308_v20 = vadd.bf16 %v3864_v11, %v7167_v16 }
 0x6f0   :  { %v4055_v59 = vadd.bf16 %v4005_v37, %v2035_v52  ;;  %v4056_v21 = vadd.bf16 %v4012_v42, %v2035_v52  ;;  %v4057_v46 = vadd.bf16 %v4019_v44, %v2035_v52  ;;  %v4058_v6 = vadd.bf16 %v4026_v56, %v2035_v52 }
 0x6f1   :  { %8440 = vst [vmem:[#allocation11_spill] sm:$0xff] %v7308_v20  ;;  %6409 = vtanh.bf16 %v2417_v12  ;;  %v4059_v25 = vadd.bf16 %v4033_v57, %v2035_v52  ;;  %v4060_v26 = vadd.bf16 %v4040_v47, %v2035_v52  ;;  %v4061_v28 = vadd.bf16 %v4047_v61, %v2035_v52 }
 0x6f2   :  { %v4062_v29 = vadd.bf16 %v4054_v62, %v2035_v52  ;;  %v7313_v8 = vadd.bf16 %v4055_v59, %v7176_v24  ;;  %v7316_v31 = vadd.bf16 %v4056_v21, %v7176_v24  ;;  %v2367_v34 = vpack.i.b16 %v7207_v63, %v7207_v63 }
 0x6f3   :  { %v6402_v9 = vpop.eup %6401  ;;  %v7321_v35 = vadd.bf16 %v4057_v46, %v7176_v24  ;;  %v7324_v37 = vadd.bf16 %v4058_v6, %v7176_v24  ;;  %v7327_v38 = vadd.bf16 %v4059_v25, %v7176_v24  ;;  %v2210_v44 = vadd.bf16 %v7167_v16, %v2195_v14 }
 0x6f4   :  { %5901 = vmatpush3.bf16.xpose.msra.mxu0 %v6402_v9  ;;  %v6404_v32 = vpop.eup %6403  ;;  %v7331_v48 = vadd.bf16 %v4060_v26, %v7176_v24  ;;  %v7334_v49 = vadd.bf16 %v4061_v28, %v7176_v24  ;;  %v7337_v63 = vadd.bf16 %v4062_v29, %v7176_v24  ;;  %v2418_v51 = vadd.bf16 %v7176_v24, %v2403_v18 }
 0x6f5   :  { %5902 = vmatprep.subr.bf16.mxu0 %v8435_v19  ;;  %v6406_v42 = vpop.eup %6405  ;;  %v2302_v27 = vunpack.i.h.s16 %v7172_v22  ;;  %v2332_v52 = vrot.slane %v5560_v23, %v7157_v4  ;;  %v2372_v55 = vrot.slane %v2367_v34, %v7157_v4  ;;  %v2087_v56 = vcombine.high %v7150_v53, %v7150_v53 }
 0x6f6   :  { %8441 = vst [vmem:[#allocation12_spill] sm:$0xff] %v7337_v63  ;;  %5921 = vmatpush3.bf16.xpose.msra.mxu1 %v6406_v42  ;;  %v2127_v57 = vrot.slane %v7192_v41, %v7157_v4  ;;  %v2170_v36 = vrot.slane %v2165_v43, %v7157_v4  ;;  %6411 = vtanh.bf16 %v2210_v44  ;;  %v6408_v41 = vpop.eup %6407  ;;  %v2296_v18 = vcombine.high %v7160_v30, %v7160_v30 }
 0x6f7   :  { %5922 = vmatprep.subr.bf16.mxu1 %v8435_v19  ;;  %v2404_v22 = vadd.bf16 %v2372_v55, %v7237_v39  ;;  %6413 = vtanh.bf16 %v2418_v51  ;;  %v2310_v62 = vpack.i.b16 %v2302_v27, %v2302_v27  ;;  %v2374_v9 = vpack.i.b16 %v2332_v52, %v2332_v52 }
 0x6f8   :  { %v2196_v53 = vadd.bf16 %v2170_v36, %v7233_v33  ;;  %v5556_v10 = vpack.i.b16 %v2087_v56, %v2087_v56  ;;  %v2172_v11 = vpack.i.b16 %v2127_v57, %v2127_v57  ;;  %v2095_v46 = vunpack.i.h.s16 %v2087_v56 }
 0x6f9   :  { %v2419_v12 = vadd.bf16 %v7176_v24, %v2404_v22  ;;  %v2336_v59 = vrot.slane %v2310_v62, %v7157_v4  ;;  %v2379_v21 = vrot.slane %v2374_v9, %v7157_v4  ;;  %v5561_v51 = vpack.i.b16 %v2296_v18, %v2296_v18 }
 0x6fa   :  { %v2211_v14 = vadd.bf16 %v7167_v16, %v2196_v53  ;;  %v2131_v6 = vrot.slane %v5556_v10, %v7157_v4  ;;  %v2177_v25 = vrot.slane %v2172_v11, %v7157_v4  ;;  %v2103_v36 = vpack.i.b16 %v2095_v46, %v2095_v46 }
 0x6fb   :  { %v2405_v23 = vadd.bf16 %v2379_v21, %v7237_v39  ;;  %6415 = vtanh.bf16 %v2419_v12  ;;  %v2381_v27 = vpack.i.b16 %v2336_v59, %v2336_v59 }
 0x6fc   :  { %5903 = vmatpush3.bf16.xpose.msra.mxu0 %v6404_v32  ;;  %v6410_v5 = vpop.eup %6409  ;;  %v2197_v30 = vadd.bf16 %v2177_v25, %v7233_v33  ;;  %6417 = vtanh.bf16 %v2211_v14 }
 0x6fd   :  { %5904 = vmatprep.subr.bf16.mxu0 %v8435_v19  ;;  %v2420_v22 = vadd.bf16 %v7176_v24, %v2405_v23 }
 0x6fe   :  { %5923 = vmatpush3.bf16.xpose.msra.mxu1 %v6410_v5  ;;  %v2212_v53 = vadd.bf16 %v7167_v16, %v2197_v30 }
 0x6ff   :  { %v1901_v58 = vpop.f32.mrb[24].mxu1  ;;  %v1954_v60 = vpop.f32.mrb[32].mxu0  ;;  %5924 = vmatprep.subr.bf16.mxu1 %v8435_v19  ;;  %6419 = vtanh.bf16 %v2420_v22 }
 0x700   :  { %v7354_v61 = vpop.f32.mrb[25].mxu1  ;;  %v7356_v45 = vpop.f32.mrb[33].mxu0  ;;  %6421 = vtanh.bf16 %v2212_v53 }
 0x701   :  { %v1905_v1 = vpop.f32.mrb[26].mxu1  ;;  %v1958_v47 = vpop.f32.mrb[34].mxu0 }
 0x702   :  { %v7359_v7 = vpack.c.bf16 %v1905_v1, %v1901_v58  ;;  %v7361_v2 = vpop.f32.mrb[27].mxu1  ;;  %v7363_v43 = vpop.f32.mrb[35].mxu0  ;;  %v7389_v52 = vpack.c.bf16 %v1958_v47, %v1954_v60  ;;  %v2179_v58 = vpack.i.b16 %v2131_v6, %v2131_v6  ;;  %v2304_v1 = vunpack.i.h.s16 %v2296_v18 }
 0x703   :  { %v6412_v44 = vpop.eup %6411  ;;  %v2340_v60 = vrot.slane %v5561_v51, %v7157_v4  ;;  %v2386_v47 = vrot.slane %v2381_v27, %v7157_v4  ;;  %v7416_v51 = vpack.c.bf16 %v7361_v2, %v7354_v61 }
 0x704   :  { %5905 = vmatpush3.bf16.xpose.msra.mxu0 %v6408_v41  ;;  %v6414_v57 = vpop.eup %6413  ;;  %v2135_v41 = vrot.slane %v2103_v36, %v7157_v4  ;;  %v2184_v62 = vrot.slane %v2179_v58, %v7157_v4  ;;  %v2312_v10 = vpack.i.b16 %v2304_v1, %v2304_v1 }
 0x705   :  { %5906 = vmatprep.subr.bf16.mxu0 %v8435_v19  ;;  %v2406_v9 = vadd.bf16 %v2386_v47, %v7237_v39  ;;  %v2388_v11 = vpack.i.b16 %v2340_v60, %v2340_v60 }
 0x706   :  { %5925 = vmatpush3.bf16.xpose.msra.mxu1 %v6414_v57  ;;  %v2198_v5 = vadd.bf16 %v2184_v62, %v7233_v33  ;;  %v6416_v12 = vpop.eup %6415  ;;  %v2186_v14 = vpack.i.b16 %v2135_v41, %v2135_v41  ;;  %v2344_v46 = vrot.slane %v2312_v10, %v7157_v4  ;;  %v7441_v62 = vpack.c.bf16 %v7363_v43, %v7356_v45 }
 0x707   :  { %v7375_v26 = vpop.f32.mrb[28].mxu1  ;;  %v7377_v28 = vpop.f32.mrb[36].mxu0  ;;  %5926 = vmatprep.subr.bf16.mxu1 %v8435_v19  ;;  %v2421_v18 = vadd.bf16 %v7176_v24, %v2406_v9  ;;  %v2393_v6 = vrot.slane %v2388_v11, %v7157_v4 }
 0x708   :  { %v7380_v29 = vpop.f32.mrb[29].mxu1  ;;  %v7382_v32 = vpop.f32.mrb[37].mxu0  ;;  %v2213_v21 = vadd.bf16 %v7167_v16, %v2198_v5  ;;  %v2191_v25 = vrot.slane %v2186_v14, %v7157_v4 }
 0x709   :  { %v7385_v34 = vpop.f32.mrb[30].mxu1  ;;  %v7387_v42 = vpop.f32.mrb[38].mxu0  ;;  %v2407_v23 = vadd.bf16 %v2393_v6, %v7237_v39  ;;  %6423 = vtanh.bf16 %v2421_v18 }
 0x70a   :  { %v7391_v55 = vpop.f32.mrb[31].mxu1  ;;  %v7393_v56 = vpop.f32.mrb[39].mxu0  ;;  %v2199_v30 = vadd.bf16 %v2191_v25, %v7233_v33  ;;  %6425 = vtanh.bf16 %v2213_v21  ;;  %v7452_v45 = vpack.c.bf16 %v7385_v34, %v7375_v26  ;;  %v7456_v43 = vpack.c.bf16 %v7387_v42, %v7377_v28  ;;  %v3102_v21 = vld [vmem:[#allocation8 + $0x7] sm:$0x1] }
 0x70b   :  { %v6418_v59 = vpop.eup %6417  ;;  %v2422_v36 = vadd.bf16 %v7176_v24, %v2407_v23  ;;  %v7460_v14 = vpack.c.bf16 %v7391_v55, %v7380_v29  ;;  %v3103_v25 = vpack.c.bf16 %v3102_v21, %v3102_v21  ;;  %v2039_v26 = vpack.c.bf16 %v7393_v56, %v7382_v32 }
 0x70c   :  { %5907 = vmatpush3.bf16.xpose.msra.mxu0 %v6412_v44  ;;  %v2395_v44 = vpack.i.b16 %v2344_v46, %v2344_v46  ;;  %v6420_v27 = vpop.eup %6419  ;;  %v2214_v58 = vadd.bf16 %v7167_v16, %v2199_v30  ;;  %8442 = vst [vmem:[#allocation13_spill] sm:$0xff] %v7452_v45  ;;  %8443 = vst [vmem:[#allocation14_spill] sm:$0xff] %v7456_v43 }
 0x70d   :  { %5908 = vmatprep.subr.bf16.mxu0 %v8435_v19  ;;  %v6422_v57 = vpop.eup %6421  ;;  %6427 = vtanh.bf16 %v2422_v36  ;;  %8444 = vst [vmem:[#allocation15_spill] sm:$0xff] %v7460_v14 }
 0x70e   :  { %5927 = vmatpush3.bf16.xpose.msra.mxu1 %v6416_v12  ;;  %v2400_v22 = vrot.slane %v2395_v44, %v7157_v4  ;;  %6429 = vtanh.bf16 %v2214_v58  ;;  %v6389_v12 = vld [vmem:[#allocation2 + $0x2c] ss:$0 sps:$4 sm:$0xff]   ;;  %v3242_v44 = vpack.i.b16 %v3103_v25, %v3103_v25 }
 0x70f   :  { %5928 = vmatprep.subr.bf16.mxu1 %v8435_v19 }
 0x710   :  { %v2408_v53 = vadd.bf16 %v2400_v22, %v7237_v39  ;;  %v7471_v56 = vrot.slane %v3242_v44, %v7157_v4 }
 0x712   :  { %v2423_v47 = vadd.bf16 %v7176_v24, %v2408_v53 }
 0x714   :  { %5909 = vmatpush3.bf16.xpose.msra.mxu0 %v6418_v59  ;;  %v6424_v16 = vpop.eup %6423  ;;  %6431 = vtanh.bf16 %v2423_v47  ;;  %v4721_v59 = vrot.slane %v6389_v12, %v7146_v40 }
 0x715   :  { %5910 = vmatprep.subr.bf16.mxu0 %v8435_v19  ;;  %v6426_v60 = vpop.eup %6425 }
 0x716   :  { %5929 = vmatpush3.bf16.xpose.msra.mxu1 %v6420_v27  ;;  %v4722_v18 = vcombine.high %v4721_v59, %v4721_v59  ;;  %v4729_v46 = vrot.slane %v4721_v59, %v7146_v40 }
 0x717   :  { %5930 = vmatprep.subr.bf16.mxu1 %v8435_v19 }
 0x718   :  { %v6428_v5 = vpop.eup %6427  ;;  %v4736_v6 = vrot.slane %v4722_v18, %v7146_v40  ;;  %v4737_v34 = vcombine.high %v4729_v46, %v4729_v46  ;;  %v4740_v42 = vunpack.i.h.s16 %v4729_v46  ;;  %v5612_v30 = vpack.i.b16 %v4729_v46, %v4729_v46 }
 0x719   :  { %v6430_v10 = vpop.eup %6429 }
 0x71a   :  { %v4738_v28 = vcombine.high %v4736_v6, %v4736_v6  ;;  %v4742_v23 = vunpack.i.h.s16 %v4736_v6  ;;  %v4744_v29 = vunpack.i.h.s16 %v4737_v34  ;;  %v5613_v27 = vpack.i.b16 %v4736_v6, %v4736_v6 }
 0x71b   :  { %v5614_v58 = vpack.i.b16 %v4737_v34, %v4737_v34 }
 0x71c   :  { %5911 = vmatpush3.bf16.xpose.msra.mxu0 %v6422_v57  ;;  %v4746_v55 = vunpack.i.h.s16 %v4738_v28  ;;  %v4748_v57 = vpack.i.b16 %v4740_v42, %v4740_v42  ;;  %v4750_v36 = vpack.i.b16 %v4742_v23, %v4742_v23  ;;  %v4752_v22 = vpack.i.b16 %v4744_v29, %v4744_v29 }
 0x71d   :  { %5912 = vmatprep.subr.bf16.mxu0 %v8435_v19  ;;  %v5615_v53 = vpack.i.b16 %v4738_v28, %v4738_v28  ;;  %v4766_v32 = vrot.slane %v5613_v27, %v7157_v4 }
 0x71e   :  { %5931 = vmatpush3.bf16.xpose.msra.mxu1 %v6424_v16  ;;  %v4754_v16 = vpack.i.b16 %v4746_v55, %v4746_v55  ;;  %v4762_v47 = vrot.slane %v4748_v57, %v7157_v4 }
 0x71f   :  { %v7423_v33 = vpop.f32.mrb[32].mxu1  ;;  %5932 = vmatprep.subr.bf16.mxu1 %v8435_v19  ;;  %v6432_v11 = vpop.eup %6431  ;;  %v4782_v12 = vrot.slane %v5615_v53, %v7157_v4  ;;  %v4802_v46 = vpack.i.b16 %v4766_v32, %v4766_v32 }
 0x720   :  { %v7426_v61 = vpop.f32.mrb[33].mxu1  ;;  %v4786_v59 = vrot.slane %v4754_v16, %v7157_v4  ;;  %v4795_v21 = vpack.i.b16 %v4762_v47, %v4762_v47 }
 0x721   :  { %v7428_v2 = vpop.f32.mrb[34].mxu1  ;;  %v4830_v23 = vpack.i.b16 %v4782_v12, %v4782_v12  ;;  %v4807_v44 = vrot.slane %v4802_v46, %v7157_v4 }
 0x722   :  { %v7430_v1 = vpop.f32.mrb[35].mxu1  ;;  %v4800_v42 = vrot.slane %v4795_v21, %v7157_v4 }
 0x723   :  { %v4835_v57 = vrot.slane %v4830_v23, %v7157_v4  ;;  %v4845_v53 = vadd.bf16 %v4807_v44, %v2039_v26  ;;  %v6391_v44 = vld [vmem:[#allocation2 + $0x34] ss:$0 sps:$4 sm:$0xff]  }
 0x724   :  { %5913 = vmatpush3.bf16.xpose.msra.mxu0 %v6426_v60  ;;  %v4758_v60 = vrot.slane %v5612_v30, %v7157_v4  ;;  %v4837_v30 = vpack.i.b16 %v4786_v59, %v4786_v59 }
 0x725   :  { %5914 = vmatprep.subr.bf16.mxu0 %v8435_v19  ;;  %v4849_v32 = vadd.bf16 %v4835_v57, %v2039_v26  ;;  %v7493_v12 = vadd.bf16 %v4845_v53, %v7471_v56  ;;  %v4918_v53 = vrot.slane %v6391_v44, %v7146_v40 }
 0x726   :  { %5933 = vmatpush3.bf16.xpose.msra.mxu1 %v6428_v5  ;;  %v4770_v5 = vrot.slane %v4750_v36, %v7157_v4  ;;  %v4788_v18 = vpack.i.b16 %v4758_v60, %v4758_v60  ;;  %v4842_v36 = vrot.slane %v4837_v30, %v7157_v4 }
 0x727   :  { %v7434_v41 = vpop.f32.mrb[36].mxu1  ;;  %5934 = vmatprep.subr.bf16.mxu1 %v8435_v19  ;;  %8447 = vst [vmem:[#allocation18_spill] sm:$0xff] %v7493_v12 }
 0x728   :  { %v7437_v39 = vpop.f32.mrb[37].mxu1  ;;  %v4809_v6 = vpack.i.b16 %v4770_v5, %v4770_v5  ;;  %v4793_v28 = vrot.slane %v4788_v18, %v7157_v4  ;;  %v4850_v5 = vadd.bf16 %v4842_v36, %v2039_v26  ;;  %v2686_v36 = vld [vmem:[#allocation8 + $0x5] sm:$0x1] }
 0x729   :  { %v7443_v9 = vpop.f32.mrb[38].mxu1 }
 0x72a   :  { %v7447_v24 = vpop.f32.mrb[39].mxu1  ;;  %v4814_v29 = vrot.slane %v4809_v6, %v7157_v4  ;;  %v7508_v46 = vadd.bf16 %v4850_v5, %v7471_v56  ;;  %v7512_v6 = vpack.c.bf16 %v7428_v2, %v7423_v33  ;;  %v5567_v33 = vld.sshfl [vmem:[#allocation2 + $0x18] sm:$0x33 pattern:$0x75316420] }
 0x72c   :  { %5915 = vmatpush3.bf16.xpose.msra.mxu0 %v6430_v10  ;;  %v4774_v10 = vrot.slane %v5614_v58, %v7157_v4  ;;  %v4843_v58 = vadd.bf16 %v4793_v28, %v2039_v26  ;;  %v4846_v16 = vadd.bf16 %v4814_v29, %v2039_v26  ;;  %8452 = vst [vmem:[#allocation23_spill] sm:$0xff] %v7508_v46  ;;  %v2478_v29 = vld [vmem:[#allocation8 + $0x4] sm:$0x1] }
 0x72d   :  { %5940 = vmatprep.subr.bf16.mxu0 %v8435_v19 }
 0x72e   :  { %5935 = vmatpush3.bf16.xpose.msra.mxu1 %v6432_v11  ;;  %v4778_v11 = vrot.slane %v4752_v22, %v7157_v4  ;;  %v4816_v25 = vpack.i.b16 %v4774_v10, %v4774_v10  ;;  %v4844_v22 = vadd.bf16 %v4800_v42, %v2039_v26  ;;  %v7487_v10 = vadd.bf16 %v4843_v58, %v7471_v56  ;;  %v6392_v58 = vld [vmem:[#allocation2 + $0x3c] ss:$0 sps:$4 sm:$0xff]  }
 0x72f   :  { %5960 = vmatprep.subr.bf16.mxu1 %v8435_v19  ;;  %v7496_v59 = vadd.bf16 %v4846_v16, %v7471_v56  ;;  %v2703_v16 = vrot.slane %v5567_v33, %v7146_v40  ;;  %v5115_v5 = vrot.slane %v6392_v58, %v7146_v40 }
 0x730   :  { %v4823_v34 = vpack.i.b16 %v4778_v11, %v4778_v11  ;;  %v4821_v55 = vrot.slane %v4816_v25, %v7157_v4  ;;  %8445 = vst [vmem:[#allocation16_spill] sm:$0xff] %v7487_v10  ;;  %v7490_v11 = vadd.bf16 %v4844_v22, %v7471_v56  ;;  %v5562_v25 = vld.sshfl [vmem:[#allocation2 + $0x10] sm:$0x33 pattern:$0x75316420]  ;;  %v2479_v22 = vpack.c.bf16 %v2478_v29, %v2478_v29 }
 0x731   :  { %8448 = vst [vmem:[#allocation19_spill] sm:$0xff] %v7496_v59  ;;  %v2488_v23 = vcombine.high %v5562_v25, %v5562_v25 }
 0x732   :  { %v4828_v27 = vrot.slane %v4823_v34, %v7157_v4  ;;  %v4847_v60 = vadd.bf16 %v4821_v55, %v2039_v26  ;;  %8446 = vst [vmem:[#allocation17_spill] sm:$0xff] %v7490_v11  ;;  %v2495_v34 = vrot.slane %v5562_v25, %v7146_v40  ;;  %v7517_v55 = vpack.c.bf16 %v7430_v1, %v7426_v61 }
 0x733   :  { %v7521_v57 = vrot.slane %v2488_v23, %v7146_v40 }
 0x734   :  { %v4848_v47 = vadd.bf16 %v4828_v27, %v2039_v26  ;;  %v7499_v18 = vadd.bf16 %v4847_v60, %v7471_v56  ;;  %v7505_v26 = vadd.bf16 %v4849_v32, %v7471_v56  ;;  %v2506_v28 = vunpack.i.h.s16 %v2495_v34 }
 0x735   :  { %v5563_v42 = vpack.i.b16 %v2495_v34, %v2495_v34  ;;  %v2696_v32 = vcombine.high %v5567_v33, %v5567_v33  ;;  %v5564_v61 = vpack.i.b16 %v7521_v57, %v7521_v57  ;;  %v2508_v25 = vunpack.i.h.s16 %v7521_v57 }
 0x736   :  { %8449 = vst [vmem:[#allocation20_spill] sm:$0xff] %v7499_v18  ;;  %v7502_v21 = vadd.bf16 %v4848_v47, %v7471_v56  ;;  %8451 = vst [vmem:[#allocation22_spill] sm:$0xff] %v7505_v26  ;;  %v2514_v30 = vpack.i.b16 %v2506_v28, %v2506_v28  ;;  %v2687_v47 = vpack.c.bf16 %v2686_v36, %v2686_v36 }
 0x737   :  { %v2524_v27 = vrot.slane %v5563_v42, %v7157_v4  ;;  %v2618_v28 = vpack.i.b16 %v2479_v22, %v2479_v22  ;;  %v4919_v42 = vcombine.high %v4918_v53, %v4918_v53  ;;  %v7532_v44 = vrot.slane %v2696_v32, %v7146_v40 }
 0x738   :  { %8450 = vst [vmem:[#allocation21_spill] sm:$0xff] %v7502_v21  ;;  %v2528_v2 = vrot.slane %v2514_v30, %v7157_v4  ;;  %v2714_v30 = vunpack.i.h.s16 %v2703_v16  ;;  %v2826_v29 = vpack.i.b16 %v2687_v47, %v2687_v47  ;;  %v5116_v36 = vcombine.high %v5115_v5, %v5115_v5  ;;  %v3310_v21 = vld [vmem:[#allocation8 + $0x8] sm:$0x1] }
 0x739   :  { %v2554_v60 = vpack.i.b16 %v2524_v27, %v2524_v27  ;;  %v2532_v27 = vrot.slane %v5564_v61, %v7157_v4  ;;  %v2516_v19 = vpack.i.b16 %v2508_v25, %v2508_v25  ;;  %v7538_v58 = vrot.slane %v2618_v28, %v7157_v4 }
 0x73a   :  { %v2561_v1 = vpack.i.b16 %v2528_v2, %v2528_v2  ;;  %v4926_v22 = vrot.slane %v4918_v53, %v7146_v40  ;;  %v7543_v46 = vcombine.high %v2495_v34, %v2495_v34  ;;  %v5568_v32 = vpack.i.b16 %v2703_v16, %v2703_v16 }
 0x73b   :  { %v2559_v23 = vrot.slane %v2554_v60, %v7157_v4  ;;  %v4933_v60 = vrot.slane %v4919_v42, %v7146_v40  ;;  %v2722_v26 = vpack.i.b16 %v2714_v30, %v2714_v30  ;;  %v7546_v61 = vrot.slane %v2826_v29, %v7157_v4 }
 0x73c   :  { %v2566_v33 = vrot.slane %v2561_v1, %v7157_v4  ;;  %v7548_v1 = vcombine.high %v2703_v16, %v2703_v16  ;;  %v7551_v25 = vrot.slane %v5115_v5, %v7146_v40  ;;  %v2568_v28 = vpack.i.b16 %v2532_v27, %v2532_v27 }
 0x73d   :  { %v2609_v2 = vadd.bf16 %v2559_v23, %v7359_v7  ;;  %v2716_v23 = vunpack.i.h.s16 %v7532_v44  ;;  %v7555_v53 = vrot.slane %v5116_v36, %v7146_v40  ;;  %v7558_v42 = vrot.slane %v2516_v19, %v7157_v4 }
 0x73e   :  { %v2610_v47 = vadd.bf16 %v2566_v33, %v7359_v7  ;;  %v5569_v30 = vpack.i.b16 %v7532_v44, %v7532_v44  ;;  %v7566_v5 = vpack.c.bf16 %v7443_v9, %v7434_v41  ;;  %v4934_v29 = vcombine.high %v4926_v22, %v4926_v22 }
 0x73f   :  { %v2624_v34 = vadd.bf16 %v7538_v58, %v2609_v2  ;;  %v4935_v27 = vcombine.high %v4933_v60, %v4933_v60  ;;  %v2732_v33 = vrot.slane %v5568_v32, %v7157_v4  ;;  %v2736_v36 = vrot.slane %v2722_v26, %v7157_v4 }
 0x740   :  { %v2625_v16 = vadd.bf16 %v7538_v58, %v2610_v47  ;;  %v4937_v19 = vunpack.i.h.s16 %v4926_v22  ;;  %v4939_v18 = vunpack.i.h.s16 %v4933_v60  ;;  %v7571_v2 = vrot.slane %v2568_v28, %v7157_v4 }
 0x741   :  { %v2724_v59 = vpack.i.b16 %v2716_v23, %v2716_v23  ;;  %v4941_v12 = vunpack.i.h.s16 %v4934_v29  ;;  %v4943_v11 = vunpack.i.h.s16 %v4935_v27  ;;  %v7574_v47 = vrot.slane %v5569_v30, %v7157_v4 }
 0x742   :  { %v5616_v41 = vpack.i.b16 %v4926_v22, %v4926_v22  ;;  %v4945_v9 = vpack.i.b16 %v4937_v19, %v4937_v19  ;;  %v5617_v10 = vpack.i.b16 %v4933_v60, %v4933_v60  ;;  %6433 = vtanh.bf16 %v2624_v34 }
 0x743   :  { %v3311_v43 = vpack.c.bf16 %v3310_v21, %v3310_v21  ;;  %v4947_v32 = vpack.i.b16 %v4939_v18, %v4939_v18  ;;  %v5618_v14 = vpack.i.b16 %v4934_v29, %v4934_v29  ;;  %6435 = vtanh.bf16 %v2625_v16  ;;  %v3518_v29 = vld [vmem:[#allocation8 + $0x9] sm:$0x1] }
 0x744   :  { %v2762_v63 = vpack.i.b16 %v2732_v33, %v2732_v33  ;;  %v2769_v28 = vpack.i.b16 %v2736_v36, %v2736_v36  ;;  %v7579_v23 = vrot.slane %v2724_v59, %v7157_v4  ;;  %v4949_v45 = vpack.i.b16 %v4941_v12, %v4941_v12 }
 0x745   :  { %v5619_v20 = vpack.i.b16 %v4935_v27, %v4935_v27  ;;  %v4951_v30 = vpack.i.b16 %v4943_v11, %v4943_v11  ;;  %v2776_v22 = vpack.i.b16 %v7574_v47, %v7574_v47  ;;  %v4955_v60 = vrot.slane %v5616_v41, %v7157_v4 }
 0x746   :  { %v4959_v18 = vrot.slane %v4945_v9, %v7157_v4  ;;  %v4963_v21 = vrot.slane %v5617_v10, %v7157_v4  ;;  %v3450_v34 = vpack.i.b16 %v3311_v43, %v3311_v43  ;;  %v4967_v16 = vrot.slane %v4947_v32, %v7157_v4 }
 0x747   :  { %v4971_v33 = vrot.slane %v5618_v14, %v7157_v4  ;;  %v4975_v59 = vrot.slane %v4949_v45, %v7157_v4  ;;  %v2767_v12 = vrot.slane %v2762_v63, %v7157_v4  ;;  %v2774_v11 = vrot.slane %v2769_v28, %v7157_v4 }
 0x748   :  { %v4979_v27 = vrot.slane %v5619_v20, %v7157_v4  ;;  %v4985_v36 = vpack.i.b16 %v4955_v60, %v4955_v60  ;;  %v4983_v19 = vrot.slane %v4951_v30, %v7157_v4  ;;  %v4992_v47 = vpack.i.b16 %v4959_v18, %v4959_v18 }
 0x749   :  { %v4999_v41 = vpack.i.b16 %v4963_v21, %v4963_v21  ;;  %v5006_v10 = vpack.i.b16 %v4967_v16, %v4967_v16  ;;  %v2817_v43 = vadd.bf16 %v2767_v12, %v7416_v51  ;;  %v3519_v9 = vpack.c.bf16 %v3518_v29, %v3518_v29 }
 0x74a   :  { %v5013_v32 = vpack.i.b16 %v4971_v33, %v4971_v33  ;;  %v5020_v26 = vpack.i.b16 %v4975_v59, %v4975_v59  ;;  %v7595_v14 = vrot.slane %v3450_v34, %v7157_v4  ;;  %v4990_v63 = vrot.slane %v4985_v36, %v7157_v4 }
 0x74b   :  { %v4997_v45 = vrot.slane %v4992_v47, %v7157_v4  ;;  %v5004_v20 = vrot.slane %v4999_v41, %v7157_v4  ;;  %v5011_v28 = vrot.slane %v5006_v10, %v7157_v4  ;;  %v5027_v18 = vpack.i.b16 %v4979_v27, %v4979_v27 }
 0x74c   :  { %v5018_v30 = vrot.slane %v5013_v32, %v7157_v4  ;;  %v5025_v60 = vrot.slane %v5020_v26, %v7157_v4  ;;  %v5034_v21 = vpack.i.b16 %v4983_v19, %v4983_v19  ;;  %v5040_v29 = vadd.bf16 %v4990_v63, %v7566_v5 }
 0x74d   :  { %v5041_v16 = vadd.bf16 %v4997_v45, %v7566_v5  ;;  %v5042_v34 = vadd.bf16 %v5004_v20, %v7566_v5  ;;  %v7606_v33 = vpop.eup %6433  ;;  %v5032_v59 = vrot.slane %v5027_v18, %v7157_v4  ;;  %v5043_v12 = vadd.bf16 %v5011_v28, %v7566_v5 }
 0x74e   :  { %v5044_v36 = vadd.bf16 %v5018_v30, %v7566_v5  ;;  %v5045_v47 = vadd.bf16 %v5025_v60, %v7566_v5  ;;  %v7612_v41 = vpop.eup %6435  ;;  %v5039_v26 = vrot.slane %v5034_v21, %v7157_v4  ;;  %v7616_v27 = vadd.bf16 %v5040_v29, %v7595_v14 }
 0x74f   :  { %v7619_v19 = vadd.bf16 %v5041_v16, %v7595_v14  ;;  %v7622_v10 = vadd.bf16 %v5042_v34, %v7595_v14  ;;  %v5046_v32 = vadd.bf16 %v5032_v59, %v7566_v5  ;;  %v7626_v63 = vadd.bf16 %v5043_v12, %v7595_v14 }
 0x750   :  { %v7629_v45 = vadd.bf16 %v5044_v36, %v7595_v14  ;;  %v7632_v20 = vadd.bf16 %v5045_v47, %v7595_v14  ;;  %v7635_v28 = vrot.slane %v2776_v22, %v7157_v4  ;;  %v5047_v30 = vadd.bf16 %v5039_v26, %v7566_v5 }
 0x751   :  { %8453 = vst [vmem:[#allocation24_spill] sm:$0xff] %v7626_v63  ;;  %v7640_v60 = vpack.c.bf16 %v7447_v24, %v7437_v39  ;;  %v5131_v18 = vcombine.high %v7551_v25, %v7551_v25  ;;  %v2818_v21 = vadd.bf16 %v2774_v11, %v7416_v51  ;;  %v7646_v29 = vadd.bf16 %v5046_v32, %v7595_v14 }
 0x752   :  { %8454 = vst [vmem:[#allocation25_spill] sm:$0xff] %v7629_v45  ;;  %8455 = vst [vmem:[#allocation26_spill] sm:$0xff] %v7632_v20  ;;  %v5132_v16 = vcombine.high %v7555_v53, %v7555_v53  ;;  %v5134_v22 = vunpack.i.h.s16 %v7551_v25  ;;  %v2832_v34 = vadd.bf16 %v7546_v61, %v2817_v43  ;;  %v7653_v5 = vadd.bf16 %v5047_v30, %v7595_v14 }
 0x753   :  { %8456 = vst [vmem:[#allocation27_spill] sm:$0xff] %v7646_v29  ;;  %v5136_v39 = vunpack.i.h.s16 %v7555_v53  ;;  %v5138_v24 = vunpack.i.h.s16 %v5131_v18  ;;  %v3658_v59 = vpack.i.b16 %v3519_v9, %v3519_v9  ;;  %v5620_v11 = vpack.i.b16 %v7551_v25, %v7551_v25 }
 0x754   :  { %8457 = vst [vmem:[#allocation28_spill] sm:$0xff] %v7653_v5  ;;  %v5140_v12 = vunpack.i.h.s16 %v5132_v16  ;;  %v5142_v36 = vpack.i.b16 %v5134_v22, %v5134_v22  ;;  %v5621_v26 = vpack.i.b16 %v7555_v53, %v7555_v53  ;;  %v5622_v43 = vpack.i.b16 %v5131_v18, %v5131_v18 }
 0x755   :  { %v5144_v32 = vpack.i.b16 %v5136_v39, %v5136_v39  ;;  %v2833_v30 = vadd.bf16 %v7546_v61, %v2818_v21  ;;  %v5146_v5 = vpack.i.b16 %v5138_v24, %v5138_v24  ;;  %v5623_v29 = vpack.i.b16 %v5132_v16, %v5132_v16 }
 0x756   :  { %v5148_v20 = vpack.i.b16 %v5140_v12, %v5140_v12  ;;  %6437 = vtanh.bf16 %v2832_v34  ;;  %v5152_v9 = vrot.slane %v5620_v11, %v7157_v4  ;;  %v5156_v45 = vrot.slane %v5142_v36, %v7157_v4 }
 0x757   :  { %v5160_v25 = vrot.slane %v5621_v26, %v7157_v4  ;;  %v7667_v22 = vrot.slane %v3658_v59, %v7157_v4  ;;  %v5164_v47 = vrot.slane %v5144_v32, %v7157_v4  ;;  %v5168_v53 = vrot.slane %v5622_v43, %v7157_v4 }
 0x758   :  { %v5172_v18 = vrot.slane %v5146_v5, %v7157_v4  ;;  %v5176_v21 = vrot.slane %v5623_v29, %v7157_v4  ;;  %v5180_v16 = vrot.slane %v5148_v20, %v7157_v4  ;;  %v5182_v34 = vpack.i.b16 %v5152_v9, %v5152_v9 }
 0x759   :  { %v5189_v39 = vpack.i.b16 %v5156_v45, %v5156_v45  ;;  %v5196_v24 = vpack.i.b16 %v5160_v25, %v5160_v25  ;;  %v5203_v12 = vpack.i.b16 %v5164_v47, %v5164_v47  ;;  %v5210_v11 = vpack.i.b16 %v5168_v53, %v5168_v53 }
 0x75a   :  { %v5217_v36 = vpack.i.b16 %v5172_v18, %v5172_v18  ;;  %v5187_v26 = vrot.slane %v5182_v34, %v7157_v4  ;;  %v5224_v63 = vpack.i.b16 %v5176_v21, %v5176_v21  ;;  %v5231_v32 = vpack.i.b16 %v5180_v16, %v5180_v16  ;;  %v2223_v34 = vld [vmem:[#allocation8 + $0xa] sm:$0x1] }
 0x75b   :  { %v5194_v59 = vrot.slane %v5189_v39, %v7157_v4  ;;  %v5201_v43 = vrot.slane %v5196_v24, %v7157_v4  ;;  %v5208_v5 = vrot.slane %v5203_v12, %v7157_v4  ;;  %v5215_v29 = vrot.slane %v5210_v11, %v7157_v4  ;;  %v2432_v11 = vld [vmem:[#allocation8 + $0xb] sm:$0x1] }
 0x75c   :  { %v5222_v20 = vrot.slane %v5217_v36, %v7157_v4  ;;  %v5229_v45 = vrot.slane %v5224_v63, %v7157_v4  ;;  %v5236_v47 = vrot.slane %v5231_v32, %v7157_v4  ;;  %v5237_v9 = vadd.bf16 %v5187_v26, %v7640_v60 }
 0x75d   :  { %v5238_v25 = vadd.bf16 %v5194_v59, %v7640_v60  ;;  %v5239_v53 = vadd.bf16 %v5201_v43, %v7640_v60  ;;  %v5240_v18 = vadd.bf16 %v5208_v5, %v7640_v60  ;;  %v5241_v21 = vadd.bf16 %v5215_v29, %v7640_v60 }
 0x75e   :  { %v5242_v16 = vadd.bf16 %v5222_v20, %v7640_v60  ;;  %v5243_v39 = vadd.bf16 %v5229_v45, %v7640_v60  ;;  %v5244_v24 = vadd.bf16 %v5236_v47, %v7640_v60  ;;  %v7691_v63 = vadd.bf16 %v5237_v9, %v7667_v22 }
 0x75f   :  { %v7694_v12 = vadd.bf16 %v5238_v25, %v7667_v22  ;;  %v7697_v36 = vadd.bf16 %v5239_v53, %v7667_v22  ;;  %v7700_v26 = vadd.bf16 %v5240_v18, %v7667_v22  ;;  %v7703_v59 = vadd.bf16 %v5241_v21, %v7667_v22 }
 0x760   :  { %v7706_v32 = vadd.bf16 %v5242_v16, %v7667_v22  ;;  %6439 = vtanh.bf16 %v2833_v30  ;;  %v7709_v60 = vadd.bf16 %v5243_v39, %v7667_v22  ;;  %v7712_v43 = vadd.bf16 %v5244_v24, %v7667_v22 }
 0x761   :  { %8458 = vst [vmem:[#allocation29_spill] sm:$0xff] %v7703_v59  ;;  %v7714_v5 = vpack.c.bf16 %v2223_v34, %v2223_v34  ;;  %v6438_v29 = vpop.eup %6437  ;;  %v5565_v20 = vpack.i.b16 %v7543_v46, %v7543_v46  ;;  %v2575_v45 = vpack.i.b16 %v7558_v42, %v7558_v42  ;;  %v7720_v47 = vpack.c.bf16 %v2432_v11, %v2432_v11 }
 0x762   :  { %8459 = vst [vmem:[#allocation30_spill] sm:$0xff] %v7706_v32  ;;  %8460 = vst [vmem:[#allocation31_spill] sm:$0xff] %v7709_v60  ;;  %v5570_v30 = vpack.i.b16 %v7548_v1, %v7548_v1  ;;  %v2783_v9 = vpack.i.b16 %v7579_v23, %v7579_v23  ;;  %v8462_v25 = vadd.bf16 %v7571_v2, %v7359_v7  ;;  %v8464_v21 = vmov 0.0  }
 0x763   :  { %8461 = vst [vmem:[#allocation32_spill] sm:$0xff] %v7712_v43  ;;  %5917 = vmatmul.mubr.bf16.vlgmr.msra.gmra.mrb[40].mxu0 %v7714_v5  ;;  %5937 = vmatmul.mubr.bf16.vlgmr.msra.gmra.mrb[40].mxu1 %v7720_v47  ;;  %v8463_v42 = vadd.bf16 %v7635_v28, %v7416_v51  ;;  %v2510_v23 = vunpack.i.h.s16 %v7543_v46  ;;  %v2540_v16 = vrot.slane %v5565_v20, %v7157_v4 }
 0x764   :  { %v2626_v53 = vadd.bf16 %v7538_v58, %v8462_v25  ;;  %5941 = vmatpush3.bf16.xpose.msra.mxu0 %v7606_v33  ;;  %5961 = vmatpush3.bf16.xpose.msra.mxu1 %v6438_v29  ;;  %v2580_v2 = vrot.slane %v2575_v45, %v7157_v4  ;;  %v2718_v33 = vunpack.i.h.s16 %v7548_v1  ;;  %v2748_v28 = vrot.slane %v5570_v30, %v7157_v4 }
 0x765   :  { %v2834_v18 = vadd.bf16 %v7546_v61, %v8463_v42  ;;  %5942 = vmatprep.subr.bf16.mxu0 %v8464_v21  ;;  %5962 = vmatprep.subr.bf16.mxu1 %v8464_v21  ;;  %v2788_v34 = vrot.slane %v2783_v9, %v7157_v4  ;;  %v2518_v24 = vpack.i.b16 %v2510_v23, %v2510_v23 }
 0x766   :  { %5956 = vmatprep.mubr.msk.bf16.mxu0 %vm6738_vm1, %v8464_v21  ;;  %5976 = vmatprep.mubr.msk.bf16.mxu1 %vm6738_vm1, %v8464_v21  ;;  %v2612_v46 = vadd.bf16 %v2580_v2, %v7359_v7  ;;  %6441 = vtanh.bf16 %v2626_v53  ;;  %v2582_v11 = vpack.i.b16 %v2540_v16, %v2540_v16  ;;  %v2726_v29 = vpack.i.b16 %v2718_v33, %v2718_v33 }
 0x767   :  { %v2820_v39 = vadd.bf16 %v2788_v34, %v7416_v51  ;;  %6443 = vtanh.bf16 %v2834_v18  ;;  %v2790_v20 = vpack.i.b16 %v2748_v28, %v2748_v28  ;;  %v2504_v9 = vcombine.high %v7521_v57, %v7521_v57 }
 0x768   :  { %v2627_v1 = vadd.bf16 %v7538_v58, %v2612_v46  ;;  %v2544_v25 = vrot.slane %v2518_v24, %v7157_v4  ;;  %v2587_v53 = vrot.slane %v2582_v11, %v7157_v4  ;;  %v2712_v42 = vcombine.high %v7532_v44, %v7532_v44 }
 0x769   :  { %v2835_v30 = vadd.bf16 %v7546_v61, %v2820_v39  ;;  %v2752_v18 = vrot.slane %v2726_v29, %v7157_v4  ;;  %v5566_v57 = vpack.i.b16 %v2504_v9, %v2504_v9  ;;  %v2512_v24 = vunpack.i.h.s16 %v2504_v9 }
 0x76a   :  { %v2613_v23 = vadd.bf16 %v2587_v53, %v7359_v7  ;;  %6445 = vtanh.bf16 %v2627_v1  ;;  %v2589_v2 = vpack.i.b16 %v2544_v25, %v2544_v25  ;;  %v5571_v28 = vpack.i.b16 %v2712_v42, %v2712_v42 }
 0x76b   :  { %v6440_v45 = vpop.eup %6439  ;;  %6447 = vtanh.bf16 %v2835_v30  ;;  %v2797_v34 = vpack.i.b16 %v2752_v18, %v2752_v18  ;;  %v2548_v11 = vrot.slane %v5566_v57, %v7157_v4  ;;  %v2520_v53 = vpack.i.b16 %v2512_v24, %v2512_v24 }
 0x76c   :  { %5943 = vmatpush3.bf16.xpose.msra.mxu0 %v7612_v41  ;;  %5963 = vmatpush3.bf16.xpose.msra.mxu1 %v6440_v45  ;;  %v2795_v41 = vrot.slane %v2790_v20, %v7157_v4  ;;  %v2628_v39 = vadd.bf16 %v7538_v58, %v2613_v23  ;;  %v2594_v29 = vrot.slane %v2589_v2, %v7157_v4  ;;  %v2720_v20 = vunpack.i.h.s16 %v2712_v42  ;;  %v5577_v2 = vld.sshfl [vmem:[#allocation2 + $0x28] sm:$0x33 pattern:$0x75316420] }
 0x76d   :  { %5944 = vmatprep.subr.bf16.mxu0 %v8464_v21  ;;  %5964 = vmatprep.subr.bf16.mxu1 %v8464_v21  ;;  %v2756_v45 = vrot.slane %v5571_v28, %v7157_v4  ;;  %v2802_v1 = vrot.slane %v2797_v34, %v7157_v4  ;;  %v2596_v18 = vpack.i.b16 %v2548_v11, %v2548_v11 }
 0x76e   :  { %v2821_v16 = vadd.bf16 %v2795_v41, %v7416_v51  ;;  %v2614_v30 = vadd.bf16 %v2594_v29, %v7359_v7  ;;  %6449 = vtanh.bf16 %v2628_v39  ;;  %v5572_v41 = vld.sshfl [vmem:[#allocation2 + $0x20] sm:$0x33 pattern:$0x75316420]  ;;  %v2728_v23 = vpack.i.b16 %v2720_v20, %v2720_v20 }
 0x76f   :  { %v2822_v25 = vadd.bf16 %v2802_v1, %v7416_v51  ;;  %v7780_v28 = vrot.slane %v5572_v41, %v7146_v40  ;;  %v2552_v34 = vrot.slane %v2520_v53, %v7157_v4  ;;  %v7786_v39 = vrot.slane %v5577_v2, %v7146_v40 }
 0x770   :  { %v2836_v44 = vadd.bf16 %v7546_v61, %v2821_v16  ;;  %v2804_v16 = vpack.i.b16 %v2756_v45, %v2756_v45  ;;  %v2629_v42 = vadd.bf16 %v7538_v58, %v2614_v30 }
 0x771   :  { %v6442_v33 = vpop.eup %6441  ;;  %v2603_v20 = vpack.i.b16 %v2552_v34, %v2552_v34  ;;  %v5573_v45 = vpack.i.b16 %v7780_v28, %v7780_v28  ;;  %v3130_v34 = vunpack.i.h.s16 %v7786_v39 }
 0x772   :  { %v6444_v46 = vpop.eup %6443  ;;  %6451 = vtanh.bf16 %v2836_v44  ;;  %v2760_v44 = vrot.slane %v2728_v23, %v7157_v4  ;;  %v2809_v24 = vrot.slane %v2804_v16, %v7157_v4 }
 0x773   :  { %6453 = vtanh.bf16 %v2629_v42  ;;  %v2608_v16 = vrot.slane %v2603_v20, %v7157_v4  ;;  %v2940_v42 = vrot.slane %v5573_v45, %v7157_v4  ;;  %v3112_v45 = vcombine.high %v5577_v2, %v5577_v2 }
 0x774   :  { %5945 = vmatpush3.bf16.xpose.msra.mxu0 %v6442_v33  ;;  %5965 = vmatpush3.bf16.xpose.msra.mxu1 %v6444_v46  ;;  %v2837_v33 = vadd.bf16 %v7546_v61, %v2822_v25  ;;  %v2601_v46 = vrot.slane %v2596_v18, %v7157_v4  ;;  %v2823_v29 = vadd.bf16 %v2809_v24, %v7416_v51 }
 0x775   :  { %5946 = vmatprep.subr.bf16.mxu0 %v8464_v21  ;;  %5966 = vmatprep.subr.bf16.mxu1 %v8464_v21  ;;  %v6446_v9 = vpop.eup %6445  ;;  %v2811_v30 = vpack.i.b16 %v2760_v44, %v2760_v44  ;;  %v5578_v25 = vpack.i.b16 %v7786_v39, %v7786_v39  ;;  %v2616_v44 = vadd.bf16 %v2608_v16, %v7359_v7 }
 0x776   :  { %v6448_v57 = vpop.eup %6447  ;;  %v2615_v11 = vadd.bf16 %v2601_v46, %v7359_v7  ;;  %6455 = vtanh.bf16 %v2837_v33  ;;  %v2838_v23 = vadd.bf16 %v7546_v61, %v2823_v29  ;;  %v2904_v29 = vcombine.high %v5572_v41, %v5572_v41 }
 0x777   :  { %v2816_v33 = vrot.slane %v2811_v30, %v7157_v4  ;;  %v3148_v46 = vrot.slane %v5578_v25, %v7157_v4  ;;  %v3138_v43 = vpack.i.b16 %v3130_v34, %v3130_v34  ;;  %v2631_v30 = vadd.bf16 %v7538_v58, %v2616_v44 }
 0x778   :  { %v2630_v18 = vadd.bf16 %v7538_v58, %v2615_v11  ;;  %v7812_v7 = vrot.slane %v2904_v29, %v7146_v40  ;;  %v7818_v2 = vrot.slane %v3112_v45, %v7146_v40 }
 0x779   :  { %v6450_v1 = vpop.eup %6449  ;;  %v2824_v11 = vadd.bf16 %v2816_v33, %v7416_v51  ;;  %v3178_v60 = vpack.i.b16 %v3148_v46, %v3148_v46 }
 0x77a   :  { %6457 = vtanh.bf16 %v2630_v18  ;;  %v3152_v18 = vrot.slane %v3138_v43, %v7157_v4  ;;  %v5579_v34 = vpack.i.b16 %v7818_v2, %v7818_v2  ;;  %v3132_v29 = vunpack.i.h.s16 %v7818_v2 }
 0x77b   :  { %6459 = vtanh.bf16 %v2838_v23  ;;  %v2839_v25 = vadd.bf16 %v7546_v61, %v2824_v11 }
 0x77c   :  { %5947 = vmatpush3.bf16.xpose.msra.mxu0 %v6446_v9  ;;  %5967 = vmatpush3.bf16.xpose.msra.mxu1 %v6448_v57  ;;  %v2894_v9 = vld [vmem:[#allocation8 + $0x6] sm:$0x1]  ;;  %v2922_v57 = vunpack.i.h.s16 %v7780_v28  ;;  %6461 = vtanh.bf16 %v2631_v30  ;;  %v3185_v43 = vpack.i.b16 %v3152_v18, %v3152_v18 }
 0x77d   :  { %5948 = vmatprep.subr.bf16.mxu0 %v8464_v21  ;;  %5968 = vmatprep.subr.bf16.mxu1 %v8464_v21  ;;  %v6452_v53 = vpop.eup %6451  ;;  %v2895_v24 = vpack.c.bf16 %v2894_v9, %v2894_v9  ;;  %v3183_v9 = vrot.slane %v3178_v60, %v7157_v4  ;;  %6463 = vtanh.bf16 %v2839_v25 }
 0x77e   :  { %v2930_v20 = vpack.i.b16 %v2922_v57, %v2922_v57  ;;  %v5574_v57 = vpack.i.b16 %v7812_v7, %v7812_v7 }
 0x77f   :  { %v3034_v59 = vpack.i.b16 %v2895_v24, %v2895_v24  ;;  %v3233_v16 = vadd.bf16 %v3183_v9, %v7441_v62 }
 0x780   :  { %v2944_v51 = vrot.slane %v2930_v20, %v7157_v4  ;;  %v2948_v24 = vrot.slane %v5574_v57, %v7157_v4  ;;  %v3156_v20 = vrot.slane %v5579_v34, %v7157_v4 }
 0x781   :  { %v7824_v23 = vrot.slane %v3034_v59, %v7157_v4  ;;  %v3248_v44 = vadd.bf16 %v7471_v56, %v3233_v16  ;;  %v2924_v59 = vunpack.i.h.s16 %v7812_v7  ;;  %v2640_v16 = vld [vmem:[#allocation8 + $0xc] sm:$0x1] }
 0x782   :  { %v2984_v25 = vpack.i.b16 %v2948_v24, %v2948_v24  ;;  %v3192_v18 = vpack.i.b16 %v3156_v20, %v3156_v20 }
 0x783   :  { %v2932_v30 = vpack.i.b16 %v2924_v59, %v2924_v59  ;;  %v7855_v59 = vpack.c.bf16 %v2640_v16, %v2640_v16 }
 0x784   :  { %5949 = vmatpush3.bf16.xpose.msra.mxu0 %v6450_v1  ;;  %5969 = vmatpush3.bf16.xpose.msra.mxu1 %v6452_v53  ;;  %v2970_v1 = vpack.i.b16 %v2940_v42, %v2940_v42  ;;  %v6454_v53 = vpop.eup %6453  ;;  %v2977_v42 = vpack.i.b16 %v2944_v51, %v2944_v51 }
 0x785   :  { %5950 = vmatprep.subr.bf16.mxu0 %v8464_v21  ;;  %5970 = vmatprep.subr.bf16.mxu1 %v8464_v21  ;;  %v6456_v32 = vpop.eup %6455  ;;  %v2952_v34 = vrot.slane %v2932_v30, %v7157_v4 }
 0x786   :  { %v2975_v41 = vrot.slane %v2970_v1, %v7157_v4  ;;  %v6458_v33 = vpop.eup %6457  ;;  %v2982_v11 = vrot.slane %v2977_v42, %v7157_v4  ;;  %v3190_v1 = vrot.slane %v3185_v43, %v7157_v4  ;;  %v2848_v42 = vld [vmem:[#allocation8 + $0xd] sm:$0x1]  ;;  %v2989_v43 = vrot.slane %v2984_v25, %v7157_v4 }
 0x787   :  { %v6460_v46 = vpop.eup %6459  ;;  %v2991_v20 = vpack.i.b16 %v2952_v34, %v2952_v34 }
 0x788   :  { %v3234_v45 = vadd.bf16 %v3190_v1, %v7441_v62  ;;  %v6462_v51 = vpop.eup %6461  ;;  %v3027_v24 = vadd.bf16 %v2989_v43, %v7389_v52 }
 0x789   :  { %v6464_v9 = vpop.eup %6463 }
 0x78a   :  { %v3249_v57 = vadd.bf16 %v7471_v56, %v3234_v45  ;;  %v3042_v30 = vadd.bf16 %v7824_v23, %v3027_v24 }
 0x78c   :  { %5951 = vmatpush3.bf16.xpose.msra.mxu0 %v6454_v53  ;;  %5971 = vmatpush3.bf16.xpose.msra.mxu1 %v6456_v32  ;;  %v3025_v32 = vadd.bf16 %v2975_v41, %v7389_v52  ;;  %v3026_v53 = vadd.bf16 %v2982_v11, %v7389_v52  ;;  %v3140_v41 = vpack.i.b16 %v3132_v29, %v3132_v29 }
 0x78d   :  { %5952 = vmatprep.subr.bf16.mxu0 %v8464_v21  ;;  %5972 = vmatprep.subr.bf16.mxu1 %v8464_v21  ;;  %v7858_v11 = vpack.c.bf16 %v2848_v42, %v2848_v42 }
 0x78e   :  { %v3040_v60 = vadd.bf16 %v7824_v23, %v3025_v32  ;;  %v3041_v32 = vadd.bf16 %v7824_v23, %v3026_v53 }
 0x790   :  { %6465 = vtanh.bf16 %v3040_v60  ;;  %v3160_v60 = vrot.slane %v3140_v41, %v7157_v4 }
 0x791   :  { %6467 = vtanh.bf16 %v3248_v44  ;;  %v3197_v44 = vrot.slane %v3192_v18, %v7157_v4  ;;  %v2996_v18 = vrot.slane %v2991_v20, %v7157_v4 }
 0x792   :  { %6469 = vtanh.bf16 %v3041_v32  ;;  %v3199_v45 = vpack.i.b16 %v3160_v60, %v3160_v60 }
 0x793   :  { %6471 = vtanh.bf16 %v3249_v57  ;;  %v3028_v57 = vadd.bf16 %v2996_v18, %v7389_v52 }
 0x794   :  { %5953 = vmatpush3.bf16.xpose.msra.mxu0 %v6458_v33  ;;  %5973 = vmatpush3.bf16.xpose.msra.mxu1 %v6460_v46  ;;  %v2919_v33 = vcombine.high %v7780_v28, %v7780_v28  ;;  %v3127_v46 = vcombine.high %v7786_v39, %v7786_v39  ;;  %v3235_v28 = vadd.bf16 %v3197_v44, %v7441_v62  ;;  %6473 = vtanh.bf16 %v3042_v30 }
 0x795   :  { %5954 = vmatprep.subr.bf16.mxu0 %v8464_v21  ;;  %5974 = vmatprep.subr.bf16.mxu1 %v8464_v21  ;;  %v3204_v16 = vrot.slane %v3199_v45, %v7157_v4 }
 0x796   :  { %v5575_v29 = vpack.i.b16 %v2919_v33, %v2919_v33  ;;  %v5580_v53 = vpack.i.b16 %v3127_v46, %v3127_v46  ;;  %v3250_v25 = vadd.bf16 %v7471_v56, %v3235_v28 }
 0x797   :  { %v3236_v42 = vadd.bf16 %v3204_v16, %v7441_v62 }
 0x798   :  { %v2956_v41 = vrot.slane %v5575_v29, %v7157_v4  ;;  %v3164_v32 = vrot.slane %v5580_v53, %v7157_v4  ;;  %6475 = vtanh.bf16 %v3250_v25  ;;  %v2920_v29 = vcombine.high %v7812_v7, %v7812_v7 }
 0x799   :  { %v3251_v28 = vadd.bf16 %v7471_v56, %v3236_v42  ;;  %v3128_v53 = vcombine.high %v7818_v2, %v7818_v2 }
 0x79a   :  { %v2998_v34 = vpack.i.b16 %v2956_v41, %v2956_v41  ;;  %v3206_v44 = vpack.i.b16 %v3164_v32, %v3164_v32  ;;  %v5576_v7 = vpack.i.b16 %v2920_v29, %v2920_v29 }
 0x79b   :  { %v6466_v1 = vpop.eup %6465  ;;  %v5581_v18 = vpack.i.b16 %v3128_v53, %v3128_v53 }
 0x79c   :  { %5955 = vmatpush3.bf16.xpose.msra.mxu0 %v6462_v51  ;;  %5975 = vmatpush3.bf16.xpose.msra.mxu1 %v6464_v9  ;;  %v6468_v39 = vpop.eup %6467  ;;  %v2926_v51 = vunpack.i.h.s16 %v2919_v33  ;;  %v3134_v9 = vunpack.i.h.s16 %v3127_v46  ;;  %v3043_v46 = vadd.bf16 %v7824_v23, %v3028_v57  ;;  %v2928_v57 = vunpack.i.h.s16 %v2920_v29 }
 0x79d   :  { %5980 = vmatprep.subr.bf16.mxu0 %v8464_v21  ;;  %6000 = vmatprep.subr.bf16.mxu1 %v8464_v21  ;;  %v6470_v43 = vpop.eup %6469  ;;  %v2964_v42 = vrot.slane %v5576_v7, %v7157_v4 }
 0x79e   :  { %v2934_v33 = vpack.i.b16 %v2926_v51, %v2926_v51  ;;  %v3142_v60 = vpack.i.b16 %v3134_v9, %v3134_v9  ;;  %v6472_v24 = vpop.eup %6471  ;;  %6477 = vtanh.bf16 %v3043_v46  ;;  %v2936_v46 = vpack.i.b16 %v2928_v57, %v2928_v57 }
 0x79f   :  { %6479 = vtanh.bf16 %v3251_v28  ;;  %v6474_v41 = vpop.eup %6473  ;;  %v3012_v28 = vpack.i.b16 %v2964_v42, %v2964_v42 }
 0x7a0   :  { %v2960_v20 = vrot.slane %v2934_v33, %v7157_v4  ;;  %v3168_v45 = vrot.slane %v3142_v60, %v7157_v4 }
 0x7a2   :  { %v3005_v51 = vpack.i.b16 %v2960_v20, %v2960_v20  ;;  %v3213_v9 = vpack.i.b16 %v3168_v45, %v3168_v45  ;;  %v5582_v20 = vld.sshfl [vmem:[#allocation2 + $0x30] sm:$0x33 pattern:$0x75316420] }
 0x7a3   :  { %5957 = vmatmul.mubr.bf16.vlgmr.msra.gmra.mrb[44].mxu0 %v7855_v59  ;;  %5977 = vmatmul.mubr.bf16.vlgmr.msra.gmra.mrb[44].mxu1 %v7858_v11  ;;  %v6476_v32 = vpop.eup %6475  ;;  %v7905_v7 = vrot.slane %v5582_v20, %v7146_v40 }
 0x7a4   :  { %5981 = vmatpush3.bf16.xpose.msra.mxu0 %v6466_v1  ;;  %6001 = vmatpush3.bf16.xpose.msra.mxu1 %v6468_v39  ;;  %v3003_v1 = vrot.slane %v2998_v34, %v7157_v4  ;;  %v3211_v39 = vrot.slane %v3206_v44, %v7157_v4  ;;  %v3010_v33 = vrot.slane %v3005_v51, %v7157_v4  ;;  %v3136_v34 = vunpack.i.h.s16 %v3128_v53 }
 0x7a5   :  { %5982 = vmatprep.subr.bf16.mxu0 %v8464_v21  ;;  %6002 = vmatprep.subr.bf16.mxu1 %v8464_v21  ;;  %v3218_v60 = vrot.slane %v3213_v9, %v7157_v4  ;;  %v2968_v51 = vrot.slane %v2936_v46, %v7157_v4  ;;  %v5583_v42 = vpack.i.b16 %v7905_v7, %v7905_v7 }
 0x7a6   :  { %5996 = vmatprep.mubr.msk.bf16.mxu0 %vm6738_vm1, %v8464_v21  ;;  %6016 = vmatprep.mubr.msk.bf16.mxu1 %vm6738_vm1, %v8464_v21  ;;  %v3029_v30 = vadd.bf16 %v3003_v1, %v7389_v52  ;;  %v3237_v25 = vadd.bf16 %v3211_v39, %v7441_v62  ;;  %v3030_v44 = vadd.bf16 %v3010_v33, %v7389_v52 }
 0x7a7   :  { %v3144_v1 = vpack.i.b16 %v3136_v34, %v3136_v34  ;;  %v3019_v57 = vpack.i.b16 %v2968_v51, %v2968_v51  ;;  %v3320_v51 = vcombine.high %v5582_v20, %v5582_v20 }
 0x7a8   :  { %v3044_v16 = vadd.bf16 %v7824_v23, %v3029_v30  ;;  %v3252_v2 = vadd.bf16 %v7471_v56, %v3237_v25  ;;  %v5587_v30 = vld.sshfl [vmem:[#allocation2 + $0x38] sm:$0x33 pattern:$0x75316420]  ;;  %v3045_v53 = vadd.bf16 %v7824_v23, %v3030_v44 }
 0x7a9   :  { %v6478_v29 = vpop.eup %6477  ;;  %v3176_v9 = vrot.slane %v3144_v1, %v7157_v4  ;;  %v3024_v46 = vrot.slane %v3019_v57, %v7157_v4 }
 0x7aa   :  { %6481 = vtanh.bf16 %v3044_v16  ;;  %v6480_v39 = vpop.eup %6479 }
 0x7ab   :  { %6483 = vtanh.bf16 %v3252_v2  ;;  %v3227_v34 = vpack.i.b16 %v3176_v9, %v3176_v9 }
 0x7ac   :  { %5983 = vmatpush3.bf16.xpose.msra.mxu0 %v6470_v43  ;;  %6003 = vmatpush3.bf16.xpose.msra.mxu1 %v6472_v24  ;;  %v3172_v43 = vrot.slane %v5581_v18, %v7157_v4  ;;  %v3238_v24 = vadd.bf16 %v3218_v60, %v7441_v62  ;;  %v7911_v18 = vrot.slane %v5587_v30, %v7146_v40  ;;  %6485 = vtanh.bf16 %v3045_v53 }
 0x7ad   :  { %5984 = vmatprep.subr.bf16.mxu0 %v8464_v21  ;;  %6004 = vmatprep.subr.bf16.mxu1 %v8464_v21  ;;  %v3232_v1 = vrot.slane %v3227_v34, %v7157_v4  ;;  %v3032_v53 = vadd.bf16 %v3024_v46, %v7389_v52 }
 0x7ae   :  { %v3220_v45 = vpack.i.b16 %v3172_v43, %v3172_v43  ;;  %v3253_v25 = vadd.bf16 %v7471_v56, %v3238_v24  ;;  %v5588_v43 = vpack.i.b16 %v7911_v18, %v7911_v18 }
 0x7b0   :  { %6487 = vtanh.bf16 %v3253_v25  ;;  %v3240_v25 = vadd.bf16 %v3232_v1, %v7441_v62 }
 0x7b2   :  { %v3255_v34 = vadd.bf16 %v7471_v56, %v3240_v25 }
 0x7b4   :  { %5985 = vmatpush3.bf16.xpose.msra.mxu0 %v6474_v41  ;;  %6005 = vmatpush3.bf16.xpose.msra.mxu1 %v6476_v32  ;;  %v3017_v41 = vrot.slane %v3012_v28, %v7157_v4  ;;  %v3225_v32 = vrot.slane %v3220_v45, %v7157_v4  ;;  %v3338_v28 = vunpack.i.h.s16 %v7905_v7  ;;  %v3546_v45 = vunpack.i.h.s16 %v7911_v18 }
 0x7b5   :  { %5986 = vmatprep.subr.bf16.mxu0 %v8464_v21  ;;  %6006 = vmatprep.subr.bf16.mxu1 %v8464_v21  ;;  %v6482_v33 = vpop.eup %6481 }
 0x7b6   :  { %v3031_v16 = vadd.bf16 %v3017_v41, %v7389_v52  ;;  %v3239_v2 = vadd.bf16 %v3225_v32, %v7441_v62  ;;  %v6484_v60 = vpop.eup %6483  ;;  %v3346_v41 = vpack.i.b16 %v3338_v28, %v3338_v28  ;;  %v7937_v52 = vrot.slane %v3320_v51, %v7146_v40 }
 0x7b7   :  { %v6486_v32 = vpop.eup %6485 }
 0x7b8   :  { %v3046_v44 = vadd.bf16 %v7824_v23, %v3031_v16  ;;  %v3254_v24 = vadd.bf16 %v7471_v56, %v3239_v2  ;;  %v3528_v16 = vcombine.high %v5587_v30, %v5587_v30  ;;  %v3554_v2 = vpack.i.b16 %v3546_v45, %v3546_v45 }
 0x7b9   :  { %v3360_v62 = vrot.slane %v3346_v41, %v7157_v4  ;;  %v3340_v25 = vunpack.i.h.s16 %v7937_v52 }
 0x7ba   :  { %6489 = vtanh.bf16 %v3046_v44  ;;  %v7943_v30 = vrot.slane %v3528_v16, %v7146_v40 }
 0x7bb   :  { %6491 = vtanh.bf16 %v3254_v24  ;;  %v5584_v24 = vpack.i.b16 %v7937_v52, %v7937_v52  ;;  %v3393_v46 = vpack.i.b16 %v3360_v62, %v3360_v62 }
 0x7bc   :  { %5987 = vmatpush3.bf16.xpose.msra.mxu0 %v6478_v29  ;;  %6007 = vmatpush3.bf16.xpose.msra.mxu1 %v6480_v39  ;;  %v3356_v29 = vrot.slane %v5583_v42, %v7157_v4  ;;  %v3564_v39 = vrot.slane %v5588_v43, %v7157_v4  ;;  %v6488_v42 = vpop.eup %6487  ;;  %v3568_v43 = vrot.slane %v3554_v2, %v7157_v4 }
 0x7bd   :  { %5988 = vmatprep.subr.bf16.mxu0 %v8464_v21  ;;  %6008 = vmatprep.subr.bf16.mxu1 %v8464_v21  ;;  %v3364_v51 = vrot.slane %v5584_v24, %v7157_v4  ;;  %v3398_v41 = vrot.slane %v3393_v46, %v7157_v4  ;;  %v3264_v24 = vld [vmem:[#allocation8 + $0xf] sm:$0x1]  ;;  %v3335_v46 = vcombine.high %v7905_v7, %v7905_v7 }
 0x7be   :  { %v3386_v9 = vpack.i.b16 %v3356_v29, %v3356_v29  ;;  %v3594_v57 = vpack.i.b16 %v3564_v39, %v3564_v39  ;;  %v5589_v29 = vpack.i.b16 %v7943_v30, %v7943_v30  ;;  %v3601_v1 = vpack.i.b16 %v3568_v43, %v3568_v43 }
 0x7bf   :  { %v3442_v2 = vadd.bf16 %v3398_v41, %v7512_v6  ;;  %v5585_v41 = vpack.i.b16 %v3335_v46, %v3335_v46 }
 0x7c0   :  { %v3391_v20 = vrot.slane %v3386_v9, %v7157_v4  ;;  %v3548_v9 = vunpack.i.h.s16 %v7943_v30  ;;  %v3606_v16 = vrot.slane %v3601_v1, %v7157_v4  ;;  %v3543_v1 = vcombine.high %v7911_v18, %v7911_v18 }
 0x7c2   :  { %v3441_v56 = vadd.bf16 %v3391_v20, %v7512_v6  ;;  %v3556_v62 = vpack.i.b16 %v3548_v9, %v3548_v9 }
 0x7c4   :  { %5989 = vmatpush3.bf16.xpose.msra.mxu0 %v6482_v33  ;;  %6009 = vmatpush3.bf16.xpose.msra.mxu1 %v6484_v60  ;;  %v3047_v33 = vadd.bf16 %v7824_v23, %v3032_v53  ;;  %v3599_v60 = vrot.slane %v3594_v57, %v7157_v4  ;;  %v3456_v39 = vadd.bf16 %v7595_v14, %v3441_v56  ;;  %v3056_v56 = vld [vmem:[#allocation8 + $0xe] sm:$0x1] }
 0x7c5   :  { %5990 = vmatprep.subr.bf16.mxu0 %v8464_v21  ;;  %6010 = vmatprep.subr.bf16.mxu1 %v8464_v21  ;;  %v6490_v28 = vpop.eup %6489  ;;  %v3650_v57 = vadd.bf16 %v3606_v16, %v7517_v55  ;;  %v5590_v16 = vpack.i.b16 %v3543_v1, %v3543_v1 }
 0x7c6   :  { %6493 = vtanh.bf16 %v3047_v33  ;;  %v3649_v44 = vadd.bf16 %v3599_v60, %v7517_v55  ;;  %v6492_v45 = vpop.eup %6491  ;;  %v3400_v33 = vpack.i.b16 %v3364_v51, %v3364_v51  ;;  %v3457_v60 = vadd.bf16 %v7595_v14, %v3442_v2 }
 0x7c7   :  { %6495 = vtanh.bf16 %v3255_v34  ;;  %v7980_v51 = vpack.c.bf16 %v3264_v24, %v3264_v24 }
 0x7c8   :  { %v3664_v53 = vadd.bf16 %v7667_v22, %v3649_v44  ;;  %6497 = vtanh.bf16 %v3456_v39  ;;  %v3665_v44 = vadd.bf16 %v7667_v22, %v3650_v57 }
 0x7ca   :  { %6499 = vtanh.bf16 %v3664_v53  ;;  %v7977_v53 = vpack.c.bf16 %v3056_v56, %v3056_v56 }
 0x7cb   :  { %6501 = vtanh.bf16 %v3457_v60 }
 0x7cc   :  { %5991 = vmatpush3.bf16.xpose.msra.mxu0 %v6486_v32  ;;  %6011 = vmatpush3.bf16.xpose.msra.mxu1 %v6488_v42  ;;  %v3572_v32 = vrot.slane %v5589_v29, %v7157_v4  ;;  %v3348_v42 = vpack.i.b16 %v3340_v25, %v3340_v25  ;;  %v3405_v29 = vrot.slane %v3400_v33, %v7157_v4  ;;  %6503 = vtanh.bf16 %v3665_v44 }
 0x7cd   :  { %5992 = vmatprep.subr.bf16.mxu0 %v8464_v21  ;;  %6012 = vmatprep.subr.bf16.mxu1 %v8464_v21  ;;  %v3342_v33 = vunpack.i.h.s16 %v3335_v46 }
 0x7ce   :  { %v3608_v20 = vpack.i.b16 %v3572_v32, %v3572_v32  ;;  %v3443_v25 = vadd.bf16 %v3405_v29, %v7512_v6 }
 0x7cf   :  { %v3350_v24 = vpack.i.b16 %v3342_v33, %v3342_v33 }
 0x7d0   :  { %v3613_v39 = vrot.slane %v3608_v20, %v7157_v4  ;;  %v3458_v57 = vadd.bf16 %v7595_v14, %v3443_v25  ;;  %v3550_v20 = vunpack.i.h.s16 %v3543_v1 }
 0x7d1   :  { %v6494_v34 = vpop.eup %6493 }
 0x7d2   :  { %v6496_v43 = vpop.eup %6495  ;;  %v3651_v7 = vadd.bf16 %v3613_v39, %v7517_v55  ;;  %6505 = vtanh.bf16 %v3458_v57  ;;  %v3558_v29 = vpack.i.b16 %v3550_v20, %v3550_v20 }
 0x7d3   :  { %v6498_v32 = vpop.eup %6497 }
 0x7d4   :  { %5993 = vmatpush3.bf16.xpose.msra.mxu0 %v6490_v28  ;;  %6013 = vmatpush3.bf16.xpose.msra.mxu1 %v6492_v45  ;;  %v3368_v28 = vrot.slane %v3348_v42, %v7157_v4  ;;  %v3576_v45 = vrot.slane %v3556_v62, %v7157_v4  ;;  %v3666_v42 = vadd.bf16 %v7667_v22, %v3651_v7 }
 0x7d5   :  { %5994 = vmatprep.subr.bf16.mxu0 %v8464_v21  ;;  %6014 = vmatprep.subr.bf16.mxu1 %v8464_v21  ;;  %v6500_v18 = vpop.eup %6499  ;;  %v3336_v7 = vcombine.high %v7937_v52, %v7937_v52 }
 0x7d6   :  { %v3407_v9 = vpack.i.b16 %v3368_v28, %v3368_v28  ;;  %v3615_v2 = vpack.i.b16 %v3576_v45, %v3576_v45  ;;  %6507 = vtanh.bf16 %v3666_v42  ;;  %v6502_v28 = vpop.eup %6501 }
 0x7d7   :  { %v6504_v39 = vpop.eup %6503  ;;  %v5586_v52 = vpack.i.b16 %v3336_v7, %v3336_v7 }
 0x7d8   :  { %v3412_v62 = vrot.slane %v3407_v9, %v7157_v4  ;;  %v3620_v60 = vrot.slane %v3615_v2, %v7157_v4 }
 0x7da   :  { %v3444_v56 = vadd.bf16 %v3412_v62, %v7512_v6  ;;  %v3652_v44 = vadd.bf16 %v3620_v60, %v7517_v55  ;;  %v3344_v60 = vunpack.i.h.s16 %v3336_v7 }
 0x7dc   :  { %5995 = vmatpush3.bf16.xpose.msra.mxu0 %v6494_v34  ;;  %6015 = vmatpush3.bf16.xpose.msra.mxu1 %v6496_v43  ;;  %v3372_v34 = vrot.slane %v5585_v41, %v7157_v4  ;;  %v3580_v43 = vrot.slane %v5590_v16, %v7157_v4  ;;  %v3459_v1 = vadd.bf16 %v7595_v14, %v3444_v56 }
 0x7dd   :  { %6020 = vmatprep.subr.bf16.mxu0 %v8464_v21  ;;  %6040 = vmatprep.subr.bf16.mxu1 %v8464_v21  ;;  %v3667_v25 = vadd.bf16 %v7667_v22, %v3652_v44  ;;  %v3376_v41 = vrot.slane %v3350_v24, %v7157_v4  ;;  %v3584_v16 = vrot.slane %v3558_v29, %v7157_v4  ;;  %v6506_v33 = vpop.eup %6505 }
 0x7de   :  { %v3414_v46 = vpack.i.b16 %v3372_v34, %v3372_v34  ;;  %v3622_v45 = vpack.i.b16 %v3580_v43, %v3580_v43  ;;  %6509 = vtanh.bf16 %v3459_v1  ;;  %v3380_v56 = vrot.slane %v5586_v52, %v7157_v4 }
 0x7df   :  { %6511 = vtanh.bf16 %v3667_v25  ;;  %v3421_v42 = vpack.i.b16 %v3376_v41, %v3376_v41  ;;  %v3629_v62 = vpack.i.b16 %v3584_v16, %v3584_v16 }
 0x7e0   :  { %v3419_v9 = vrot.slane %v3414_v46, %v7157_v4  ;;  %v3627_v2 = vrot.slane %v3622_v45, %v7157_v4  ;;  %v3428_v1 = vpack.i.b16 %v3380_v56, %v3380_v56 }
 0x7e1   :  { %v6508_v20 = vpop.eup %6507  ;;  %v3426_v44 = vrot.slane %v3421_v42, %v7157_v4 }
 0x7e2   :  { %v3653_v57 = vadd.bf16 %v3627_v2, %v7517_v55 }
 0x7e3   :  { %5997 = vmatmul.mubr.bf16.vlgmr.msra.gmra.mrb[48].mxu0 %v7977_v53  ;;  %6017 = vmatmul.mubr.bf16.vlgmr.msra.gmra.mrb[48].mxu1 %v7980_v51  ;;  %v3446_v29 = vadd.bf16 %v3426_v44, %v7512_v6 }
 0x7e4   :  { %6021 = vmatpush3.bf16.xpose.msra.mxu0 %v6498_v32  ;;  %6041 = vmatpush3.bf16.xpose.msra.mxu1 %v6500_v18  ;;  %v3544_v32 = vcombine.high %v7943_v30, %v7943_v30  ;;  %v3445_v18 = vadd.bf16 %v3419_v9, %v7512_v6  ;;  %v3668_v30 = vadd.bf16 %v7667_v22, %v3653_v57 }
 0x7e5   :  { %6022 = vmatprep.subr.bf16.mxu0 %v8464_v21  ;;  %6042 = vmatprep.subr.bf16.mxu1 %v8464_v21  ;;  %v3461_v16 = vadd.bf16 %v7595_v14, %v3446_v29 }
 0x7e6   :  { %6036 = vmatprep.mubr.msk.bf16.mxu0 %vm6738_vm1, %v8464_v21  ;;  %6056 = vmatprep.mubr.msk.bf16.mxu1 %vm6738_vm1, %v8464_v21  ;;  %v5591_v34 = vpack.i.b16 %v3544_v32, %v3544_v32  ;;  %v3460_v43 = vadd.bf16 %v7595_v14, %v3445_v18  ;;  %v3552_v24 = vunpack.i.h.s16 %v3544_v32  ;;  %v3433_v18 = vrot.slane %v3428_v1, %v7157_v4 }
 0x7e8   :  { %v3588_v46 = vrot.slane %v5591_v34, %v7157_v4  ;;  %6513 = vtanh.bf16 %v3460_v43  ;;  %v3560_v7 = vpack.i.b16 %v3552_v24, %v3552_v24  ;;  %v3447_v42 = vadd.bf16 %v3433_v18, %v7512_v6 }
 0x7e9   :  { %6515 = vtanh.bf16 %v3668_v30  ;;  %v6510_v25 = vpop.eup %6509 }
 0x7ea   :  { %v3636_v41 = vpack.i.b16 %v3588_v46, %v3588_v46  ;;  %v6512_v9 = vpop.eup %6511  ;;  %v3592_v57 = vrot.slane %v3560_v7, %v7157_v4  ;;  %6517 = vtanh.bf16 %v3461_v16  ;;  %v3462_v30 = vadd.bf16 %v7595_v14, %v3447_v42 }
 0x7ec   :  { %6023 = vmatpush3.bf16.xpose.msra.mxu0 %v6502_v28  ;;  %6043 = vmatpush3.bf16.xpose.msra.mxu1 %v6504_v39  ;;  %v3634_v28 = vrot.slane %v3629_v62, %v7157_v4  ;;  %v3352_v39 = vpack.i.b16 %v3344_v60, %v3344_v60  ;;  %v3641_v52 = vrot.slane %v3636_v41, %v7157_v4 }
 0x7ed   :  { %6024 = vmatprep.subr.bf16.mxu0 %v8464_v21  ;;  %6044 = vmatprep.subr.bf16.mxu1 %v8464_v21 }
 0x7ee   :  { %v3654_v45 = vadd.bf16 %v3634_v28, %v7517_v55  ;;  %v3384_v2 = vrot.slane %v3352_v39, %v7157_v4 }
 0x7f0   :  { %v3669_v32 = vadd.bf16 %v7667_v22, %v3654_v45  ;;  %v3435_v34 = vpack.i.b16 %v3384_v2, %v3384_v2  ;;  %v6387_v2 = vld [vmem:[#allocation2 + $0x14] ss:$0 sps:$4 sm:$0xff]  }
 0x7f2   :  { %6519 = vtanh.bf16 %v3669_v32  ;;  %v3440_v56 = vrot.slane %v3435_v34, %v7157_v4  ;;  %v8078_v32 = vld [vmem:[#allocation8 + $0x13] sm:$0x1] }
 0x7f3   :  { %v6514_v62 = vpop.eup %6513  ;;  %6521 = vtanh.bf16 %v3462_v30 }
 0x7f4   :  { %6025 = vmatpush3.bf16.xpose.msra.mxu0 %v6506_v33  ;;  %6045 = vmatpush3.bf16.xpose.msra.mxu1 %v6508_v20  ;;  %v3655_v33 = vadd.bf16 %v3641_v52, %v7517_v55  ;;  %v3643_v20 = vpack.i.b16 %v3592_v57, %v3592_v57  ;;  %v6516_v43 = vpop.eup %6515  ;;  %v3448_v24 = vadd.bf16 %v3440_v56, %v7512_v6 }
 0x7f5   :  { %6026 = vmatprep.subr.bf16.mxu0 %v8464_v21  ;;  %6046 = vmatprep.subr.bf16.mxu1 %v8464_v21  ;;  %v6518_v28 = vpop.eup %6517 }
 0x7f6   :  { %v3670_v60 = vadd.bf16 %v7667_v22, %v3655_v33  ;;  %v3648_v44 = vrot.slane %v3643_v20, %v7157_v4  ;;  %v3463_v45 = vadd.bf16 %v7595_v14, %v3448_v24 }
 0x7f8   :  { %v3656_v46 = vadd.bf16 %v3648_v44, %v7517_v55  ;;  %6523 = vtanh.bf16 %v3670_v60 }
 0x7f9   :  { %6525 = vtanh.bf16 %v3463_v45 }
 0x7fa   :  { %v3671_v39 = vadd.bf16 %v7667_v22, %v3656_v46  ;;  %v3472_v22 = vld [vmem:[#allocation8 + $0x10] sm:$0x1] }
 0x7fb   :  { %v8051_v7 = vpack.c.bf16 %v3472_v22, %v3472_v22 }
 0x7fc   :  { %6027 = vmatpush3.bf16.xpose.msra.mxu0 %v6510_v25  ;;  %6047 = vmatpush3.bf16.xpose.msra.mxu1 %v6512_v9  ;;  %6527 = vtanh.bf16 %v3671_v39  ;;  %v3680_v25 = vld [vmem:[#allocation8 + $0x11] sm:$0x1] }
 0x7fd   :  { %6028 = vmatprep.subr.bf16.mxu0 %v8464_v21  ;;  %6048 = vmatprep.subr.bf16.mxu1 %v8464_v21  ;;  %v6520_v29 = vpop.eup %6519  ;;  %6529 = vtanh.bf16 %v7282_v54  ;;  %v8054_v41 = vpack.c.bf16 %v3680_v25, %v3680_v25 }
 0x7fe   :  { %v6522_v1 = vpop.eup %6521  ;;  %6531 = vtanh.bf16 %v7313_v8 }
 0x7ff   :  { %6533 = vtanh.bf16 %v7285_v0 }
 0x800   :  { %6535 = vtanh.bf16 %v7316_v31 }
 0x801   :  { %6537 = vtanh.bf16 %v7288_v13  ;;  %v8074_v13 = vld [vmem:[%s8433_s6] sm:$0x1] }
 0x802   :  { %6539 = vtanh.bf16 %v7321_v35  ;;  %v8076_v35 = vld [vmem:[#allocation8 + $0x12] sm:$0x1]  ;;  %vm2226_vm5 = vcmp.eq.f32.partialorder %v8074_v13, 0.0  ;;  %v8481_v13 = vld [vmem:[#allocation26_spill] sm:$0xff] }
 0x803   :  { %v6524_v6 = vpop.eup %6523  ;;  %6541 = vtanh.bf16 %v7293_v15  ;;  %v6388_v15 = vld [vmem:[#allocation2 + $0x1c] ss:$0 sps:$4 sm:$0xff]  }
 0x804   :  { %6029 = vmatpush3.bf16.xpose.msra.mxu0 %v6514_v62  ;;  %6049 = vmatpush3.bf16.xpose.msra.mxu1 %v6516_v43  ;;  %v6526_v55 = vpop.eup %6525  ;;  %6543 = vtanh.bf16 %v7324_v37  ;;  %v4130_v43 = vrot.slane %v6387_v2, %v7146_v40 }
 0x805   :  { %6030 = vmatprep.subr.bf16.mxu0 %v8464_v21  ;;  %6050 = vmatprep.subr.bf16.mxu1 %v8464_v21  ;;  %6545 = vtanh.bf16 %v7296_v17  ;;  %v4327_v17 = vrot.slane %v6388_v15, %v7146_v40 }
 0x806   :  { %6547 = vtanh.bf16 %v7327_v38  ;;  %v4131_v22 = vcombine.high %v4130_v43, %v4130_v43 }
 0x807   :  { %v6528_v14 = vpop.eup %6527  ;;  %6549 = vtanh.bf16 %v7299_v50 }
 0x808   :  { %v6530_v54 = vpop.eup %6529  ;;  %6551 = vtanh.bf16 %v7331_v48  ;;  %v8120_v2 = vrot.slane %v4131_v22, %v7146_v40 }
 0x809   :  { %v6532_v8 = vpop.eup %6531  ;;  %6553 = vtanh.bf16 %v7305_v3 }
 0x80a   :  { %v6534_v0 = vpop.eup %6533  ;;  %6555 = vtanh.bf16 %v7334_v49 }
 0x80b   :  { %v6536_v31 = vpop.eup %6535 }
 0x80c   :  { %6031 = vmatpush3.bf16.xpose.msra.mxu0 %v6518_v28  ;;  %6051 = vmatpush3.bf16.xpose.msra.mxu1 %v6520_v29  ;;  %v6538_v9 = vpop.eup %6537  ;;  %v8098_v28 = vrot.slane %v4130_v43, %v7146_v40  ;;  %v8102_v29 = vrot.slane %v4327_v17, %v7146_v40 }
 0x80d   :  { %6032 = vmatprep.subr.bf16.mxu0 %v8464_v21  ;;  %6052 = vmatprep.subr.bf16.mxu1 %v8464_v21  ;;  %v6540_v16 = vpop.eup %6539 }
 0x80e   :  { %v6542_v56 = vpop.eup %6541  ;;  %v5600_v45 = vpack.i.b16 %v8098_v28, %v8098_v28  ;;  %v4346_v50 = vunpack.i.h.s16 %v8102_v29 }
 0x80f   :  { %v6544_v24 = vpop.eup %6543 }
 0x810   :  { %v6546_v39 = vpop.eup %6545 }
 0x814   :  { %6033 = vmatpush3.bf16.xpose.msra.mxu0 %v6522_v1  ;;  %6053 = vmatpush3.bf16.xpose.msra.mxu1 %v6524_v6  ;;  %v5604_v1 = vpack.i.b16 %v8102_v29, %v8102_v29  ;;  %v6548_v6 = vpop.eup %6547 }
 0x815   :  { %6034 = vmatprep.subr.bf16.mxu0 %v8464_v21  ;;  %6054 = vmatprep.subr.bf16.mxu1 %v8464_v21 }
 0x816   :  { %v4364_v48 = vrot.slane %v5604_v1, %v7157_v4 }
 0x81c   :  { %6035 = vmatpush3.bf16.xpose.msra.mxu0 %v6526_v55  ;;  %6055 = vmatpush3.bf16.xpose.msra.mxu1 %v6528_v14  ;;  %v4149_v55 = vunpack.i.h.s16 %v8098_v28  ;;  %v4167_v14 = vrot.slane %v5600_v45, %v7157_v4 }
 0x81d   :  { %6060 = vmatprep.subr.bf16.mxu0 %v8464_v21  ;;  %6080 = vmatprep.subr.bf16.mxu1 %v8464_v21 }
 0x81e   :  { %v4157_v25 = vpack.i.b16 %v4149_v55, %v4149_v55 }
 0x823   :  { %6037 = vmatmul.mubr.bf16.vlgmr.msra.gmra.mrb[52].mxu0 %v8051_v7  ;;  %6057 = vmatmul.mubr.bf16.vlgmr.msra.gmra.mrb[52].mxu1 %v8054_v41 }
 0x824   :  { %6061 = vmatpush3.bf16.xpose.msra.mxu0 %v6530_v54  ;;  %6081 = vmatpush3.bf16.xpose.msra.mxu1 %v6532_v8  ;;  %v4197_v54 = vpack.i.b16 %v4167_v14, %v4167_v14  ;;  %v6550_v8 = vpop.eup %6549 }
 0x825   :  { %6062 = vmatprep.subr.bf16.mxu0 %v8464_v21  ;;  %6082 = vmatprep.subr.bf16.mxu1 %v8464_v21 }
 0x826   :  { %6076 = vmatprep.mubr.msk.bf16.mxu0 %vm6738_vm1, %v8464_v21  ;;  %6096 = vmatprep.mubr.msk.bf16.mxu1 %vm6738_vm1, %v8464_v21  ;;  %v4202_v3 = vrot.slane %v4197_v54, %v7157_v4 }
 0x82c   :  { %6063 = vmatpush3.bf16.xpose.msra.mxu0 %v6534_v0  ;;  %6083 = vmatpush3.bf16.xpose.msra.mxu1 %v6536_v31  ;;  %v4328_v0 = vcombine.high %v4327_v17, %v4327_v17  ;;  %v4354_v31 = vpack.i.b16 %v4346_v50, %v4346_v50 }
 0x82d   :  { %6064 = vmatprep.subr.bf16.mxu0 %v8464_v21  ;;  %6084 = vmatprep.subr.bf16.mxu1 %v8464_v21 }
 0x82e   :  { %v8126_v49 = vrot.slane %v4328_v0, %v7146_v40  ;;  %v4368_v15 = vrot.slane %v4354_v31, %v7157_v4 }
 0x830   :  { %v4348_v1 = vunpack.i.h.s16 %v8126_v49 }
 0x832   :  { %v4356_v54 = vpack.i.b16 %v4348_v1, %v4348_v1 }
 0x834   :  { %6065 = vmatpush3.bf16.xpose.msra.mxu0 %v6538_v9  ;;  %6085 = vmatpush3.bf16.xpose.msra.mxu1 %v6540_v16  ;;  %v4394_v9 = vpack.i.b16 %v4364_v48, %v4364_v48  ;;  %v6552_v16 = vpop.eup %6551 }
 0x835   :  { %6066 = vmatprep.subr.bf16.mxu0 %v8464_v21  ;;  %6086 = vmatprep.subr.bf16.mxu1 %v8464_v21 }
 0x836   :  { %v2261_v18 = vpop.f32.mrb[40].mxu0  ;;  %v2469_v57 = vpop.f32.mrb[40].mxu1 }
 0x837   :  { %v5918_v37 = vpop.f32.mrb[41].mxu0  ;;  %v2262_v52 = vadd.f32 %v2261_v18, %v8076_v35  ;;  %v2470_v42 = vadd.f32 %v2469_v57, %v8078_v32  ;;  %v5938_v34 = vpop.f32.mrb[41].mxu1  ;;  %v4171_v18 = vrot.slane %v4157_v25, %v7157_v4  ;;  %v8465_v57 = vld [vmem:[#allocation11_spill] sm:$0xff] }
 0x838   :  { %v2264_v33 = vpop.f32.mrb[42].mxu0  ;;  %v2472_v20 = vpop.f32.mrb[42].mxu1  ;;  %v4399_v37 = vrot.slane %v4394_v9, %v7157_v4  ;;  %6557 = vtanh.bf16 %v8465_v57  ;;  %v8468_v34 = vld [vmem:[#allocation15_spill] sm:$0xff] }
 0x839   :  { %v5919_v62 = vpop.f32.mrb[43].mxu0  ;;  %v2475_v30 = vsel %vm2226_vm5, -10000.0, %v2470_v42  ;;  %v5939_v60 = vpop.f32.mrb[43].mxu1  ;;  %v2267_v46 = vsel %vm2226_vm5, -10000.0, %v2262_v52  ;;  %v8466_v52 = vld [vmem:[#allocation13_spill] sm:$0xff]  ;;  %v8467_v33 = vld [vmem:[#allocation12_spill] sm:$0xff]  ;;  %v5601_v20 = vpack.i.b16 %v8120_v2, %v8120_v2  ;;  %v4204_v43 = vpack.i.b16 %v4171_v18, %v4171_v18 }
 0x83a   :  { %v5303_v44 = vrot.slane %v2475_v30, 7  ;;  %v4252_v42 = vadd.bf16 %v4202_v3, %v8466_v52  ;;  %6559 = vtanh.bf16 %v8467_v33  ;;  %v4449_v62 = vadd.bf16 %v4399_v37, %v8468_v34  ;;  %v6554_v30 = vpop.eup %6553 }
 0x83b   :  { %v5605_v60 = vpack.i.b16 %v8126_v49, %v8126_v49  ;;  %v6556_v17 = vpop.eup %6555  ;;  %v4175_v45 = vrot.slane %v5601_v20, %v7157_v4  ;;  %v4376_v37 = vrot.slane %v4356_v54, %v7157_v4  ;;  %v4147_v54 = vcombine.high %v8120_v2, %v8120_v2 }
 0x83c   :  { %6067 = vmatpush3.bf16.xpose.msra.mxu0 %v6542_v56  ;;  %v8094_v38 = vsel %vm5344_vm6, %v2267_v46, %v5303_v44  ;;  %6087 = vmatpush3.bf16.xpose.msra.mxu1 %v6544_v24  ;;  %v4401_v56 = vpack.i.b16 %v4368_v15, %v4368_v15  ;;  %v4260_v44 = vadd.bf16 %v4252_v42, %v7538_v58  ;;  %v4151_v46 = vunpack.i.h.s16 %v8120_v2  ;;  %v6390_v2 = vld [vmem:[#allocation2 + $0x24] ss:$0 sps:$4 sm:$0xff]  }
 0x83d   :  { %6068 = vmatprep.subr.bf16.mxu0 %v8464_v21  ;;  %6088 = vmatprep.subr.bf16.mxu1 %v8464_v21  ;;  %v4457_v24 = vadd.bf16 %v4449_v62, %v7546_v61  ;;  %v4211_v22 = vpack.i.b16 %v4175_v45, %v4175_v45  ;;  %v4343_v15 = vcombine.high %v8102_v29, %v8102_v29 }
 0x83e   :  { %v4406_v55 = vrot.slane %v4401_v56, %v7157_v4  ;;  %6561 = vtanh.bf16 %v4260_v44  ;;  %v4159_v48 = vpack.i.b16 %v4151_v46, %v4151_v46 }
 0x83f   :  { %6563 = vtanh.bf16 %v4457_v24  ;;  %v4216_v3 = vrot.slane %v4211_v22, %v7157_v4 }
 0x840   :  { %v4450_v50 = vadd.bf16 %v4406_v55, %v8468_v34  ;;  %v4179_v18 = vrot.slane %v4159_v48, %v7157_v4 }
 0x841   :  { %v4254_v42 = vadd.bf16 %v4216_v3, %v8466_v52 }
 0x842   :  { %v4458_v9 = vadd.bf16 %v4450_v50, %v7546_v61  ;;  %v4218_v62 = vpack.i.b16 %v4179_v18, %v4179_v18 }
 0x843   :  { %v6558_v25 = vpop.eup %6557  ;;  %v4262_v29 = vadd.bf16 %v4254_v42, %v7538_v58 }
 0x844   :  { %6069 = vmatpush3.bf16.xpose.msra.mxu0 %v6546_v39  ;;  %6089 = vmatpush3.bf16.xpose.msra.mxu1 %v6548_v6  ;;  %v4209_v39 = vrot.slane %v4204_v43, %v7157_v4  ;;  %v4372_v6 = vrot.slane %v5605_v60, %v7157_v4  ;;  %v5606_v43 = vpack.i.b16 %v4343_v15, %v4343_v15 }
 0x845   :  { %6070 = vmatprep.subr.bf16.mxu0 %v8464_v21  ;;  %6090 = vmatprep.subr.bf16.mxu1 %v8464_v21  ;;  %v6560_v0 = vpop.eup %6559  ;;  %v4223_v24 = vrot.slane %v4218_v62, %v7157_v4  ;;  %v4155_v62 = vunpack.i.h.s16 %v4147_v54 }
 0x846   :  { %v4253_v14 = vadd.bf16 %v4209_v39, %v8466_v52  ;;  %v4380_v46 = vrot.slane %v5606_v43, %v7157_v4 }
 0x847   :  { %v4255_v45 = vadd.bf16 %v4223_v24, %v8466_v52 }
 0x848   :  { %v4261_v31 = vadd.bf16 %v4253_v14, %v7538_v58  ;;  %v4422_v50 = vpack.i.b16 %v4380_v46, %v4380_v46 }
 0x849   :  { %v6562_v20 = vpop.eup %6561  ;;  %v4263_v22 = vadd.bf16 %v4255_v45, %v7538_v58 }
 0x84a   :  { %6565 = vtanh.bf16 %v4261_v31  ;;  %v6564_v60 = vpop.eup %6563  ;;  %v4344_v31 = vcombine.high %v8126_v49, %v8126_v49 }
 0x84b   :  { %6567 = vtanh.bf16 %v4458_v9 }
 0x84c   :  { %6071 = vmatpush3.bf16.xpose.msra.mxu0 %v6550_v8  ;;  %6091 = vmatpush3.bf16.xpose.msra.mxu1 %v6552_v16  ;;  %v4408_v8 = vpack.i.b16 %v4372_v6, %v4372_v6  ;;  %v4146_v16 = vcombine.high %v8098_v28, %v8098_v28  ;;  %6569 = vtanh.bf16 %v4262_v29  ;;  %v5607_v42 = vpack.i.b16 %v4344_v31, %v4344_v31 }
 0x84d   :  { %6072 = vmatprep.subr.bf16.mxu0 %v8464_v21  ;;  %6092 = vmatprep.subr.bf16.mxu1 %v8464_v21 }
 0x84e   :  { %v4413_v57 = vrot.slane %v4408_v8, %v7157_v4  ;;  %v5602_v28 = vpack.i.b16 %v4146_v16, %v4146_v16  ;;  %v4388_v24 = vrot.slane %v5607_v42, %v7157_v4 }
 0x850   :  { %v4451_v33 = vadd.bf16 %v4413_v57, %v8468_v34  ;;  %v4183_v44 = vrot.slane %v5602_v28, %v7157_v4 }
 0x852   :  { %v4459_v56 = vadd.bf16 %v4451_v33, %v7546_v61  ;;  %v4225_v6 = vpack.i.b16 %v4183_v44, %v4183_v44  ;;  %v4352_v44 = vunpack.i.h.s16 %v4344_v31 }
 0x854   :  { %6073 = vmatpush3.bf16.xpose.msra.mxu0 %v6554_v30  ;;  %6093 = vmatpush3.bf16.xpose.msra.mxu1 %v6556_v17  ;;  %v4415_v30 = vpack.i.b16 %v4376_v37, %v4376_v37  ;;  %v4153_v17 = vunpack.i.h.s16 %v4146_v16  ;;  %6571 = vtanh.bf16 %v4459_v56  ;;  %v4427_v16 = vrot.slane %v4422_v50, %v7157_v4 }
 0x855   :  { %6074 = vmatprep.subr.bf16.mxu0 %v8464_v21  ;;  %6094 = vmatprep.subr.bf16.mxu1 %v8464_v21  ;;  %v6566_v55 = vpop.eup %6565  ;;  %6573 = vtanh.bf16 %v4263_v22 }
 0x856   :  { %v4161_v1 = vpack.i.b16 %v4153_v17, %v4153_v17  ;;  %v6568_v48 = vpop.eup %6567  ;;  %v4453_v3 = vadd.bf16 %v4427_v16, %v8468_v34  ;;  %v4360_v16 = vpack.i.b16 %v4352_v44, %v4352_v44 }
 0x857   :  { %v6570_v57 = vpop.eup %6569 }
 0x858   :  { %v4187_v8 = vrot.slane %v4161_v1, %v7157_v4  ;;  %v4461_v43 = vadd.bf16 %v4453_v3, %v7546_v61 }
 0x85a   :  { %v4232_v37 = vpack.i.b16 %v4187_v8, %v4187_v8 }
 0x85c   :  { %6075 = vmatpush3.bf16.xpose.msra.mxu0 %v6558_v25  ;;  %6095 = vmatpush3.bf16.xpose.msra.mxu1 %v6560_v0  ;;  %v4230_v0 = vrot.slane %v4225_v6, %v7157_v4  ;;  %v4237_v56 = vrot.slane %v4232_v37, %v7157_v4 }
 0x85d   :  { %6100 = vmatprep.subr.bf16.mxu0 %v8464_v21  ;;  %6120 = vmatprep.subr.bf16.mxu1 %v8464_v21 }
 0x85e   :  { %v4256_v18 = vadd.bf16 %v4230_v0, %v8466_v52  ;;  %v4257_v1 = vadd.bf16 %v4237_v56, %v8466_v52 }
 0x85f   :  { %v6572_v28 = vpop.eup %6571 }
 0x860   :  { %v4264_v49 = vadd.bf16 %v4256_v18, %v7538_v58  ;;  %v4436_v18 = vpack.i.b16 %v4388_v24, %v4388_v24 }
 0x863   :  { %6077 = vmatmul.mubr.bf16.vlgmr.msra.gmra.mrb[56].mxu0 %v7714_v5  ;;  %6097 = vmatmul.mubr.bf16.vlgmr.msra.gmra.mrb[56].mxu1 %v7720_v47  ;;  %v4350_v5 = vunpack.i.h.s16 %v4343_v15  ;;  %v4420_v47 = vrot.slane %v4415_v30, %v7157_v4  ;;  %v5603_v15 = vpack.i.b16 %v4147_v54, %v4147_v54  ;;  %v8198_v30 = vld [vmem:[#allocation8 + $0x15] sm:$0x1] }
 0x864   :  { %6101 = vmatpush3.bf16.xpose.msra.mxu0 %v6562_v20  ;;  %6121 = vmatpush3.bf16.xpose.msra.mxu1 %v6564_v60  ;;  %v8195_v20 = vld [vmem:[#allocation8 + $0x14] sm:$0x1]  ;;  %v8202_v60 = vrot.slane %v6390_v2, %v7146_v40 }
 0x865   :  { %6102 = vmatprep.subr.bf16.mxu0 %v8464_v21  ;;  %6122 = vmatprep.subr.bf16.mxu1 %v8464_v21  ;;  %v4452_v39 = vadd.bf16 %v4420_v47, %v8468_v34  ;;  %v4358_v14 = vpack.i.b16 %v4350_v5, %v4350_v5  ;;  %v4191_v29 = vrot.slane %v5603_v15, %v7157_v4 }
 0x866   :  { %6116 = vmatprep.mubr.msk.bf16.mxu0 %vm6738_vm1, %v8464_v21  ;;  %6136 = vmatprep.mubr.msk.bf16.mxu1 %vm6738_vm1, %v8464_v21  ;;  %v4265_v15 = vadd.bf16 %v4257_v1, %v7538_v58 }
 0x867   :  { %v4460_v25 = vadd.bf16 %v4452_v39, %v7546_v61  ;;  %v4384_v9 = vrot.slane %v4358_v14, %v7157_v4  ;;  %v4163_v39 = vpack.i.b16 %v4155_v62, %v4155_v62  ;;  %v4239_v54 = vpack.i.b16 %v4191_v29, %v4191_v29 }
 0x869   :  { %6575 = vtanh.bf16 %v4460_v25  ;;  %v4429_v33 = vpack.i.b16 %v4384_v9, %v4384_v9  ;;  %v6574_v9 = vpop.eup %6573  ;;  %v4244_v62 = vrot.slane %v4239_v54, %v7157_v4 }
 0x86a   :  { %6577 = vtanh.bf16 %v4264_v49  ;;  %v4441_v49 = vrot.slane %v4436_v18, %v7157_v4 }
 0x86b   :  { %v4434_v5 = vrot.slane %v4429_v33, %v7157_v4  ;;  %6579 = vtanh.bf16 %v4461_v43  ;;  %v8227_v33 = vrot.slane %v8202_v60, %v7146_v40  ;;  %v4258_v43 = vadd.bf16 %v4244_v62, %v8466_v52 }
 0x86c   :  { %6103 = vmatpush3.bf16.xpose.msra.mxu0 %v6566_v55  ;;  %6123 = vmatpush3.bf16.xpose.msra.mxu1 %v6568_v48  ;;  %6581 = vtanh.bf16 %v4265_v15  ;;  %v4455_v29 = vadd.bf16 %v4441_v49, %v8468_v34 }
 0x86d   :  { %6104 = vmatprep.subr.bf16.mxu0 %v8464_v21  ;;  %6124 = vmatprep.subr.bf16.mxu1 %v8464_v21  ;;  %v4454_v50 = vadd.bf16 %v4434_v5, %v8468_v34 }
 0x874   :  { %6105 = vmatpush3.bf16.xpose.msra.mxu0 %v6570_v57  ;;  %6125 = vmatpush3.bf16.xpose.msra.mxu1 %v6572_v28  ;;  %v6576_v2 = vpop.eup %6575  ;;  %v4462_v57 = vadd.bf16 %v4454_v50, %v7546_v61  ;;  %v4195_v28 = vrot.slane %v4163_v39, %v7157_v4  ;;  %v4543_v39 = vunpack.i.h.s16 %v8227_v33  ;;  %v4525_v50 = vcombine.high %v8202_v60, %v8202_v60  ;;  %v8469_v60 = vld [vmem:[#allocation14_spill] sm:$0xff] }
 0x875   :  { %6106 = vmatprep.subr.bf16.mxu0 %v8464_v21  ;;  %6126 = vmatprep.subr.bf16.mxu1 %v8464_v21  ;;  %v6578_v44 = vpop.eup %6577 }
 0x876   :  { %v2677_v17 = vpop.f32.mrb[44].mxu0  ;;  %v2885_v45 = vpop.f32.mrb[44].mxu1  ;;  %6583 = vtanh.bf16 %v4462_v57  ;;  %v4246_v56 = vpack.i.b16 %v4195_v28, %v4195_v28  ;;  %v8470_v57 = vld [vmem:[#allocation16_spill] sm:$0xff] }
 0x877   :  { %v2678_v46 = vadd.f32 %v2677_v17, %v8195_v20  ;;  %v5958_v47 = vpop.f32.mrb[45].mxu0  ;;  %v2886_v6 = vadd.f32 %v2885_v45, %v8198_v30  ;;  %v5978_v14 = vpop.f32.mrb[45].mxu1  ;;  %v5608_v17 = vpack.i.b16 %v8227_v33, %v8227_v33 }
 0x878   :  { %v2680_v55 = vpop.f32.mrb[46].mxu0  ;;  %v2888_v25 = vpop.f32.mrb[46].mxu1  ;;  %v4463_v47 = vadd.bf16 %v4455_v29, %v7546_v61  ;;  %v4251_v45 = vrot.slane %v4246_v56, %v7157_v4  ;;  %v4540_v29 = vcombine.high %v8227_v33, %v8227_v33 }
 0x879   :  { %v2683_v48 = vsel %vm2226_vm5, -10000.0, %v2678_v46  ;;  %v5959_v22 = vpop.f32.mrb[47].mxu0  ;;  %v2891_v0 = vsel %vm2226_vm5, -10000.0, %v2886_v6  ;;  %v5979_v31 = vpop.f32.mrb[47].mxu1  ;;  %v4266_v46 = vadd.bf16 %v4258_v43, %v7538_v58  ;;  %v4561_v1 = vrot.slane %v5608_v17, %v7157_v4 }
 0x87a   :  { %v5306_v8 = vrot.slane %v2683_v48, 6  ;;  %v5309_v3 = vrot.slane %v2891_v0, 5  ;;  %v6580_v5 = vpop.eup %6579  ;;  %v4259_v55 = vadd.bf16 %v4251_v45, %v8466_v52  ;;  %v4551_v48 = vpack.i.b16 %v4543_v39, %v4543_v39 }
 0x87b   :  { %6585 = vtanh.bf16 %v4266_v46  ;;  %v4591_v22 = vpack.i.b16 %v4561_v1, %v4561_v1  ;;  %v6582_v25 = vpop.eup %6581  ;;  %v8254_v52 = vrot.slane %v4525_v50, %v7146_v40  ;;  %v4547_v33 = vunpack.i.h.s16 %v4540_v29 }
 0x87c   :  { %v5347_v37 = vsel %vm5346_vm7, %v8094_v38, %v5306_v8  ;;  %6107 = vmatpush3.bf16.xpose.msra.mxu0 %v6574_v9  ;;  %6127 = vmatpush3.bf16.xpose.msra.mxu1 %v6576_v2  ;;  %v4392_v38 = vrot.slane %v4360_v16, %v7157_v4  ;;  %6587 = vtanh.bf16 %v4463_v47  ;;  %v4267_v8 = vadd.bf16 %v4259_v55, %v7538_v58 }
 0x87d   :  { %v8222_v42 = vsel %vm5348_vm8, %v5347_v37, %v5309_v3  ;;  %6108 = vmatprep.subr.bf16.mxu0 %v8464_v21  ;;  %6128 = vmatprep.subr.bf16.mxu1 %v8464_v21  ;;  %v4596_v31 = vrot.slane %v4591_v22, %v7157_v4  ;;  %v5609_v58 = vpack.i.b16 %v8254_v52, %v8254_v52  ;;  %v4545_v40 = vunpack.i.h.s16 %v8254_v52 }
 0x87e   :  { %v4443_v24 = vpack.i.b16 %v4392_v38, %v4392_v38  ;;  %6589 = vtanh.bf16 %v4267_v8  ;;  %v4555_v55 = vpack.i.b16 %v4547_v33, %v4547_v33 }
 0x87f   :  { %v4646_v9 = vadd.bf16 %v4596_v31, %v8469_v60  ;;  %v4569_v2 = vrot.slane %v5609_v58, %v7157_v4  ;;  %v4553_v28 = vpack.i.b16 %v4545_v40, %v4545_v40 }
 0x880   :  { %v4448_v6 = vrot.slane %v4443_v24, %v7157_v4  ;;  %v8471_v24 = vld [vmem:[#allocation17_spill] sm:$0xff] }
 0x881   :  { %v6584_v54 = vpop.eup %6583  ;;  %v4654_v3 = vadd.bf16 %v4646_v9, %v7824_v23  ;;  %v4605_v62 = vpack.i.b16 %v4569_v2, %v4569_v2  ;;  %v4573_v56 = vrot.slane %v4553_v28, %v7157_v4 }
 0x882   :  { %v4456_v14 = vadd.bf16 %v4448_v6, %v8468_v34  ;;  %v4565_v34 = vrot.slane %v4551_v48, %v7157_v4 }
 0x883   :  { %v4610_v17 = vrot.slane %v4605_v62, %v7157_v4  ;;  %v4612_v46 = vpack.i.b16 %v4573_v56, %v4573_v56  ;;  %v8474_v56 = vld [vmem:[#allocation20_spill] sm:$0xff] }
 0x884   :  { %6109 = vmatpush3.bf16.xpose.msra.mxu0 %v6578_v44  ;;  %6129 = vmatpush3.bf16.xpose.msra.mxu1 %v6580_v5  ;;  %v4464_v0 = vadd.bf16 %v4456_v14, %v7546_v61  ;;  %v4598_v61 = vpack.i.b16 %v4565_v34, %v4565_v34  ;;  %v5610_v5 = vpack.i.b16 %v4540_v29, %v4540_v29  ;;  %v8473_v34 = vld [vmem:[#allocation19_spill] sm:$0xff] }
 0x885   :  { %6110 = vmatprep.subr.bf16.mxu0 %v8464_v21  ;;  %6130 = vmatprep.subr.bf16.mxu1 %v8464_v21  ;;  %v4648_v44 = vadd.bf16 %v4610_v17, %v8469_v60  ;;  %v4617_v6 = vrot.slane %v4612_v46, %v7157_v4 }
 0x886   :  { %6591 = vtanh.bf16 %v4464_v0  ;;  %v6586_v16 = vpop.eup %6585  ;;  %v4603_v15 = vrot.slane %v4598_v61, %v7157_v4  ;;  %v4577_v1 = vrot.slane %v5610_v5, %v7157_v4 }
 0x887   :  { %v6588_v18 = vpop.eup %6587  ;;  %6593 = vtanh.bf16 %v4654_v3  ;;  %v4656_v39 = vadd.bf16 %v4648_v44, %v7824_v23  ;;  %v8304_v3 = vld [vmem:[#allocation8 + $0x17] sm:$0x1] }
 0x888   :  { %v4647_v37 = vadd.bf16 %v4603_v15, %v8469_v60  ;;  %6595 = vtanh.bf16 %v8470_v57  ;;  %v4619_v14 = vpack.i.b16 %v4577_v1, %v4577_v1 }
 0x889   :  { %v6590_v38 = vpop.eup %6589 }
 0x88a   :  { %v4655_v43 = vadd.bf16 %v4647_v37, %v7824_v23  ;;  %v4624_v8 = vrot.slane %v4619_v14, %v7157_v4 }
 0x88c   :  { %6111 = vmatpush3.bf16.xpose.msra.mxu0 %v6582_v25  ;;  %6131 = vmatpush3.bf16.xpose.msra.mxu1 %v6584_v54  ;;  %6597 = vtanh.bf16 %v4655_v43  ;;  %v4541_v25 = vcombine.high %v8254_v52, %v8254_v52  ;;  %v4581_v54 = vrot.slane %v4555_v55, %v7157_v4  ;;  %v4650_v0 = vadd.bf16 %v4624_v8, %v8469_v60 }
 0x88d   :  { %6112 = vmatprep.subr.bf16.mxu0 %v8464_v21  ;;  %6132 = vmatprep.subr.bf16.mxu1 %v8464_v21  ;;  %6599 = vtanh.bf16 %v8471_v24 }
 0x88e   :  { %6601 = vtanh.bf16 %v4656_v39  ;;  %v5611_v31 = vpack.i.b16 %v4541_v25, %v4541_v25  ;;  %v4626_v9 = vpack.i.b16 %v4581_v54, %v4581_v54  ;;  %v4549_v52 = vunpack.i.h.s16 %v4541_v25 }
 0x890   :  { %v4585_v40 = vrot.slane %v5611_v31, %v7157_v4  ;;  %v4631_v2 = vrot.slane %v4626_v9, %v7157_v4  ;;  %v4557_v29 = vpack.i.b16 %v4549_v52, %v4549_v52 }
 0x891   :  { %v6592_v49 = vpop.eup %6591 }
 0x892   :  { %v6594_v47 = vpop.eup %6593  ;;  %v4651_v62 = vadd.bf16 %v4631_v2, %v8469_v60  ;;  %v4633_v5 = vpack.i.b16 %v4585_v40, %v4585_v40  ;;  %v4589_v55 = vrot.slane %v4557_v29, %v7157_v4 }
 0x893   :  { %v6596_v45 = vpop.eup %6595 }
 0x894   :  { %6113 = vmatpush3.bf16.xpose.msra.mxu0 %v6586_v16  ;;  %6133 = vmatpush3.bf16.xpose.msra.mxu1 %v6588_v18  ;;  %v4658_v16 = vadd.bf16 %v4650_v0, %v7824_v23  ;;  %v8302_v18 = vld [vmem:[#allocation8 + $0x16] sm:$0x1]  ;;  %v4638_v14 = vrot.slane %v4633_v5, %v7157_v4 }
 0x895   :  { %6114 = vmatprep.subr.bf16.mxu0 %v8464_v21  ;;  %6134 = vmatprep.subr.bf16.mxu1 %v8464_v21 }
 0x897   :  { %v6598_v50 = vpop.eup %6597 }
 0x898   :  { %v6600_v48 = vpop.eup %6599 }
 0x899   :  { %v6602_v58 = vpop.eup %6601 }
 0x89c   :  { %6115 = vmatpush3.bf16.xpose.msra.mxu0 %v6590_v38  ;;  %6135 = vmatpush3.bf16.xpose.msra.mxu1 %v6592_v49 }
 0x89d   :  { %6140 = vmatprep.subr.bf16.mxu0 %v8464_v21  ;;  %6160 = vmatprep.subr.bf16.mxu1 %v8464_v21 }
 0x8a3   :  { %6117 = vmatmul.mubr.bf16.vlgmr.msra.gmra.mrb[60].mxu0 %v7855_v59  ;;  %6137 = vmatmul.mubr.bf16.vlgmr.msra.gmra.mrb[60].mxu1 %v7858_v11  ;;  %v4649_v59 = vadd.bf16 %v4617_v6, %v8469_v60  ;;  %v8472_v11 = vld [vmem:[#allocation18_spill] sm:$0xff]  ;;  %v4659_v6 = vadd.bf16 %v4651_v62, %v7824_v23 }
 0x8a4   :  { %6141 = vmatpush3.bf16.xpose.msra.mxu0 %v6594_v47  ;;  %6161 = vmatpush3.bf16.xpose.msra.mxu1 %v6596_v45  ;;  %6603 = vtanh.bf16 %v8472_v11 }
 0x8a5   :  { %6142 = vmatprep.subr.bf16.mxu0 %v8464_v21  ;;  %6162 = vmatprep.subr.bf16.mxu1 %v8464_v21  ;;  %v4657_v22 = vadd.bf16 %v4649_v59, %v7824_v23 }
 0x8a6   :  { %6156 = vmatprep.mubr.msk.bf16.mxu0 %vm6738_vm1, %v8464_v21  ;;  %6176 = vmatprep.mubr.msk.bf16.mxu1 %vm6738_vm1, %v8464_v21 }
 0x8a7   :  { %6605 = vtanh.bf16 %v4657_v22  ;;  %v4640_v22 = vpack.i.b16 %v4589_v55, %v4589_v55 }
 0x8a8   :  { %6607 = vtanh.bf16 %v8473_v34  ;;  %v8476_v34 = vld [vmem:[#allocation22_spill] sm:$0xff] }
 0x8a9   :  { %6609 = vtanh.bf16 %v4658_v16  ;;  %v4645_v8 = vrot.slane %v4640_v22, %v7157_v4 }
 0x8aa   :  { %6611 = vtanh.bf16 %v8474_v56 }
 0x8ab   :  { %6613 = vtanh.bf16 %v4659_v6  ;;  %v4653_v0 = vadd.bf16 %v4645_v8, %v8469_v60  ;;  %v8483_v6 = vld [vmem:[#allocation27_spill] sm:$0xff] }
 0x8ac   :  { %6143 = vmatpush3.bf16.xpose.msra.mxu0 %v6598_v50  ;;  %6163 = vmatpush3.bf16.xpose.msra.mxu1 %v6600_v48  ;;  %v4652_v50 = vadd.bf16 %v4638_v14, %v8469_v60  ;;  %v8475_v48 = vld [vmem:[#allocation21_spill] sm:$0xff]  ;;  %v8485_v14 = vld [vmem:[#allocation28_spill] sm:$0xff] }
 0x8ad   :  { %6144 = vmatprep.subr.bf16.mxu0 %v8464_v21  ;;  %6164 = vmatprep.subr.bf16.mxu1 %v8464_v21  ;;  %6615 = vtanh.bf16 %v8475_v48 }
 0x8ae   :  { %v4660_v54 = vadd.bf16 %v4652_v50, %v7824_v23  ;;  %v8486_v50 = vld [vmem:[#allocation32_spill] sm:$0xff] }
 0x8af   :  { %v6604_v61 = vpop.eup %6603 }
 0x8b0   :  { %6617 = vtanh.bf16 %v4660_v54  ;;  %v3724_v54 = vld [vmem:[%s8433_s6 + $0x1] sm:$0x1] }
 0x8b1   :  { %6619 = vtanh.bf16 %v8476_v34  ;;  %vm3881_vm13 = vcmp.eq.f32.partialorder %v3724_v54, 0.0 }
 0x8b2   :  { %v6606_v39 = vpop.eup %6605 }
 0x8b3   :  { %v6608_v1 = vpop.eup %6607 }
 0x8b4   :  { %6145 = vmatpush3.bf16.xpose.msra.mxu0 %v6602_v58  ;;  %6165 = vmatpush3.bf16.xpose.msra.mxu1 %v6604_v61  ;;  %v4661_v58 = vadd.bf16 %v4653_v0, %v7824_v23  ;;  %v8477_v61 = vld [vmem:[#allocation23_spill] sm:$0xff] }
 0x8b5   :  { %6146 = vmatprep.subr.bf16.mxu0 %v8464_v21  ;;  %6166 = vmatprep.subr.bf16.mxu1 %v8464_v21 }
 0x8b6   :  { %v3093_v15 = vpop.f32.mrb[48].mxu0  ;;  %v3301_v28 = vpop.f32.mrb[48].mxu1  ;;  %6621 = vtanh.bf16 %v4661_v58 }
 0x8b7   :  { %v3094_v37 = vadd.f32 %v3093_v15, %v8302_v18  ;;  %v5998_v57 = vpop.f32.mrb[49].mxu0  ;;  %v3302_v38 = vadd.f32 %v3301_v28, %v8304_v3  ;;  %v6018_v43 = vpop.f32.mrb[49].mxu1  ;;  %6623 = vtanh.bf16 %v8477_v61 }
 0x8b8   :  { %v3096_v49 = vpop.f32.mrb[50].mxu0  ;;  %v3304_v24 = vpop.f32.mrb[50].mxu1  ;;  %6625 = vtanh.bf16 %v7616_v27  ;;  %v8479_v57 = vld [vmem:[#allocation25_spill] sm:$0xff] }
 0x8b9   :  { %v3099_v17 = vsel %vm2226_vm5, -10000.0, %v3094_v37  ;;  %v5999_v44 = vpop.f32.mrb[51].mxu0  ;;  %v3307_v47 = vsel %vm2226_vm5, -10000.0, %v3302_v38  ;;  %v6019_v45 = vpop.f32.mrb[51].mxu1  ;;  %6627 = vtanh.bf16 %v7691_v63  ;;  %v8478_v63 = vld [vmem:[#allocation24_spill] sm:$0xff]  ;;  %v8480_v38 = vld [vmem:[#allocation29_spill] sm:$0xff] }
 0x8ba   :  { %v5312_v46 = vrot.slane %v3099_v17, 4  ;;  %v5315_v33 = vrot.slane %v3307_v47, 3  ;;  %6629 = vtanh.bf16 %v7619_v19 }
 0x8bb   :  { %6631 = vtanh.bf16 %v7694_v12 }
 0x8bc   :  { %v5351_v59 = vsel %vm5350_vm9, %v8222_v42, %v5312_v46  ;;  %6147 = vmatpush3.bf16.xpose.msra.mxu0 %v6606_v39  ;;  %6167 = vmatpush3.bf16.xpose.msra.mxu1 %v6608_v1  ;;  %v6610_v42 = vpop.eup %6609  ;;  %6633 = vtanh.bf16 %v7622_v10  ;;  %v8364_v10 = vld [vmem:[#allocation8 + $0x19] sm:$0x1]  ;;  %v8482_v39 = vld [vmem:[#allocation30_spill] sm:$0xff] }
 0x8bd   :  { %v8322_v11 = vsel %vm5352_vm10, %v5351_v59, %v5315_v33  ;;  %6148 = vmatprep.subr.bf16.mxu0 %v8464_v21  ;;  %6168 = vmatprep.subr.bf16.mxu1 %v8464_v21  ;;  %v6612_v25 = vpop.eup %6611  ;;  %6635 = vtanh.bf16 %v7697_v36  ;;  %v8484_v59 = vld [vmem:[#allocation31_spill] sm:$0xff] }
 0x8be   :  { %v6614_v31 = vpop.eup %6613  ;;  %6637 = vtanh.bf16 %v8478_v63 }
 0x8bf   :  { %v6616_v9 = vpop.eup %6615  ;;  %6639 = vtanh.bf16 %v7700_v26 }
 0x8c0   :  { %v6618_v4 = vpop.eup %6617  ;;  %6641 = vtanh.bf16 %v8479_v57 }
 0x8c1   :  { %v6620_v16 = vpop.eup %6619  ;;  %6643 = vtanh.bf16 %v8480_v38 }
 0x8c2   :  { %v6622_v23 = vpop.eup %6621  ;;  %6645 = vtanh.bf16 %v8481_v13 }
 0x8c3   :  { %v6624_v60 = vpop.eup %6623  ;;  %6647 = vtanh.bf16 %v8482_v39 }
 0x8c4   :  { %6149 = vmatpush3.bf16.xpose.msra.mxu0 %v6610_v42  ;;  %6169 = vmatpush3.bf16.xpose.msra.mxu1 %v6612_v25  ;;  %v6626_v52 = vpop.eup %6625  ;;  %6649 = vtanh.bf16 %v8483_v6 }
 0x8c5   :  { %6150 = vmatprep.subr.bf16.mxu0 %v8464_v21  ;;  %6170 = vmatprep.subr.bf16.mxu1 %v8464_v21  ;;  %v6628_v40 = vpop.eup %6627  ;;  %6651 = vtanh.bf16 %v8484_v59 }
 0x8c6   :  { %v6630_v27 = vpop.eup %6629  ;;  %6653 = vtanh.bf16 %v8485_v14 }
 0x8c7   :  { %v6632_v19 = vpop.eup %6631  ;;  %6655 = vtanh.bf16 %v8486_v50 }
 0x8c8   :  { %v6634_v12 = vpop.eup %6633 }
 0x8cc   :  { %6151 = vmatpush3.bf16.xpose.msra.mxu0 %v6614_v31  ;;  %6171 = vmatpush3.bf16.xpose.msra.mxu1 %v6616_v9 }
 0x8cd   :  { %6152 = vmatprep.subr.bf16.mxu0 %v8464_v21  ;;  %6172 = vmatprep.subr.bf16.mxu1 %v8464_v21 }
 0x8d4   :  { %6153 = vmatpush3.bf16.xpose.msra.mxu0 %v6618_v4  ;;  %6173 = vmatpush3.bf16.xpose.msra.mxu1 %v6620_v16 }
 0x8d5   :  { %6154 = vmatprep.subr.bf16.mxu0 %v8464_v21  ;;  %6174 = vmatprep.subr.bf16.mxu1 %v8464_v21 }
 0x8dc   :  { %6155 = vmatpush3.bf16.xpose.msra.mxu0 %v6622_v23  ;;  %6175 = vmatpush3.bf16.xpose.msra.mxu1 %v6624_v60 }
 0x8dd   :  { %6180 = vmatprep.subr.bf16.mxu0 %v8464_v21  ;;  %6200 = vmatprep.subr.bf16.mxu1 %v8464_v21 }
 0x8e3   :  { %6157 = vmatmul.mubr.bf16.vlgmr.msra.gmra.mrb[64].mxu0 %v7977_v53  ;;  %6177 = vmatmul.mubr.bf16.vlgmr.msra.gmra.mrb[64].mxu1 %v7980_v51  ;;  %v6636_v53 = vpop.eup %6635  ;;  %v8362_v51 = vld [vmem:[#allocation8 + $0x18] sm:$0x1] }
 0x8e4   :  { %6181 = vmatpush3.bf16.xpose.msra.mxu0 %v6626_v52  ;;  %6201 = vmatpush3.bf16.xpose.msra.mxu1 %v6628_v40  ;;  %v6638_v24 = vpop.eup %6637 }
 0x8e5   :  { %6182 = vmatprep.subr.bf16.mxu0 %v8464_v21  ;;  %6202 = vmatprep.subr.bf16.mxu1 %v8464_v21  ;;  %v6640_v46 = vpop.eup %6639 }
 0x8e6   :  { %6196 = vmatprep.mubr.msk.bf16.mxu0 %vm6738_vm1, %v8464_v21  ;;  %6216 = vmatprep.mubr.msk.bf16.mxu1 %vm6738_vm1, %v8464_v21  ;;  %v6642_v33 = vpop.eup %6641 }
 0x8e7   :  { %v6644_v1 = vpop.eup %6643 }
 0x8ec   :  { %6183 = vmatpush3.bf16.xpose.msra.mxu0 %v6630_v27  ;;  %6203 = vmatpush3.bf16.xpose.msra.mxu1 %v6632_v19 }
 0x8ed   :  { %6184 = vmatprep.subr.bf16.mxu0 %v8464_v21  ;;  %6204 = vmatprep.subr.bf16.mxu1 %v8464_v21 }
 0x8f4   :  { %6185 = vmatpush3.bf16.xpose.msra.mxu0 %v6634_v12  ;;  %6205 = vmatpush3.bf16.xpose.msra.mxu1 %v6636_v53 }
 0x8f5   :  { %6186 = vmatprep.subr.bf16.mxu0 %v8464_v21  ;;  %6206 = vmatprep.subr.bf16.mxu1 %v8464_v21 }
 0x8f6   :  { %v3509_v36 = vpop.f32.mrb[52].mxu0  ;;  %v3717_v37 = vpop.f32.mrb[52].mxu1 }
 0x8f7   :  { %v3510_v2 = vadd.f32 %v3509_v36, %v8362_v51  ;;  %v6038_v15 = vpop.f32.mrb[53].mxu0  ;;  %v3718_v26 = vadd.f32 %v3717_v37, %v8364_v10  ;;  %v6058_v62 = vpop.f32.mrb[53].mxu1 }
 0x8f8   :  { %v3512_v28 = vpop.f32.mrb[54].mxu0  ;;  %v3720_v29 = vpop.f32.mrb[54].mxu1 }
 0x8f9   :  { %v3515_v49 = vsel %vm2226_vm5, -10000.0, %v3510_v2  ;;  %v6039_v43 = vpop.f32.mrb[55].mxu0  ;;  %v3723_v17 = vsel %vm2226_vm5, -10000.0, %v3718_v26  ;;  %v6059_v44 = vpop.f32.mrb[55].mxu1 }
 0x8fa   :  { %v5318_v56 = vrot.slane %v3515_v49, 2  ;;  %v5321_v5 = vrot.slane %v3723_v17, 1 }
 0x8fc   :  { %v5355_v47 = vsel %vm5354_vm11, %v8322_v11, %v5318_v56  ;;  %6187 = vmatpush3.bf16.xpose.msra.mxu0 %v6638_v24  ;;  %6207 = vmatpush3.bf16.xpose.msra.mxu1 %v6640_v46  ;;  %v6646_v11 = vpop.eup %6645 }
 0x8fd   :  { %v5357_v45 = vsel %vm5356_vm12, %v5355_v47, %v5321_v5  ;;  %6188 = vmatprep.subr.bf16.mxu0 %v8464_v21  ;;  %6208 = vmatprep.subr.bf16.mxu1 %v8464_v21  ;;  %v6648_v55 = vpop.eup %6647 }
 0x8fe   :  { %5367 = vst [vmem:[%s8434_s7 + $0x10] sm:$0xff] %v5357_v45  ;;  %v6650_v48 = vpop.eup %6649 }
 0x8ff   :  { %v6652_v22 = vpop.eup %6651 }
 0x900   :  { %v6654_v42 = vpop.eup %6653 }
 0x901   :  { %v6656_v25 = vpop.eup %6655 }
 0x904   :  { %6189 = vmatpush3.bf16.xpose.msra.mxu0 %v6642_v33  ;;  %6209 = vmatpush3.bf16.xpose.msra.mxu1 %v6644_v1 }
 0x905   :  { %6190 = vmatprep.subr.bf16.mxu0 %v8464_v21  ;;  %6210 = vmatprep.subr.bf16.mxu1 %v8464_v21 }
 0x90c   :  { %6191 = vmatpush3.bf16.xpose.msra.mxu0 %v6646_v11  ;;  %6211 = vmatpush3.bf16.xpose.msra.mxu1 %v6648_v55 }
 0x90d   :  { %6192 = vmatprep.subr.bf16.mxu0 %v8464_v21  ;;  %6212 = vmatprep.subr.bf16.mxu1 %v8464_v21 }
 0x914   :  { %6193 = vmatpush3.bf16.xpose.msra.mxu0 %v6650_v48  ;;  %6213 = vmatpush3.bf16.xpose.msra.mxu1 %v6652_v22 }
 0x915   :  { %6194 = vmatprep.subr.bf16.mxu0 %v8464_v21  ;;  %6214 = vmatprep.subr.bf16.mxu1 %v8464_v21 }
 0x91c   :  { %6195 = vmatpush3.bf16.xpose.msra.mxu0 %v6654_v42  ;;  %6215 = vmatpush3.bf16.xpose.msra.mxu1 %v6656_v25 }
 0x923   :  { %6197 = vmatmul.mubr.bf16.vlgmr.msra.gmra.mrb[68].mxu0 %v8051_v7  ;;  %6217 = vmatmul.mubr.bf16.vlgmr.msra.gmra.mrb[68].mxu1 %v8054_v41 }
 0x936   :  { %v3916_v8 = vpop.f32.mrb[56].mxu0  ;;  %v4113_v34 = vpop.f32.mrb[56].mxu1 }
 0x937   :  { %v6078_v0 = vpop.f32.mrb[57].mxu0  ;;  %v3917_v31 = vadd.f32 %v3916_v8, %v8076_v35  ;;  %v4114_v21 = vadd.f32 %v4113_v34, %v8078_v32  ;;  %v6098_v58 = vpop.f32.mrb[57].mxu1 }
 0x938   :  { %v3919_v9 = vpop.f32.mrb[58].mxu0  ;;  %v4116_v4 = vpop.f32.mrb[58].mxu1 }
 0x939   :  { %v6079_v61 = vpop.f32.mrb[59].mxu0  ;;  %v4119_v7 = vsel %vm3881_vm13, -10000.0, %v4114_v21  ;;  %v6099_v16 = vpop.f32.mrb[59].mxu1  ;;  %v3922_v23 = vsel %vm3881_vm13, -10000.0, %v3917_v31 }
 0x93a   :  { %v5324_v41 = vrot.slane %v4119_v7, 7 }
 0x93c   :  { %v5358_v60 = vsel %vm5344_vm6, %v3922_v23, %v5324_v41 }
 0x976   :  { %v4310_v52 = vpop.f32.mrb[60].mxu0  ;;  %v4507_v19 = vpop.f32.mrb[60].mxu1 }
 0x977   :  { %v4311_v40 = vadd.f32 %v4310_v52, %v8195_v20  ;;  %v6118_v27 = vpop.f32.mrb[61].mxu0  ;;  %v4508_v35 = vadd.f32 %v4507_v19, %v8198_v30  ;;  %v6138_v63 = vpop.f32.mrb[61].mxu1 }
 0x978   :  { %v4313_v32 = vpop.f32.mrb[62].mxu0  ;;  %v4510_v36 = vpop.f32.mrb[62].mxu1 }
 0x979   :  { %v4316_v12 = vsel %vm3881_vm13, -10000.0, %v4311_v40  ;;  %v6119_v53 = vpop.f32.mrb[63].mxu0  ;;  %v4513_v15 = vsel %vm3881_vm13, -10000.0, %v4508_v35  ;;  %v6139_v37 = vpop.f32.mrb[63].mxu1 }
 0x97a   :  { %v5327_v2 = vrot.slane %v4316_v12, 6  ;;  %v5330_v57 = vrot.slane %v4513_v15, 5 }
 0x97c   :  { %v5359_v26 = vsel %vm5346_vm7, %v5358_v60, %v5327_v2 }
 0x97d   :  { %v5360_v28 = vsel %vm5348_vm8, %v5359_v26, %v5330_v57 }
 0x9b6   :  { %v4704_v20 = vpop.f32.mrb[64].mxu0  ;;  %v4901_v30 = vpop.f32.mrb[64].mxu1 }
 0x9b7   :  { %v4705_v62 = vadd.f32 %v4704_v20, %v8302_v18  ;;  %v6158_v38 = vpop.f32.mrb[65].mxu0  ;;  %v4902_v49 = vadd.f32 %v4901_v30, %v8304_v3  ;;  %v6178_v29 = vpop.f32.mrb[65].mxu1 }
 0x9b8   :  { %v4707_v43 = vpop.f32.mrb[66].mxu0  ;;  %v4904_v44 = vpop.f32.mrb[66].mxu1 }
 0x9b9   :  { %v4710_v56 = vsel %vm3881_vm13, -10000.0, %v4705_v62  ;;  %v6159_v17 = vpop.f32.mrb[67].mxu0  ;;  %v4907_v5 = vsel %vm3881_vm13, -10000.0, %v4902_v49  ;;  %v6179_v46 = vpop.f32.mrb[67].mxu1 }
 0x9ba   :  { %v5333_v24 = vrot.slane %v4710_v56, 4  ;;  %v5336_v47 = vrot.slane %v4907_v5, 3 }
 0x9bc   :  { %v5361_v45 = vsel %vm5350_vm9, %v5360_v28, %v5333_v24 }
 0x9bd   :  { %v5362_v13 = vsel %vm5352_vm10, %v5361_v45, %v5336_v47 }
 0x9f6   :  { %v5098_v18 = vpop.f32.mrb[68].mxu0  ;;  %v5295_v3 = vpop.f32.mrb[68].mxu1 }
 0x9f7   :  { %v5099_v39 = vadd.f32 %v5098_v18, %v8362_v51  ;;  %v6198_v33 = vpop.f32.mrb[69].mxu0  ;;  %v5296_v1 = vadd.f32 %v5295_v3, %v8364_v10  ;;  %v6218_v59 = vpop.f32.mrb[69].mxu1 }
 0x9f8   :  { %v5101_v6 = vpop.f32.mrb[70].mxu0  ;;  %v5298_v14 = vpop.f32.mrb[70].mxu1 }
 0x9f9   :  { %v5104_v11 = vsel %vm3881_vm13, -10000.0, %v5099_v39  ;;  %v6199_v55 = vpop.f32.mrb[71].mxu0  ;;  %v5301_v48 = vsel %vm3881_vm13, -10000.0, %v5296_v1  ;;  %v6219_v22 = vpop.f32.mrb[71].mxu1 }
 0x9fa   :  { %v5339_v50 = vrot.slane %v5104_v11, 2  ;;  %v5342_v42 = vrot.slane %v5301_v48, 1 }
 0x9fc   :  { %v5363_v25 = vsel %vm5354_vm11, %v5362_v13, %v5339_v50 }
 0x9fd   :  { %v5364_v8 = vsel %vm5356_vm12, %v5363_v25, %v5342_v42 }
 0x9fe   :  { %5368 = vst [vmem:[%s8434_s7 + $0x18] sm:$0xff] %v5364_v8 }
 0x9ff   :  { %5373 = vsyncpa [#allocation5], 1 }
 0xa00   :  { %5374 = vsyncpa [#allocation7], 1 }

</bundles_post_ra>
